<compile_context>
chip_gen: v5e
topology: v5e:2x2
jax: 0.10.0
libtpu: 0.0.40
codegen_flags: <defaults>
</compile_context>

<pallas_src>
import jax
import jax.numpy as jnp
import numpy as np
from jax.experimental import pallas as pl
from jax.experimental.pallas import tpu as pltpu


# ----------------------------------------------------------------------------
# helpers
# ----------------------------------------------------------------------------
def _chunk(t, max_chunk=8):
    """Largest divisor of t that is <= max_chunk (time-chunk for the recurrence)."""
    for c in range(min(t, max_chunk), 0, -1):
        if t % c == 0:
            return c
    return 1


def _row_tile(n, target=256):
    """Row tile for the projection matmul: full if small, else a /8 divisor."""
    if n <= target:
        return n
    best = None
    for t in range(8, target + 1, 8):
        if n % t == 0:
            best = t
    return best if best is not None else n


# ----------------------------------------------------------------------------
# 1) Input projection: gates_x = x @ W_ih^T + b for both directions at once.
# ----------------------------------------------------------------------------
def _proj2_kernel(x_ref, wf_ref, wb_ref, bf_ref, bb_ref, of_ref, ob_ref):
    x = x_ref[...]                                             # (TN, D) bf16
    of_ref[...] = (jnp.dot(x, wf_ref[...], preferred_element_type=jnp.float32)
                   + bf_ref[...]).astype(of_ref.dtype)
    ob_ref[...] = (jnp.dot(x, wb_ref[...], preferred_element_type=jnp.float32)
                   + bb_ref[...]).astype(ob_ref.dtype)


def lstm_input_proj(x2d, p):
    """x2d: (N, D) bf16 -> (gates_fwd, gates_bwd), each (N, 4H) f32."""
    n, d = x2d.shape
    h4 = p["wih_f"].shape[1]
    tn = _row_tile(n)
    spec_x = pl.BlockSpec((tn, d), lambda i: (i, 0))
    spec_w = pl.BlockSpec((d, h4), lambda i: (0, 0))
    spec_b = pl.BlockSpec((1, h4), lambda i: (0, 0))
    spec_o = pl.BlockSpec((tn, h4), lambda i: (i, 0))
    return pl.pallas_call(
        _proj2_kernel,
        out_shape=(jax.ShapeDtypeStruct((n, h4), jnp.float32),
                   jax.ShapeDtypeStruct((n, h4), jnp.float32)),
        grid=(n // tn,),
        in_specs=[spec_x, spec_w, spec_w, spec_b, spec_b],
        out_specs=(spec_o, spec_o),
        compiler_params=pltpu.CompilerParams(dimension_semantics=("parallel",)),
    )(x2d, p["wih_f"], p["wih_b"], p["bias_f"], p["bias_b"])


# ----------------------------------------------------------------------------
# 2) Fused bidirectional recurrence (only h @ W_hh^T left inside the loop).
#    Gate layout after prepare_params is (i, f, o, g).
# ----------------------------------------------------------------------------
def _bilstm_kernel(gxf_ref, gxb_ref, whf_ref, whb_ref,
                   hf_ref, hb_ref, hfs, cfs, hbs, cbs):
    c = pl.program_id(0)

    @pl.when(c == 0)
    def _():
        hfs[...] = jnp.zeros_like(hfs)
        cfs[...] = jnp.zeros_like(cfs)
        hbs[...] = jnp.zeros_like(hbs)
        cbs[...] = jnp.zeros_like(cbs)

    tc = gxf_ref.shape[0]
    h_dim = whf_ref.shape[0]

    def cell(gates_x, h, cst, w_ref):
        g = gates_x + jnp.dot(h.astype(w_ref.dtype), w_ref[...],
                              preferred_element_type=jnp.float32)     # (B, 4H)
        act = jax.nn.sigmoid(g[:, :3 * h_dim])                        # i, f, o slab
        i = act[:, :h_dim]
        f = act[:, h_dim:2 * h_dim]
        o = act[:, 2 * h_dim:]
        gg = jnp.tanh(g[:, 3 * h_dim:])                               # g slab
        cst = f * cst + i * gg
        h = o * jnp.tanh(cst)
        return h, cst

    def body(j, carry):
        # forward direction: local time j of chunk c
        h, cs = cell(gxf_ref[j], hfs[...], cfs[...], whf_ref)
        hfs[...] = h
        cfs[...] = cs
        hf_ref[j] = h.astype(hf_ref.dtype)
        # backward direction: local time (Tc-1-j) of chunk (nc-1-c)
        jr = tc - 1 - j
        h, cs = cell(gxb_ref[jr], hbs[...], cbs[...], whb_ref)
        hbs[...] = h
        cbs[...] = cs
        hb_ref[jr] = h.astype(hb_ref.dtype)
        return carry

    jax.lax.fori_loop(0, tc, body, 0, unroll=True)


def bilstm_recurrence(gx_f, gx_b, p, max_chunk=8):
    """gx_f / gx_b: (T, B, 4H) f32 gate pre-activations (x-projection + bias).
       Returns (h_fwd, h_bwd), each (T, B, H) bf16."""
    t, b, h4 = gx_f.shape
    h = h4 // 4
    tc = _chunk(t, max_chunk)
    nc = t // tc
    return pl.pallas_call(
        _bilstm_kernel,
        out_shape=(jax.ShapeDtypeStruct((t, b, h), jnp.bfloat16),
                   jax.ShapeDtypeStruct((t, b, h), jnp.bfloat16)),
        grid_spec=pltpu.PrefetchScalarGridSpec(
            num_scalar_prefetch=0,
            grid=(nc,),
            in_specs=[
                pl.BlockSpec((tc, b, h4), lambda c: (c, 0, 0)),           # fwd gates
                pl.BlockSpec((tc, b, h4), lambda c: (nc - 1 - c, 0, 0)),  # bwd gates
                pl.BlockSpec((h, h4), lambda c: (0, 0)),                  # W_hh fwd (pre-T)
                pl.BlockSpec((h, h4), lambda c: (0, 0)),                  # W_hh bwd (pre-T)
            ],
            out_specs=(
                pl.BlockSpec((tc, b, h), lambda c: (c, 0, 0)),
                pl.BlockSpec((tc, b, h), lambda c: (nc - 1 - c, 0, 0)),
            ),
            scratch_shapes=[
                pltpu.VMEM((b, h), jnp.float32),   # h fwd
                pltpu.VMEM((b, h), jnp.float32),   # c fwd
                pltpu.VMEM((b, h), jnp.float32),   # h bwd
                pltpu.VMEM((b, h), jnp.float32),   # c bwd
            ],
        ),
        compiler_params=pltpu.CompilerParams(dimension_semantics=("arbitrary",)),
    )(gx_f, gx_b, p["whh_f"], p["whh_b"])


# ----------------------------------------------------------------------------
# 3) Fused FC + transpose-to-(S,C,F) + LayerNorm(frames) + residual add.
#    One sample per grid step; grid marked "parallel".
# ----------------------------------------------------------------------------
def _fc_ln_add_kernel(hf_ref, hb_ref, w1_ref, w2_ref, b_ref, res_ref, o_ref):
    hf = hf_ref[0]                                             # (F, H) bf16
    hb = hb_ref[0]                                             # (F, H) bf16
    y = (jnp.dot(hf, w1_ref[...], preferred_element_type=jnp.float32)
         + jnp.dot(hb, w2_ref[...], preferred_element_type=jnp.float32)
         + b_ref[...])                                         # (F, C) f32
    # LayerNorm over frames (axis 0 here), weight=1 / bias=0 / eps=1e-5.
    mean = jnp.mean(y, axis=0, keepdims=True)
    var = jnp.mean(jnp.square(y - mean), axis=0, keepdims=True)
    yn = (y - mean) * jax.lax.rsqrt(var + 1e-5)                # (F, C)
    out = yn.T + res_ref[0]                                    # (C, F) + residual
    o_ref[0] = out.astype(o_ref.dtype)


def fc_ln_residual(hf, hb, residual, p):
    """hf / hb: (S, F, H) bf16; residual: (S, C, F) f32 -> (S, C, F) f32."""
    s, f, h = hf.shape
    c = p["fc_w1"].shape[1]
    return pl.pallas_call(
        _fc_ln_add_kernel,
        out_shape=jax.ShapeDtypeStruct((s, c, f), residual.dtype),
        grid=(s,),
        in_specs=[
            pl.BlockSpec((1, f, h), lambda i: (i, 0, 0)),
            pl.BlockSpec((1, f, h), lambda i: (i, 0, 0)),
            pl.BlockSpec((h, c), lambda i: (0, 0)),
            pl.BlockSpec((h, c), lambda i: (0, 0)),
            pl.BlockSpec((1, c), lambda i: (0, 0)),
            pl.BlockSpec((1, c, f), lambda i: (i, 0, 0)),
        ],
        out_specs=pl.BlockSpec((1, c, f), lambda i: (i, 0, 0)),
        compiler_params=pltpu.CompilerParams(dimension_semantics=("parallel",)),
    )(hf, hb, p["fc_w1"], p["fc_w2"], p["fc_b"], residual)


# ----------------------------------------------------------------------------
# DPRNNBlock.forward
# ----------------------------------------------------------------------------
def dprnn_block_forward(x, prep):
    s, c, f = x.shape
    h = c // 2
    p_intra, p_inter = prep["intra"], prep["inter"]

    # ---- intra path: LSTM over frames (time=F, batch=S) ----
    x_t = jnp.transpose(x, (2, 0, 1))                              # (F, S, C)
    gf, gb = lstm_input_proj(x_t.reshape(f * s, c).astype(jnp.bfloat16), p_intra)
    hf, hb = bilstm_recurrence(gf.reshape(f, s, 4 * h),
                               gb.reshape(f, s, 4 * h), p_intra)   # (F, S, H) each
    hf = jnp.transpose(hf, (1, 0, 2))                              # (S, F, H)
    hb = jnp.transpose(hb, (1, 0, 2))
    intra_out = fc_ln_residual(hf, hb, x, p_intra)                 # (S, C, F)

    # ---- inter path: LSTM over samples (time=S, batch=F) ----
    y_t = jnp.transpose(intra_out, (0, 2, 1))                      # (S, F, C)
    gf, gb = lstm_input_proj(y_t.reshape(s * f, c).astype(jnp.bfloat16), p_inter)
    hf, hb = bilstm_recurrence(gf.reshape(s, f, 4 * h),
                               gb.reshape(s, f, 4 * h), p_inter)   # (S, F, H) each
    return fc_ln_residual(hf, hb, intra_out, p_inter)              # (S, C, F)


# ----------------------------------------------------------------------------
# Parameter init (PyTorch layout) + one-time preparation for the kernels.
# ----------------------------------------------------------------------------
def init_params(key, input_size):
    h = input_size // 2
    k_lstm = 1.0 / np.sqrt(h)
    k_fc = 1.0 / np.sqrt(input_size)

    def u(k, shape, bound):
        return jax.random.uniform(k, shape, jnp.float32, -bound, bound)

    keys = jax.random.split(key, 20)

    def lstm_params(ks):
        return {
            "w_ih_f": u(ks[0], (4 * h, input_size), k_lstm),
            "w_hh_f": u(ks[1], (4 * h, h), k_lstm),
            "b_f": u(ks[2], (1, 4 * h), k_lstm) + u(ks[3], (1, 4 * h), k_lstm),
            "w_ih_r": u(ks[4], (4 * h, input_size), k_lstm),
            "w_hh_r": u(ks[5], (4 * h, h), k_lstm),
            "b_r": u(ks[6], (1, 4 * h), k_lstm) + u(ks[7], (1, 4 * h), k_lstm),
        }

    return {
        "intra_rnn": lstm_params(keys[0:8]),
        "inter_rnn": lstm_params(keys[8:16]),
        "intra_fc_w": u(keys[16], (input_size, input_size), k_fc),
        "intra_fc_b": u(keys[17], (1, input_size), k_fc),
        "inter_fc_w": u(keys[18], (input_size, input_size), k_fc),
        "inter_fc_b": u(keys[19], (1, input_size), k_fc),
    }


def _reorder_ifog(a, axis):
    """PyTorch gate order (i,f,g,o) -> kernel order (i,f,o,g) along `axis`."""
    h = a.shape[axis] // 4
    sl = lambda s_, e_: jax.lax.slice_in_dim(a, s_, e_, axis=axis)
    return jnp.concatenate([sl(0, 2 * h), sl(3 * h, 4 * h), sl(2 * h, 3 * h)],
                           axis=axis)


def prepare_params(params):
    """Pre-transpose, gate-reorder and bf16-cast weights once (no in-kernel .T)."""
    c = params["intra_fc_w"].shape[0]
    h = c // 2

    def prep_lstm(p):
        wt = lambda w: _reorder_ifog(w, 0).T.astype(jnp.bfloat16)
        return {
            "wih_f": wt(p["w_ih_f"]), "wih_b": wt(p["w_ih_r"]),     # (D, 4H)
            "whh_f": wt(p["w_hh_f"]), "whh_b": wt(p["w_hh_r"]),     # (H, 4H)
            "bias_f": _reorder_ifog(p["b_f"], 1).astype(jnp.float32),
            "bias_b": _reorder_ifog(p["b_r"], 1).astype(jnp.float32),
        }

    def prep_fc(w, b):
        return {"fc_w1": w[:, :h].T.astype(jnp.bfloat16),           # (H, C)
                "fc_w2": w[:, h:].T.astype(jnp.bfloat16),           # (H, C)
                "fc_b": b.astype(jnp.float32)}                      # (1, C)

    return {
        "intra": {**prep_lstm(params["intra_rnn"]),
                  **prep_fc(params["intra_fc_w"], params["intra_fc_b"])},
        "inter": {**prep_lstm(params["inter_rnn"]),
                  **prep_fc(params["inter_fc_w"], params["inter_fc_b"])},
    }


# ----------------------------------------------------------------------------
# Pure-JAX reference (mirrors the PyTorch forward, with the same bf16-MXU /
# f32-accumulate precision policy as the kernels) for a correctness check.
# ----------------------------------------------------------------------------
def _lstm_ref_uni(x, w_ih, w_hh, b):
    t, bsz, d = x.shape
    h_dim = w_hh.shape[1]
    wih = w_ih.astype(jnp.bfloat16)
    whh = w_hh.astype(jnp.bfloat16)
    gx = (jnp.dot(x.reshape(t * bsz, d).astype(jnp.bfloat16), wih.T,
                  preferred_element_type=jnp.float32).reshape(t, bsz, 4 * h_dim)
          + b)

    def step(carry, g_x):
        h, cst = carry
        g = g_x + jnp.dot(h.astype(jnp.bfloat16), whh.T,
                          preferred_element_type=jnp.float32)
        i = jax.nn.sigmoid(g[:, 0:h_dim])
        f = jax.nn.sigmoid(g[:, h_dim:2 * h_dim])
        gg = jnp.tanh(g[:, 2 * h_dim:3 * h_dim])
        o = jax.nn.sigmoid(g[:, 3 * h_dim:4 * h_dim])
        cst = f * cst + i * gg
        h = o * jnp.tanh(cst)
        return (h, cst), h.astype(jnp.bfloat16)

    init = (jnp.zeros((bsz, h_dim), jnp.float32),
            jnp.zeros((bsz, h_dim), jnp.float32))
    _, hs = jax.lax.scan(step, init, gx)
    return hs


def _bilstm_ref(x, p):
    hf = _lstm_ref_uni(x, p["w_ih_f"], p["w_hh_f"], p["b_f"])
    hb = _lstm_ref_uni(x[::-1], p["w_ih_r"], p["w_hh_r"], p["b_r"])[::-1]
    return jnp.concatenate([hf, hb], axis=-1)


def _fc_ref(hcat, w, b):
    c = hcat.shape[-1]
    return (jnp.dot(hcat.reshape(-1, c).astype(jnp.bfloat16),
                    w.astype(jnp.bfloat16).T,
                    preferred_element_type=jnp.float32) + b)


def _ln_ref(a):
    m = jnp.mean(a, axis=-1, keepdims=True)
    v = jnp.mean(jnp.square(a - m), axis=-1, keepdims=True)
    return (a - m) * jax.lax.rsqrt(v + 1e-5)


def dprnn_block_ref(x, params):
    s, c, f = x.shape
    xi = jnp.transpose(x, (2, 0, 1))                               # (F, S, C)
    h = _bilstm_ref(xi, params["intra_rnn"])
    y = _fc_ref(h, params["intra_fc_w"], params["intra_fc_b"]).reshape(f, s, c)
    intra_out = _ln_ref(jnp.transpose(y, (1, 2, 0))) + x           # (S, C, F)
    xe = jnp.transpose(intra_out, (0, 2, 1))                       # (S, F, C)
    h = _bilstm_ref(xe, params["inter_rnn"])
    y = _fc_ref(h, params["inter_fc_w"], params["inter_fc_b"]).reshape(s, f, c)
    return _ln_ref(jnp.transpose(y, (0, 2, 1))) + intra_out


if __name__ == "__main__":
    # Small shapes consistent with the module: (n_samples, n_channels, n_frames)
    n_samples, input_size, n_frames = 4, 32, 16
    key = jax.random.PRNGKey(0)
    kx, kp = jax.random.split(key)
    x = jax.random.normal(kx, (n_samples, input_size, n_frames), jnp.float32)
    params = init_params(kp, input_size)
    prep = prepare_params(params)

    out = jax.block_until_ready(jax.jit(dprnn_block_forward)(x, prep))
    ref = jax.block_until_ready(jax.jit(dprnn_block_ref)(x, params))

    assert out.shape == (n_samples, input_size, n_frames)
    np.testing.assert_allclose(np.asarray(out), np.asarray(ref),
                               rtol=5e-3, atol=5e-3)
    print("KERNEL_OK")
</pallas_src>

<mosaic_0001>
module attributes {stable_mosaic.version = 11 : i64} {
  func.func @_proj2_kernel(%arg0: i32, %arg1: memref<64x32xbf16, #tpu.memory_space<vmem>>, %arg2: memref<32x64xbf16, #tpu.memory_space<vmem>>, %arg3: memref<32x64xbf16, #tpu.memory_space<vmem>>, %arg4: memref<1x64xf32, #tpu.memory_space<vmem>>, %arg5: memref<1x64xf32, #tpu.memory_space<vmem>>, %arg6: memref<64x64xf32, #tpu.memory_space<vmem>>, %arg7: memref<64x64xf32, #tpu.memory_space<vmem>>) attributes {dimension_semantics = [#tpu.dimension_semantics<parallel>], iteration_bounds = array<i64: 1>, scalar_prefetch = 0 : i64, scratch_operands = 0 : i64, tpu.core_type = #tpu.core_type<tc>, window_params = [{transform_indices = @transform_0, window_bounds = array<i64: 64, 32>}, {pipeline_mode = #tpu.pipeline_mode<synchronous>, transform_indices = @transform_1, window_bounds = array<i64: 32, 64>}, {pipeline_mode = #tpu.pipeline_mode<synchronous>, transform_indices = @transform_2, window_bounds = array<i64: 32, 64>}, {pipeline_mode = #tpu.pipeline_mode<synchronous>, transform_indices = @transform_3, window_bounds = array<i64: 1, 64>}, {pipeline_mode = #tpu.pipeline_mode<synchronous>, transform_indices = @transform_4, window_bounds = array<i64: 1, 64>}, {transform_indices = @transform_5, window_bounds = array<i64: 64, 64>}, {transform_indices = @transform_6, window_bounds = array<i64: 64, 64>}]} {
    %c0 = arith.constant 0 : index
    %c0_0 = arith.constant 0 : index
    %0 = vector.load %arg1[%c0, %c0_0] : memref<64x32xbf16, #tpu.memory_space<vmem>>, vector<64x32xbf16>
    %c0_1 = arith.constant 0 : index
    %c0_2 = arith.constant 0 : index
    %1 = vector.load %arg2[%c0_1, %c0_2] : memref<32x64xbf16, #tpu.memory_space<vmem>>, vector<32x64xbf16>
    %cst = arith.constant dense<0.000000e+00> : vector<64x64xf32>
    %2 = tpu.matmul %0, %1, %cst {dimension_numbers = #tpu.dot_dimension_numbers<[1], [0], [0], [1], [0, 0, 1, 1], [], []>} : vector<64x32xbf16>, vector<32x64xbf16>, vector<64x64xf32> -> vector<64x64xf32>
    %c0_3 = arith.constant 0 : index
    %c0_4 = arith.constant 0 : index
    %3 = vector.load %arg4[%c0_3, %c0_4] : memref<1x64xf32, #tpu.memory_space<vmem>>, vector<1x64xf32>
    %4 = vector.broadcast %3 : vector<1x64xf32> to vector<64x64xf32>
    %5 = arith.addf %2, %4 : vector<64x64xf32>
    %c0_5 = arith.constant 0 : index
    %c0_6 = arith.constant 0 : index
    %6 = vector.load %arg6[%c0_5, %c0_6] : memref<64x64xf32, #tpu.memory_space<vmem>>, vector<64x64xf32>
    tpu.vector_store %arg6[%c0_5, %c0_6], %5 {strides = array<i32>} : memref<64x64xf32, #tpu.memory_space<vmem>>, vector<64x64xf32>,
    %c0_7 = arith.constant 0 : index
    %c0_8 = arith.constant 0 : index
    %7 = vector.load %arg3[%c0_7, %c0_8] : memref<32x64xbf16, #tpu.memory_space<vmem>>, vector<32x64xbf16>
    %cst_9 = arith.constant dense<0.000000e+00> : vector<64x64xf32>
    %8 = tpu.matmul %0, %7, %cst_9 {dimension_numbers = #tpu.dot_dimension_numbers<[1], [0], [0], [1], [0, 0, 1, 1], [], []>} : vector<64x32xbf16>, vector<32x64xbf16>, vector<64x64xf32> -> vector<64x64xf32>
    %c0_10 = arith.constant 0 : index
    %c0_11 = arith.constant 0 : index
    %9 = vector.load %arg5[%c0_10, %c0_11] : memref<1x64xf32, #tpu.memory_space<vmem>>, vector<1x64xf32>
    %10 = vector.broadcast %9 : vector<1x64xf32> to vector<64x64xf32>
    %11 = arith.addf %8, %10 : vector<64x64xf32>
    %c0_12 = arith.constant 0 : index
    %c0_13 = arith.constant 0 : index
    %12 = vector.load %arg7[%c0_12, %c0_13] : memref<64x64xf32, #tpu.memory_space<vmem>>, vector<64x64xf32>
    tpu.vector_store %arg7[%c0_12, %c0_13], %11 {strides = array<i32>} : memref<64x64xf32, #tpu.memory_space<vmem>>, vector<64x64xf32>,
    return
  }
  func.func @transform_0(%arg0: i32) -> (i32, i32) {
    %c0_i32 = arith.constant 0 : i32
    %c0_i32_0 = arith.constant 0 : i32
    return %arg0, %c0_i32 : i32, i32
  }
  func.func @transform_1(%arg0: i32) -> (i32, i32) {
    %c0_i32 = arith.constant 0 : i32
    %c0_i32_0 = arith.constant 0 : i32
    %c0_i32_1 = arith.constant 0 : i32
    return %c0_i32, %c0_i32_0 : i32, i32
  }
  func.func @transform_2(%arg0: i32) -> (i32, i32) {
    %c0_i32 = arith.constant 0 : i32
    %c0_i32_0 = arith.constant 0 : i32
    %c0_i32_1 = arith.constant 0 : i32
    return %c0_i32, %c0_i32_0 : i32, i32
  }
  func.func @transform_3(%arg0: i32) -> (i32, i32) {
    %c0_i32 = arith.constant 0 : i32
    %c0_i32_0 = arith.constant 0 : i32
    %c0_i32_1 = arith.constant 0 : i32
    return %c0_i32, %c0_i32_0 : i32, i32
  }
  func.func @transform_4(%arg0: i32) -> (i32, i32) {
    %c0_i32 = arith.constant 0 : i32
    %c0_i32_0 = arith.constant 0 : i32
    %c0_i32_1 = arith.constant 0 : i32
    return %c0_i32, %c0_i32_0 : i32, i32
  }
  func.func @transform_5(%arg0: i32) -> (i32, i32) {
    %c0_i32 = arith.constant 0 : i32
    %c0_i32_0 = arith.constant 0 : i32
    return %arg0, %c0_i32 : i32, i32
  }
  func.func @transform_6(%arg0: i32) -> (i32, i32) {
    %c0_i32 = arith.constant 0 : i32
    %c0_i32_0 = arith.constant 0 : i32
    return %arg0, %c0_i32 : i32, i32
  }
}

module attributes {stable_mosaic.version = 11 : i64} {
  func.func @_bilstm_kernel(%arg0: i32, %arg1: memref<8x4x64xf32, #tpu.memory_space<vmem>>, %arg2: memref<8x4x64xf32, #tpu.memory_space<vmem>>, %arg3: memref<16x64xbf16, #tpu.memory_space<vmem>>, %arg4: memref<16x64xbf16, #tpu.memory_space<vmem>>, %arg5: memref<8x4x16xbf16, #tpu.memory_space<vmem>>, %arg6: memref<8x4x16xbf16, #tpu.memory_space<vmem>>, %arg7: memref<4x16xf32, #tpu.memory_space<vmem>>, %arg8: memref<4x16xf32, #tpu.memory_space<vmem>>, %arg9: memref<4x16xf32, #tpu.memory_space<vmem>>, %arg10: memref<4x16xf32, #tpu.memory_space<vmem>>) attributes {dimension_semantics = [#tpu.dimension_semantics<arbitrary>], iteration_bounds = array<i64: 2>, scalar_prefetch = 0 : i64, scratch_operands = 4 : i64, tpu.core_type = #tpu.core_type<tc>, window_params = [{transform_indices = @transform_0, window_bounds = array<i64: 8, 4, 64>}, {transform_indices = @transform_1, window_bounds = array<i64: 8, 4, 64>}, {pipeline_mode = #tpu.pipeline_mode<synchronous>, transform_indices = @transform_2, window_bounds = array<i64: 16, 64>}, {pipeline_mode = #tpu.pipeline_mode<synchronous>, transform_indices = @transform_3, window_bounds = array<i64: 16, 64>}, {transform_indices = @transform_4, window_bounds = array<i64: 8, 4, 16>}, {transform_indices = @transform_5, window_bounds = array<i64: 8, 4, 16>}]} {
    %c0_i32 = arith.constant 0 : i32
    %0 = arith.cmpi eq, %arg0, %c0_i32 : i32
    %1 = arith.extui %0 : i1 to i32
    %c0_i32_0 = arith.constant 0 : i32
    %2 = arith.cmpi ne, %1, %c0_i32_0 : i32
    scf.if %2 {
      %cst_264 = arith.constant 0.000000e+00 : f32
      %523 = vector.broadcast %cst_264 : f32 to vector<4x16xf32>
      %c0_265 = arith.constant 0 : index
      %c0_266 = arith.constant 0 : index
      %524 = vector.load %arg7[%c0_265, %c0_266] : memref<4x16xf32, #tpu.memory_space<vmem>>, vector<4x16xf32>
      tpu.vector_store %arg7[%c0_265, %c0_266], %523 {strides = array<i32>} : memref<4x16xf32, #tpu.memory_space<vmem>>, vector<4x16xf32>,
      %cst_267 = arith.constant 0.000000e+00 : f32
      %525 = vector.broadcast %cst_267 : f32 to vector<4x16xf32>
      %c0_268 = arith.constant 0 : index
      %c0_269 = arith.constant 0 : index
      %526 = vector.load %arg8[%c0_268, %c0_269] : memref<4x16xf32, #tpu.memory_space<vmem>>, vector<4x16xf32>
      tpu.vector_store %arg8[%c0_268, %c0_269], %525 {strides = array<i32>} : memref<4x16xf32, #tpu.memory_space<vmem>>, vector<4x16xf32>,
      %cst_270 = arith.constant 0.000000e+00 : f32
      %527 = vector.broadcast %cst_270 : f32 to vector<4x16xf32>
      %c0_271 = arith.constant 0 : index
      %c0_272 = arith.constant 0 : index
      %528 = vector.load %arg9[%c0_271, %c0_272] : memref<4x16xf32, #tpu.memory_space<vmem>>, vector<4x16xf32>
      tpu.vector_store %arg9[%c0_271, %c0_272], %527 {strides = array<i32>} : memref<4x16xf32, #tpu.memory_space<vmem>>, vector<4x16xf32>,
      %cst_273 = arith.constant 0.000000e+00 : f32
      %529 = vector.broadcast %cst_273 : f32 to vector<4x16xf32>
      %c0_274 = arith.constant 0 : index
      %c0_275 = arith.constant 0 : index
      %530 = vector.load %arg10[%c0_274, %c0_275] : memref<4x16xf32, #tpu.memory_space<vmem>>, vector<4x16xf32>
      tpu.vector_store %arg10[%c0_274, %c0_275], %529 {strides = array<i32>} : memref<4x16xf32, #tpu.memory_space<vmem>>, vector<4x16xf32>,
    } else {
    }
    %c0_i32_1 = arith.constant 0 : i32
    %3 = arith.index_cast %c0_i32_1 : i32 to index
    %c0 = arith.constant 0 : index
    %c0_2 = arith.constant 0 : index
    %4 = vector.load %arg1[%3, %c0, %c0_2] : memref<8x4x64xf32, #tpu.memory_space<vmem>>, vector<1x4x64xf32>
    %5 = vector.shape_cast %4 : vector<1x4x64xf32> to vector<4x64xf32>
    %c0_3 = arith.constant 0 : index
    %c0_4 = arith.constant 0 : index
    %6 = vector.load %arg7[%c0_3, %c0_4] : memref<4x16xf32, #tpu.memory_space<vmem>>, vector<4x16xf32>
    %c0_5 = arith.constant 0 : index
    %c0_6 = arith.constant 0 : index
    %7 = vector.load %arg8[%c0_5, %c0_6] : memref<4x16xf32, #tpu.memory_space<vmem>>, vector<4x16xf32>
    %8 = arith.truncf %6 : vector<4x16xf32> to vector<4x16xbf16>
    %c0_7 = arith.constant 0 : index
    %c0_8 = arith.constant 0 : index
    %9 = vector.load %arg3[%c0_7, %c0_8] : memref<16x64xbf16, #tpu.memory_space<vmem>>, vector<16x64xbf16>
    %cst = arith.constant dense<0.000000e+00> : vector<4x64xf32>
    %10 = tpu.matmul %8, %9, %cst {dimension_numbers = #tpu.dot_dimension_numbers<[1], [0], [0], [1], [0, 0, 1, 1], [], []>} : vector<4x16xbf16>, vector<16x64xbf16>, vector<4x64xf32> -> vector<4x64xf32>
    %11 = arith.addf %5, %10 : vector<4x64xf32>
    %12 = vector.extract_strided_slice %11 {offsets = [0, 0], sizes = [4, 48], strides = [1, 1]} : vector<4x64xf32> to vector<4x48xf32>
    %13 = arith.negf %12 : vector<4x48xf32>
    %14 = math.exp %13 : vector<4x48xf32>
    %cst_9 = arith.constant 1.000000e+00 : f32
    %15 = vector.broadcast %cst_9 : f32 to vector<4x48xf32>
    %16 = arith.addf %15, %14 : vector<4x48xf32>
    %17 = arith.divf %15, %16 : vector<4x48xf32>
    %18 = vector.extract_strided_slice %17 {offsets = [0, 0], sizes = [4, 16], strides = [1, 1]} : vector<4x48xf32> to vector<4x16xf32>
    %19 = vector.extract_strided_slice %17 {offsets = [0, 16], sizes = [4, 16], strides = [1, 1]} : vector<4x48xf32> to vector<4x16xf32>
    %20 = vector.extract_strided_slice %17 {offsets = [0, 32], sizes = [4, 16], strides = [1, 1]} : vector<4x48xf32> to vector<4x16xf32>
    %21 = vector.extract_strided_slice %11 {offsets = [0, 48], sizes = [4, 16], strides = [1, 1]} : vector<4x64xf32> to vector<4x16xf32>
    %22 = math.tanh %21 : vector<4x16xf32>
    %23 = arith.mulf %19, %7 : vector<4x16xf32>
    %24 = arith.mulf %18, %22 : vector<4x16xf32>
    %25 = arith.addf %23, %24 : vector<4x16xf32>
    %26 = math.tanh %25 : vector<4x16xf32>
    %27 = arith.mulf %20, %26 : vector<4x16xf32>
    %c0_10 = arith.constant 0 : index
    %c0_11 = arith.constant 0 : index
    %28 = vector.load %arg7[%c0_10, %c0_11] : memref<4x16xf32, #tpu.memory_space<vmem>>, vector<4x16xf32>
    tpu.vector_store %arg7[%c0_10, %c0_11], %27 {strides = array<i32>} : memref<4x16xf32, #tpu.memory_space<vmem>>, vector<4x16xf32>,
    %c0_12 = arith.constant 0 : index
    %c0_13 = arith.constant 0 : index
    %29 = vector.load %arg8[%c0_12, %c0_13] : memref<4x16xf32, #tpu.memory_space<vmem>>, vector<4x16xf32>
    tpu.vector_store %arg8[%c0_12, %c0_13], %25 {strides = array<i32>} : memref<4x16xf32, #tpu.memory_space<vmem>>, vector<4x16xf32>,
    %30 = arith.truncf %27 : vector<4x16xf32> to vector<4x16xbf16>
    %31 = arith.index_cast %c0_i32_1 : i32 to index
    %c0_14 = arith.constant 0 : index
    %c0_15 = arith.constant 0 : index
    %32 = vector.load %arg5[%31, %c0_14, %c0_15] : memref<8x4x16xbf16, #tpu.memory_space<vmem>>, vector<1x4x16xbf16>
    %33 = vector.shape_cast %32 : vector<1x4x16xbf16> to vector<4x16xbf16>
    %34 = vector.shape_cast %30 : vector<4x16xbf16> to vector<1x4x16xbf16>
    tpu.vector_store %arg5[%31, %c0_14, %c0_15], %34 {strides = array<i32>} : memref<8x4x16xbf16, #tpu.memory_space<vmem>>, vector<1x4x16xbf16>,
    %c7_i32 = arith.constant 7 : i32
    %35 = arith.subi %c7_i32, %c0_i32_1 : i32
    %36 = arith.index_cast %35 : i32 to index
    %c0_16 = arith.constant 0 : index
    %c0_17 = arith.constant 0 : index
    %37 = vector.load %arg2[%36, %c0_16, %c0_17] : memref<8x4x64xf32, #tpu.memory_space<vmem>>, vector<1x4x64xf32>
    %38 = vector.shape_cast %37 : vector<1x4x64xf32> to vector<4x64xf32>
    %c0_18 = arith.constant 0 : index
    %c0_19 = arith.constant 0 : index
    %39 = vector.load %arg9[%c0_18, %c0_19] : memref<4x16xf32, #tpu.memory_space<vmem>>, vector<4x16xf32>
    %c0_20 = arith.constant 0 : index
    %c0_21 = arith.constant 0 : index
    %40 = vector.load %arg10[%c0_20, %c0_21] : memref<4x16xf32, #tpu.memory_space<vmem>>, vector<4x16xf32>
    %41 = arith.truncf %39 : vector<4x16xf32> to vector<4x16xbf16>
    %c0_22 = arith.constant 0 : index
    %c0_23 = arith.constant 0 : index
    %42 = vector.load %arg4[%c0_22, %c0_23] : memref<16x64xbf16, #tpu.memory_space<vmem>>, vector<16x64xbf16>
    %cst_24 = arith.constant dense<0.000000e+00> : vector<4x64xf32>
    %43 = tpu.matmul %41, %42, %cst_24 {dimension_numbers = #tpu.dot_dimension_numbers<[1], [0], [0], [1], [0, 0, 1, 1], [], []>} : vector<4x16xbf16>, vector<16x64xbf16>, vector<4x64xf32> -> vector<4x64xf32>
    %44 = arith.addf %38, %43 : vector<4x64xf32>
    %45 = vector.extract_strided_slice %44 {offsets = [0, 0], sizes = [4, 48], strides = [1, 1]} : vector<4x64xf32> to vector<4x48xf32>
    %46 = arith.negf %45 : vector<4x48xf32>
    %47 = math.exp %46 : vector<4x48xf32>
    %cst_25 = arith.constant 1.000000e+00 : f32
    %48 = vector.broadcast %cst_25 : f32 to vector<4x48xf32>
    %49 = arith.addf %48, %47 : vector<4x48xf32>
    %50 = arith.divf %48, %49 : vector<4x48xf32>
    %51 = vector.extract_strided_slice %50 {offsets = [0, 0], sizes = [4, 16], strides = [1, 1]} : vector<4x48xf32> to vector<4x16xf32>
    %52 = vector.extract_strided_slice %50 {offsets = [0, 16], sizes = [4, 16], strides = [1, 1]} : vector<4x48xf32> to vector<4x16xf32>
    %53 = vector.extract_strided_slice %50 {offsets = [0, 32], sizes = [4, 16], strides = [1, 1]} : vector<4x48xf32> to vector<4x16xf32>
    %54 = vector.extract_strided_slice %44 {offsets = [0, 48], sizes = [4, 16], strides = [1, 1]} : vector<4x64xf32> to vector<4x16xf32>
    %55 = math.tanh %54 : vector<4x16xf32>
    %56 = arith.mulf %52, %40 : vector<4x16xf32>
    %57 = arith.mulf %51, %55 : vector<4x16xf32>
    %58 = arith.addf %56, %57 : vector<4x16xf32>
    %59 = math.tanh %58 : vector<4x16xf32>
    %60 = arith.mulf %53, %59 : vector<4x16xf32>
    %c0_26 = arith.constant 0 : index
    %c0_27 = arith.constant 0 : index
    %61 = vector.load %arg9[%c0_26, %c0_27] : memref<4x16xf32, #tpu.memory_space<vmem>>, vector<4x16xf32>
    tpu.vector_store %arg9[%c0_26, %c0_27], %60 {strides = array<i32>} : memref<4x16xf32, #tpu.memory_space<vmem>>, vector<4x16xf32>,
    %c0_28 = arith.constant 0 : index
    %c0_29 = arith.constant 0 : index
    %62 = vector.load %arg10[%c0_28, %c0_29] : memref<4x16xf32, #tpu.memory_space<vmem>>, vector<4x16xf32>
    tpu.vector_store %arg10[%c0_28, %c0_29], %58 {strides = array<i32>} : memref<4x16xf32, #tpu.memory_space<vmem>>, vector<4x16xf32>,
    %63 = arith.truncf %60 : vector<4x16xf32> to vector<4x16xbf16>
    %64 = arith.index_cast %35 : i32 to index
    %c0_30 = arith.constant 0 : index
    %c0_31 = arith.constant 0 : index
    %65 = vector.load %arg6[%64, %c0_30, %c0_31] : memref<8x4x16xbf16, #tpu.memory_space<vmem>>, vector<1x4x16xbf16>
    %66 = vector.shape_cast %65 : vector<1x4x16xbf16> to vector<4x16xbf16>
    %67 = vector.shape_cast %63 : vector<4x16xbf16> to vector<1x4x16xbf16>
    tpu.vector_store %arg6[%64, %c0_30, %c0_31], %67 {strides = array<i32>} : memref<8x4x16xbf16, #tpu.memory_space<vmem>>, vector<1x4x16xbf16>,
    %c1_i32 = arith.constant 1 : i32
    %68 = arith.index_cast %c1_i32 : i32 to index
    %c0_32 = arith.constant 0 : index
    %c0_33 = arith.constant 0 : index
    %69 = vector.load %arg1[%68, %c0_32, %c0_33] : memref<8x4x64xf32, #tpu.memory_space<vmem>>, vector<1x4x64xf32>
    %70 = vector.shape_cast %69 : vector<1x4x64xf32> to vector<4x64xf32>
    %c0_34 = arith.constant 0 : index
    %c0_35 = arith.constant 0 : index
    %71 = vector.load %arg7[%c0_34, %c0_35] : memref<4x16xf32, #tpu.memory_space<vmem>>, vector<4x16xf32>
    %c0_36 = arith.constant 0 : index
    %c0_37 = arith.constant 0 : index
    %72 = vector.load %arg8[%c0_36, %c0_37] : memref<4x16xf32, #tpu.memory_space<vmem>>, vector<4x16xf32>
    %73 = arith.truncf %71 : vector<4x16xf32> to vector<4x16xbf16>
    %c0_38 = arith.constant 0 : index
    %c0_39 = arith.constant 0 : index
    %74 = vector.load %arg3[%c0_38, %c0_39] : memref<16x64xbf16, #tpu.memory_space<vmem>>, vector<16x64xbf16>
    %cst_40 = arith.constant dense<0.000000e+00> : vector<4x64xf32>
    %75 = tpu.matmul %73, %74, %cst_40 {dimension_numbers = #tpu.dot_dimension_numbers<[1], [0], [0], [1], [0, 0, 1, 1], [], []>} : vector<4x16xbf16>, vector<16x64xbf16>, vector<4x64xf32> -> vector<4x64xf32>
    %76 = arith.addf %70, %75 : vector<4x64xf32>
    %77 = vector.extract_strided_slice %76 {offsets = [0, 0], sizes = [4, 48], strides = [1, 1]} : vector<4x64xf32> to vector<4x48xf32>
    %78 = arith.negf %77 : vector<4x48xf32>
    %79 = math.exp %78 : vector<4x48xf32>
    %cst_41 = arith.constant 1.000000e+00 : f32
    %80 = vector.broadcast %cst_41 : f32 to vector<4x48xf32>
    %81 = arith.addf %80, %79 : vector<4x48xf32>
    %82 = arith.divf %80, %81 : vector<4x48xf32>
    %83 = vector.extract_strided_slice %82 {offsets = [0, 0], sizes = [4, 16], strides = [1, 1]} : vector<4x48xf32> to vector<4x16xf32>
    %84 = vector.extract_strided_slice %82 {offsets = [0, 16], sizes = [4, 16], strides = [1, 1]} : vector<4x48xf32> to vector<4x16xf32>
    %85 = vector.extract_strided_slice %82 {offsets = [0, 32], sizes = [4, 16], strides = [1, 1]} : vector<4x48xf32> to vector<4x16xf32>
    %86 = vector.extract_strided_slice %76 {offsets = [0, 48], sizes = [4, 16], strides = [1, 1]} : vector<4x64xf32> to vector<4x16xf32>
    %87 = math.tanh %86 : vector<4x16xf32>
    %88 = arith.mulf %84, %72 : vector<4x16xf32>
    %89 = arith.mulf %83, %87 : vector<4x16xf32>
    %90 = arith.addf %88, %89 : vector<4x16xf32>
    %91 = math.tanh %90 : vector<4x16xf32>
    %92 = arith.mulf %85, %91 : vector<4x16xf32>
    %c0_42 = arith.constant 0 : index
    %c0_43 = arith.constant 0 : index
    %93 = vector.load %arg7[%c0_42, %c0_43] : memref<4x16xf32, #tpu.memory_space<vmem>>, vector<4x16xf32>
    tpu.vector_store %arg7[%c0_42, %c0_43], %92 {strides = array<i32>} : memref<4x16xf32, #tpu.memory_space<vmem>>, vector<4x16xf32>,
    %c0_44 = arith.constant 0 : index
    %c0_45 = arith.constant 0 : index
    %94 = vector.load %arg8[%c0_44, %c0_45] : memref<4x16xf32, #tpu.memory_space<vmem>>, vector<4x16xf32>
    tpu.vector_store %arg8[%c0_44, %c0_45], %90 {strides = array<i32>} : memref<4x16xf32, #tpu.memory_space<vmem>>, vector<4x16xf32>,
    %95 = arith.truncf %92 : vector<4x16xf32> to vector<4x16xbf16>
    %96 = arith.index_cast %c1_i32 : i32 to index
    %c0_46 = arith.constant 0 : index
    %c0_47 = arith.constant 0 : index
    %97 = vector.load %arg5[%96, %c0_46, %c0_47] : memref<8x4x16xbf16, #tpu.memory_space<vmem>>, vector<1x4x16xbf16>
    %98 = vector.shape_cast %97 : vector<1x4x16xbf16> to vector<4x16xbf16>
    %99 = vector.shape_cast %95 : vector<4x16xbf16> to vector<1x4x16xbf16>
    tpu.vector_store %arg5[%96, %c0_46, %c0_47], %99 {strides = array<i32>} : memref<8x4x16xbf16, #tpu.memory_space<vmem>>, vector<1x4x16xbf16>,
    %c7_i32_48 = arith.constant 7 : i32
    %100 = arith.subi %c7_i32_48, %c1_i32 : i32
    %101 = arith.index_cast %100 : i32 to index
    %c0_49 = arith.constant 0 : index
    %c0_50 = arith.constant 0 : index
    %102 = vector.load %arg2[%101, %c0_49, %c0_50] : memref<8x4x64xf32, #tpu.memory_space<vmem>>, vector<1x4x64xf32>
    %103 = vector.shape_cast %102 : vector<1x4x64xf32> to vector<4x64xf32>
    %c0_51 = arith.constant 0 : index
    %c0_52 = arith.constant 0 : index
    %104 = vector.load %arg9[%c0_51, %c0_52] : memref<4x16xf32, #tpu.memory_space<vmem>>, vector<4x16xf32>
    %c0_53 = arith.constant 0 : index
    %c0_54 = arith.constant 0 : index
    %105 = vector.load %arg10[%c0_53, %c0_54] : memref<4x16xf32, #tpu.memory_space<vmem>>, vector<4x16xf32>
    %106 = arith.truncf %104 : vector<4x16xf32> to vector<4x16xbf16>
    %c0_55 = arith.constant 0 : index
    %c0_56 = arith.constant 0 : index
    %107 = vector.load %arg4[%c0_55, %c0_56] : memref<16x64xbf16, #tpu.memory_space<vmem>>, vector<16x64xbf16>
    %cst_57 = arith.constant dense<0.000000e+00> : vector<4x64xf32>
    %108 = tpu.matmul %106, %107, %cst_57 {dimension_numbers = #tpu.dot_dimension_numbers<[1], [0], [0], [1], [0, 0, 1, 1], [], []>} : vector<4x16xbf16>, vector<16x64xbf16>, vector<4x64xf32> -> vector<4x64xf32>
    %109 = arith.addf %103, %108 : vector<4x64xf32>
    %110 = vector.extract_strided_slice %109 {offsets = [0, 0], sizes = [4, 48], strides = [1, 1]} : vector<4x64xf32> to vector<4x48xf32>
    %111 = arith.negf %110 : vector<4x48xf32>
    %112 = math.exp %111 : vector<4x48xf32>
    %cst_58 = arith.constant 1.000000e+00 : f32
    %113 = vector.broadcast %cst_58 : f32 to vector<4x48xf32>
    %114 = arith.addf %113, %112 : vector<4x48xf32>
    %115 = arith.divf %113, %114 : vector<4x48xf32>
    %116 = vector.extract_strided_slice %115 {offsets = [0, 0], sizes = [4, 16], strides = [1, 1]} : vector<4x48xf32> to vector<4x16xf32>
    %117 = vector.extract_strided_slice %115 {offsets = [0, 16], sizes = [4, 16], strides = [1, 1]} : vector<4x48xf32> to vector<4x16xf32>
    %118 = vector.extract_strided_slice %115 {offsets = [0, 32], sizes = [4, 16], strides = [1, 1]} : vector<4x48xf32> to vector<4x16xf32>
    %119 = vector.extract_strided_slice %109 {offsets = [0, 48], sizes = [4, 16], strides = [1, 1]} : vector<4x64xf32> to vector<4x16xf32>
    %120 = math.tanh %119 : vector<4x16xf32>
    %121 = arith.mulf %117, %105 : vector<4x16xf32>
    %122 = arith.mulf %116, %120 : vector<4x16xf32>
    %123 = arith.addf %121, %122 : vector<4x16xf32>
    %124 = math.tanh %123 : vector<4x16xf32>
    %125 = arith.mulf %118, %124 : vector<4x16xf32>
    %c0_59 = arith.constant 0 : index
    %c0_60 = arith.constant 0 : index
    %126 = vector.load %arg9[%c0_59, %c0_60] : memref<4x16xf32, #tpu.memory_space<vmem>>, vector<4x16xf32>
    tpu.vector_store %arg9[%c0_59, %c0_60], %125 {strides = array<i32>} : memref<4x16xf32, #tpu.memory_space<vmem>>, vector<4x16xf32>,
    %c0_61 = arith.constant 0 : index
    %c0_62 = arith.constant 0 : index
    %127 = vector.load %arg10[%c0_61, %c0_62] : memref<4x16xf32, #tpu.memory_space<vmem>>, vector<4x16xf32>
    tpu.vector_store %arg10[%c0_61, %c0_62], %123 {strides = array<i32>} : memref<4x16xf32, #tpu.memory_space<vmem>>, vector<4x16xf32>,
    %128 = arith.truncf %125 : vector<4x16xf32> to vector<4x16xbf16>
    %129 = arith.index_cast %100 : i32 to index
    %c0_63 = arith.constant 0 : index
    %c0_64 = arith.constant 0 : index
    %130 = vector.load %arg6[%129, %c0_63, %c0_64] : memref<8x4x16xbf16, #tpu.memory_space<vmem>>, vector<1x4x16xbf16>
    %131 = vector.shape_cast %130 : vector<1x4x16xbf16> to vector<4x16xbf16>
    %132 = vector.shape_cast %128 : vector<4x16xbf16> to vector<1x4x16xbf16>
    tpu.vector_store %arg6[%129, %c0_63, %c0_64], %132 {strides = array<i32>} : memref<8x4x16xbf16, #tpu.memory_space<vmem>>, vector<1x4x16xbf16>,
    %c2_i32 = arith.constant 2 : i32
    %133 = arith.index_cast %c2_i32 : i32 to index
    %c0_65 = arith.constant 0 : index
    %c0_66 = arith.constant 0 : index
    %134 = vector.load %arg1[%133, %c0_65, %c0_66] : memref<8x4x64xf32, #tpu.memory_space<vmem>>, vector<1x4x64xf32>
    %135 = vector.shape_cast %134 : vector<1x4x64xf32> to vector<4x64xf32>
    %c0_67 = arith.constant 0 : index
    %c0_68 = arith.constant 0 : index
    %136 = vector.load %arg7[%c0_67, %c0_68] : memref<4x16xf32, #tpu.memory_space<vmem>>, vector<4x16xf32>
    %c0_69 = arith.constant 0 : index
    %c0_70 = arith.constant 0 : index
    %137 = vector.load %arg8[%c0_69, %c0_70] : memref<4x16xf32, #tpu.memory_space<vmem>>, vector<4x16xf32>
    %138 = arith.truncf %136 : vector<4x16xf32> to vector<4x16xbf16>
    %c0_71 = arith.constant 0 : index
    %c0_72 = arith.constant 0 : index
    %139 = vector.load %arg3[%c0_71, %c0_72] : memref<16x64xbf16, #tpu.memory_space<vmem>>, vector<16x64xbf16>
    %cst_73 = arith.constant dense<0.000000e+00> : vector<4x64xf32>
    %140 = tpu.matmul %138, %139, %cst_73 {dimension_numbers = #tpu.dot_dimension_numbers<[1], [0], [0], [1], [0, 0, 1, 1], [], []>} : vector<4x16xbf16>, vector<16x64xbf16>, vector<4x64xf32> -> vector<4x64xf32>
    %141 = arith.addf %135, %140 : vector<4x64xf32>
    %142 = vector.extract_strided_slice %141 {offsets = [0, 0], sizes = [4, 48], strides = [1, 1]} : vector<4x64xf32> to vector<4x48xf32>
    %143 = arith.negf %142 : vector<4x48xf32>
    %144 = math.exp %143 : vector<4x48xf32>
    %cst_74 = arith.constant 1.000000e+00 : f32
    %145 = vector.broadcast %cst_74 : f32 to vector<4x48xf32>
    %146 = arith.addf %145, %144 : vector<4x48xf32>
    %147 = arith.divf %145, %146 : vector<4x48xf32>
    %148 = vector.extract_strided_slice %147 {offsets = [0, 0], sizes = [4, 16], strides = [1, 1]} : vector<4x48xf32> to vector<4x16xf32>
    %149 = vector.extract_strided_slice %147 {offsets = [0, 16], sizes = [4, 16], strides = [1, 1]} : vector<4x48xf32> to vector<4x16xf32>
    %150 = vector.extract_strided_slice %147 {offsets = [0, 32], sizes = [4, 16], strides = [1, 1]} : vector<4x48xf32> to vector<4x16xf32>
    %151 = vector.extract_strided_slice %141 {offsets = [0, 48], sizes = [4, 16], strides = [1, 1]} : vector<4x64xf32> to vector<4x16xf32>
    %152 = math.tanh %151 : vector<4x16xf32>
    %153 = arith.mulf %149, %137 : vector<4x16xf32>
    %154 = arith.mulf %148, %152 : vector<4x16xf32>
    %155 = arith.addf %153, %154 : vector<4x16xf32>
    %156 = math.tanh %155 : vector<4x16xf32>
    %157 = arith.mulf %150, %156 : vector<4x16xf32>
    %c0_75 = arith.constant 0 : index
    %c0_76 = arith.constant 0 : index
    %158 = vector.load %arg7[%c0_75, %c0_76] : memref<4x16xf32, #tpu.memory_space<vmem>>, vector<4x16xf32>
    tpu.vector_store %arg7[%c0_75, %c0_76], %157 {strides = array<i32>} : memref<4x16xf32, #tpu.memory_space<vmem>>, vector<4x16xf32>,
    %c0_77 = arith.constant 0 : index
    %c0_78 = arith.constant 0 : index
    %159 = vector.load %arg8[%c0_77, %c0_78] : memref<4x16xf32, #tpu.memory_space<vmem>>, vector<4x16xf32>
    tpu.vector_store %arg8[%c0_77, %c0_78], %155 {strides = array<i32>} : memref<4x16xf32, #tpu.memory_space<vmem>>, vector<4x16xf32>,
    %160 = arith.truncf %157 : vector<4x16xf32> to vector<4x16xbf16>
    %161 = arith.index_cast %c2_i32 : i32 to index
    %c0_79 = arith.constant 0 : index
    %c0_80 = arith.constant 0 : index
    %162 = vector.load %arg5[%161, %c0_79, %c0_80] : memref<8x4x16xbf16, #tpu.memory_space<vmem>>, vector<1x4x16xbf16>
    %163 = vector.shape_cast %162 : vector<1x4x16xbf16> to vector<4x16xbf16>
    %164 = vector.shape_cast %160 : vector<4x16xbf16> to vector<1x4x16xbf16>
    tpu.vector_store %arg5[%161, %c0_79, %c0_80], %164 {strides = array<i32>} : memref<8x4x16xbf16, #tpu.memory_space<vmem>>, vector<1x4x16xbf16>,
    %c7_i32_81 = arith.constant 7 : i32
    %165 = arith.subi %c7_i32_81, %c2_i32 : i32
    %166 = arith.index_cast %165 : i32 to index
    %c0_82 = arith.constant 0 : index
    %c0_83 = arith.constant 0 : index
    %167 = vector.load %arg2[%166, %c0_82, %c0_83] : memref<8x4x64xf32, #tpu.memory_space<vmem>>, vector<1x4x64xf32>
    %168 = vector.shape_cast %167 : vector<1x4x64xf32> to vector<4x64xf32>
    %c0_84 = arith.constant 0 : index
    %c0_85 = arith.constant 0 : index
    %169 = vector.load %arg9[%c0_84, %c0_85] : memref<4x16xf32, #tpu.memory_space<vmem>>, vector<4x16xf32>
    %c0_86 = arith.constant 0 : index
    %c0_87 = arith.constant 0 : index
    %170 = vector.load %arg10[%c0_86, %c0_87] : memref<4x16xf32, #tpu.memory_space<vmem>>, vector<4x16xf32>
    %171 = arith.truncf %169 : vector<4x16xf32> to vector<4x16xbf16>
    %c0_88 = arith.constant 0 : index
    %c0_89 = arith.constant 0 : index
    %172 = vector.load %arg4[%c0_88, %c0_89] : memref<16x64xbf16, #tpu.memory_space<vmem>>, vector<16x64xbf16>
    %cst_90 = arith.constant dense<0.000000e+00> : vector<4x64xf32>
    %173 = tpu.matmul %171, %172, %cst_90 {dimension_numbers = #tpu.dot_dimension_numbers<[1], [0], [0], [1], [0, 0, 1, 1], [], []>} : vector<4x16xbf16>, vector<16x64xbf16>, vector<4x64xf32> -> vector<4x64xf32>
    %174 = arith.addf %168, %173 : vector<4x64xf32>
    %175 = vector.extract_strided_slice %174 {offsets = [0, 0], sizes = [4, 48], strides = [1, 1]} : vector<4x64xf32> to vector<4x48xf32>
    %176 = arith.negf %175 : vector<4x48xf32>
    %177 = math.exp %176 : vector<4x48xf32>
    %cst_91 = arith.constant 1.000000e+00 : f32
    %178 = vector.broadcast %cst_91 : f32 to vector<4x48xf32>
    %179 = arith.addf %178, %177 : vector<4x48xf32>
    %180 = arith.divf %178, %179 : vector<4x48xf32>
    %181 = vector.extract_strided_slice %180 {offsets = [0, 0], sizes = [4, 16], strides = [1, 1]} : vector<4x48xf32> to vector<4x16xf32>
    %182 = vector.extract_strided_slice %180 {offsets = [0, 16], sizes = [4, 16], strides = [1, 1]} : vector<4x48xf32> to vector<4x16xf32>
    %183 = vector.extract_strided_slice %180 {offsets = [0, 32], sizes = [4, 16], strides = [1, 1]} : vector<4x48xf32> to vector<4x16xf32>
    %184 = vector.extract_strided_slice %174 {offsets = [0, 48], sizes = [4, 16], strides = [1, 1]} : vector<4x64xf32> to vector<4x16xf32>
    %185 = math.tanh %184 : vector<4x16xf32>
    %186 = arith.mulf %182, %170 : vector<4x16xf32>
    %187 = arith.mulf %181, %185 : vector<4x16xf32>
    %188 = arith.addf %186, %187 : vector<4x16xf32>
    %189 = math.tanh %188 : vector<4x16xf32>
    %190 = arith.mulf %183, %189 : vector<4x16xf32>
    %c0_92 = arith.constant 0 : index
    %c0_93 = arith.constant 0 : index
    %191 = vector.load %arg9[%c0_92, %c0_93] : memref<4x16xf32, #tpu.memory_space<vmem>>, vector<4x16xf32>
    tpu.vector_store %arg9[%c0_92, %c0_93], %190 {strides = array<i32>} : memref<4x16xf32, #tpu.memory_space<vmem>>, vector<4x16xf32>,
    %c0_94 = arith.constant 0 : index
    %c0_95 = arith.constant 0 : index
    %192 = vector.load %arg10[%c0_94, %c0_95] : memref<4x16xf32, #tpu.memory_space<vmem>>, vector<4x16xf32>
    tpu.vector_store %arg10[%c0_94, %c0_95], %188 {strides = array<i32>} : memref<4x16xf32, #tpu.memory_space<vmem>>, vector<4x16xf32>,
    %193 = arith.truncf %190 : vector<4x16xf32> to vector<4x16xbf16>
    %194 = arith.index_cast %165 : i32 to index
    %c0_96 = arith.constant 0 : index
    %c0_97 = arith.constant 0 : index
    %195 = vector.load %arg6[%194, %c0_96, %c0_97] : memref<8x4x16xbf16, #tpu.memory_space<vmem>>, vector<1x4x16xbf16>
    %196 = vector.shape_cast %195 : vector<1x4x16xbf16> to vector<4x16xbf16>
    %197 = vector.shape_cast %193 : vector<4x16xbf16> to vector<1x4x16xbf16>
    tpu.vector_store %arg6[%194, %c0_96, %c0_97], %197 {strides = array<i32>} : memref<8x4x16xbf16, #tpu.memory_space<vmem>>, vector<1x4x16xbf16>,
    %c3_i32 = arith.constant 3 : i32
    %198 = arith.index_cast %c3_i32 : i32 to index
    %c0_98 = arith.constant 0 : index
    %c0_99 = arith.constant 0 : index
    %199 = vector.load %arg1[%198, %c0_98, %c0_99] : memref<8x4x64xf32, #tpu.memory_space<vmem>>, vector<1x4x64xf32>
    %200 = vector.shape_cast %199 : vector<1x4x64xf32> to vector<4x64xf32>
    %c0_100 = arith.constant 0 : index
    %c0_101 = arith.constant 0 : index
    %201 = vector.load %arg7[%c0_100, %c0_101] : memref<4x16xf32, #tpu.memory_space<vmem>>, vector<4x16xf32>
    %c0_102 = arith.constant 0 : index
    %c0_103 = arith.constant 0 : index
    %202 = vector.load %arg8[%c0_102, %c0_103] : memref<4x16xf32, #tpu.memory_space<vmem>>, vector<4x16xf32>
    %203 = arith.truncf %201 : vector<4x16xf32> to vector<4x16xbf16>
    %c0_104 = arith.constant 0 : index
    %c0_105 = arith.constant 0 : index
    %204 = vector.load %arg3[%c0_104, %c0_105] : memref<16x64xbf16, #tpu.memory_space<vmem>>, vector<16x64xbf16>
    %cst_106 = arith.constant dense<0.000000e+00> : vector<4x64xf32>
    %205 = tpu.matmul %203, %204, %cst_106 {dimension_numbers = #tpu.dot_dimension_numbers<[1], [0], [0], [1], [0, 0, 1, 1], [], []>} : vector<4x16xbf16>, vector<16x64xbf16>, vector<4x64xf32> -> vector<4x64xf32>
    %206 = arith.addf %200, %205 : vector<4x64xf32>
    %207 = vector.extract_strided_slice %206 {offsets = [0, 0], sizes = [4, 48], strides = [1, 1]} : vector<4x64xf32> to vector<4x48xf32>
    %208 = arith.negf %207 : vector<4x48xf32>
    %209 = math.exp %208 : vector<4x48xf32>
    %cst_107 = arith.constant 1.000000e+00 : f32
    %210 = vector.broadcast %cst_107 : f32 to vector<4x48xf32>
    %211 = arith.addf %210, %209 : vector<4x48xf32>
    %212 = arith.divf %210, %211 : vector<4x48xf32>
    %213 = vector.extract_strided_slice %212 {offsets = [0, 0], sizes = [4, 16], strides = [1, 1]} : vector<4x48xf32> to vector<4x16xf32>
    %214 = vector.extract_strided_slice %212 {offsets = [0, 16], sizes = [4, 16], strides = [1, 1]} : vector<4x48xf32> to vector<4x16xf32>
    %215 = vector.extract_strided_slice %212 {offsets = [0, 32], sizes = [4, 16], strides = [1, 1]} : vector<4x48xf32> to vector<4x16xf32>
    %216 = vector.extract_strided_slice %206 {offsets = [0, 48], sizes = [4, 16], strides = [1, 1]} : vector<4x64xf32> to vector<4x16xf32>
    %217 = math.tanh %216 : vector<4x16xf32>
    %218 = arith.mulf %214, %202 : vector<4x16xf32>
    %219 = arith.mulf %213, %217 : vector<4x16xf32>
    %220 = arith.addf %218, %219 : vector<4x16xf32>
    %221 = math.tanh %220 : vector<4x16xf32>
    %222 = arith.mulf %215, %221 : vector<4x16xf32>
    %c0_108 = arith.constant 0 : index
    %c0_109 = arith.constant 0 : index
    %223 = vector.load %arg7[%c0_108, %c0_109] : memref<4x16xf32, #tpu.memory_space<vmem>>, vector<4x16xf32>
    tpu.vector_store %arg7[%c0_108, %c0_109], %222 {strides = array<i32>} : memref<4x16xf32, #tpu.memory_space<vmem>>, vector<4x16xf32>,
    %c0_110 = arith.constant 0 : index
    %c0_111 = arith.constant 0 : index
    %224 = vector.load %arg8[%c0_110, %c0_111] : memref<4x16xf32, #tpu.memory_space<vmem>>, vector<4x16xf32>
    tpu.vector_store %arg8[%c0_110, %c0_111], %220 {strides = array<i32>} : memref<4x16xf32, #tpu.memory_space<vmem>>, vector<4x16xf32>,
    %225 = arith.truncf %222 : vector<4x16xf32> to vector<4x16xbf16>
    %226 = arith.index_cast %c3_i32 : i32 to index
    %c0_112 = arith.constant 0 : index
    %c0_113 = arith.constant 0 : index
    %227 = vector.load %arg5[%226, %c0_112, %c0_113] : memref<8x4x16xbf16, #tpu.memory_space<vmem>>, vector<1x4x16xbf16>
    %228 = vector.shape_cast %227 : vector<1x4x16xbf16> to vector<4x16xbf16>
    %229 = vector.shape_cast %225 : vector<4x16xbf16> to vector<1x4x16xbf16>
    tpu.vector_store %arg5[%226, %c0_112, %c0_113], %229 {strides = array<i32>} : memref<8x4x16xbf16, #tpu.memory_space<vmem>>, vector<1x4x16xbf16>,
    %c7_i32_114 = arith.constant 7 : i32
    %230 = arith.subi %c7_i32_114, %c3_i32 : i32
    %231 = arith.index_cast %230 : i32 to index
    %c0_115 = arith.constant 0 : index
    %c0_116 = arith.constant 0 : index
    %232 = vector.load %arg2[%231, %c0_115, %c0_116] : memref<8x4x64xf32, #tpu.memory_space<vmem>>, vector<1x4x64xf32>
    %233 = vector.shape_cast %232 : vector<1x4x64xf32> to vector<4x64xf32>
    %c0_117 = arith.constant 0 : index
    %c0_118 = arith.constant 0 : index
    %234 = vector.load %arg9[%c0_117, %c0_118] : memref<4x16xf32, #tpu.memory_space<vmem>>, vector<4x16xf32>
    %c0_119 = arith.constant 0 : index
    %c0_120 = arith.constant 0 : index
    %235 = vector.load %arg10[%c0_119, %c0_120] : memref<4x16xf32, #tpu.memory_space<vmem>>, vector<4x16xf32>
    %236 = arith.truncf %234 : vector<4x16xf32> to vector<4x16xbf16>
    %c0_121 = arith.constant 0 : index
    %c0_122 = arith.constant 0 : index
    %237 = vector.load %arg4[%c0_121, %c0_122] : memref<16x64xbf16, #tpu.memory_space<vmem>>, vector<16x64xbf16>
    %cst_123 = arith.constant dense<0.000000e+00> : vector<4x64xf32>
    %238 = tpu.matmul %236, %237, %cst_123 {dimension_numbers = #tpu.dot_dimension_numbers<[1], [0], [0], [1], [0, 0, 1, 1], [], []>} : vector<4x16xbf16>, vector<16x64xbf16>, vector<4x64xf32> -> vector<4x64xf32>
    %239 = arith.addf %233, %238 : vector<4x64xf32>
    %240 = vector.extract_strided_slice %239 {offsets = [0, 0], sizes = [4, 48], strides = [1, 1]} : vector<4x64xf32> to vector<4x48xf32>
    %241 = arith.negf %240 : vector<4x48xf32>
    %242 = math.exp %241 : vector<4x48xf32>
    %cst_124 = arith.constant 1.000000e+00 : f32
    %243 = vector.broadcast %cst_124 : f32 to vector<4x48xf32>
    %244 = arith.addf %243, %242 : vector<4x48xf32>
    %245 = arith.divf %243, %244 : vector<4x48xf32>
    %246 = vector.extract_strided_slice %245 {offsets = [0, 0], sizes = [4, 16], strides = [1, 1]} : vector<4x48xf32> to vector<4x16xf32>
    %247 = vector.extract_strided_slice %245 {offsets = [0, 16], sizes = [4, 16], strides = [1, 1]} : vector<4x48xf32> to vector<4x16xf32>
    %248 = vector.extract_strided_slice %245 {offsets = [0, 32], sizes = [4, 16], strides = [1, 1]} : vector<4x48xf32> to vector<4x16xf32>
    %249 = vector.extract_strided_slice %239 {offsets = [0, 48], sizes = [4, 16], strides = [1, 1]} : vector<4x64xf32> to vector<4x16xf32>
    %250 = math.tanh %249 : vector<4x16xf32>
    %251 = arith.mulf %247, %235 : vector<4x16xf32>
    %252 = arith.mulf %246, %250 : vector<4x16xf32>
    %253 = arith.addf %251, %252 : vector<4x16xf32>
    %254 = math.tanh %253 : vector<4x16xf32>
    %255 = arith.mulf %248, %254 : vector<4x16xf32>
    %c0_125 = arith.constant 0 : index
    %c0_126 = arith.constant 0 : index
    %256 = vector.load %arg9[%c0_125, %c0_126] : memref<4x16xf32, #tpu.memory_space<vmem>>, vector<4x16xf32>
    tpu.vector_store %arg9[%c0_125, %c0_126], %255 {strides = array<i32>} : memref<4x16xf32, #tpu.memory_space<vmem>>, vector<4x16xf32>,
    %c0_127 = arith.constant 0 : index
    %c0_128 = arith.constant 0 : index
    %257 = vector.load %arg10[%c0_127, %c0_128] : memref<4x16xf32, #tpu.memory_space<vmem>>, vector<4x16xf32>
    tpu.vector_store %arg10[%c0_127, %c0_128], %253 {strides = array<i32>} : memref<4x16xf32, #tpu.memory_space<vmem>>, vector<4x16xf32>,
    %258 = arith.truncf %255 : vector<4x16xf32> to vector<4x16xbf16>
    %259 = arith.index_cast %230 : i32 to index
    %c0_129 = arith.constant 0 : index
    %c0_130 = arith.constant 0 : index
    %260 = vector.load %arg6[%259, %c0_129, %c0_130] : memref<8x4x16xbf16, #tpu.memory_space<vmem>>, vector<1x4x16xbf16>
    %261 = vector.shape_cast %260 : vector<1x4x16xbf16> to vector<4x16xbf16>
    %262 = vector.shape_cast %258 : vector<4x16xbf16> to vector<1x4x16xbf16>
    tpu.vector_store %arg6[%259, %c0_129, %c0_130], %262 {strides = array<i32>} : memref<8x4x16xbf16, #tpu.memory_space<vmem>>, vector<1x4x16xbf16>,
    %c4_i32 = arith.constant 4 : i32
    %263 = arith.index_cast %c4_i32 : i32 to index
    %c0_131 = arith.constant 0 : index
    %c0_132 = arith.constant 0 : index
    %264 = vector.load %arg1[%263, %c0_131, %c0_132] : memref<8x4x64xf32, #tpu.memory_space<vmem>>, vector<1x4x64xf32>
    %265 = vector.shape_cast %264 : vector<1x4x64xf32> to vector<4x64xf32>
    %c0_133 = arith.constant 0 : index
    %c0_134 = arith.constant 0 : index
    %266 = vector.load %arg7[%c0_133, %c0_134] : memref<4x16xf32, #tpu.memory_space<vmem>>, vector<4x16xf32>
    %c0_135 = arith.constant 0 : index
    %c0_136 = arith.constant 0 : index
    %267 = vector.load %arg8[%c0_135, %c0_136] : memref<4x16xf32, #tpu.memory_space<vmem>>, vector<4x16xf32>
    %268 = arith.truncf %266 : vector<4x16xf32> to vector<4x16xbf16>
    %c0_137 = arith.constant 0 : index
    %c0_138 = arith.constant 0 : index
    %269 = vector.load %arg3[%c0_137, %c0_138] : memref<16x64xbf16, #tpu.memory_space<vmem>>, vector<16x64xbf16>
    %cst_139 = arith.constant dense<0.000000e+00> : vector<4x64xf32>
    %270 = tpu.matmul %268, %269, %cst_139 {dimension_numbers = #tpu.dot_dimension_numbers<[1], [0], [0], [1], [0, 0, 1, 1], [], []>} : vector<4x16xbf16>, vector<16x64xbf16>, vector<4x64xf32> -> vector<4x64xf32>
    %271 = arith.addf %265, %270 : vector<4x64xf32>
    %272 = vector.extract_strided_slice %271 {offsets = [0, 0], sizes = [4, 48], strides = [1, 1]} : vector<4x64xf32> to vector<4x48xf32>
    %273 = arith.negf %272 : vector<4x48xf32>
    %274 = math.exp %273 : vector<4x48xf32>
    %cst_140 = arith.constant 1.000000e+00 : f32
    %275 = vector.broadcast %cst_140 : f32 to vector<4x48xf32>
    %276 = arith.addf %275, %274 : vector<4x48xf32>
    %277 = arith.divf %275, %276 : vector<4x48xf32>
    %278 = vector.extract_strided_slice %277 {offsets = [0, 0], sizes = [4, 16], strides = [1, 1]} : vector<4x48xf32> to vector<4x16xf32>
    %279 = vector.extract_strided_slice %277 {offsets = [0, 16], sizes = [4, 16], strides = [1, 1]} : vector<4x48xf32> to vector<4x16xf32>
    %280 = vector.extract_strided_slice %277 {offsets = [0, 32], sizes = [4, 16], strides = [1, 1]} : vector<4x48xf32> to vector<4x16xf32>
    %281 = vector.extract_strided_slice %271 {offsets = [0, 48], sizes = [4, 16], strides = [1, 1]} : vector<4x64xf32> to vector<4x16xf32>
    %282 = math.tanh %281 : vector<4x16xf32>
    %283 = arith.mulf %279, %267 : vector<4x16xf32>
    %284 = arith.mulf %278, %282 : vector<4x16xf32>
    %285 = arith.addf %283, %284 : vector<4x16xf32>
    %286 = math.tanh %285 : vector<4x16xf32>
    %287 = arith.mulf %280, %286 : vector<4x16xf32>
    %c0_141 = arith.constant 0 : index
    %c0_142 = arith.constant 0 : index
    %288 = vector.load %arg7[%c0_141, %c0_142] : memref<4x16xf32, #tpu.memory_space<vmem>>, vector<4x16xf32>
    tpu.vector_store %arg7[%c0_141, %c0_142], %287 {strides = array<i32>} : memref<4x16xf32, #tpu.memory_space<vmem>>, vector<4x16xf32>,
    %c0_143 = arith.constant 0 : index
    %c0_144 = arith.constant 0 : index
    %289 = vector.load %arg8[%c0_143, %c0_144] : memref<4x16xf32, #tpu.memory_space<vmem>>, vector<4x16xf32>
    tpu.vector_store %arg8[%c0_143, %c0_144], %285 {strides = array<i32>} : memref<4x16xf32, #tpu.memory_space<vmem>>, vector<4x16xf32>,
    %290 = arith.truncf %287 : vector<4x16xf32> to vector<4x16xbf16>
    %291 = arith.index_cast %c4_i32 : i32 to index
    %c0_145 = arith.constant 0 : index
    %c0_146 = arith.constant 0 : index
    %292 = vector.load %arg5[%291, %c0_145, %c0_146] : memref<8x4x16xbf16, #tpu.memory_space<vmem>>, vector<1x4x16xbf16>
    %293 = vector.shape_cast %292 : vector<1x4x16xbf16> to vector<4x16xbf16>
    %294 = vector.shape_cast %290 : vector<4x16xbf16> to vector<1x4x16xbf16>
    tpu.vector_store %arg5[%291, %c0_145, %c0_146], %294 {strides = array<i32>} : memref<8x4x16xbf16, #tpu.memory_space<vmem>>, vector<1x4x16xbf16>,
    %c7_i32_147 = arith.constant 7 : i32
    %295 = arith.subi %c7_i32_147, %c4_i32 : i32
    %296 = arith.index_cast %295 : i32 to index
    %c0_148 = arith.constant 0 : index
    %c0_149 = arith.constant 0 : index
    %297 = vector.load %arg2[%296, %c0_148, %c0_149] : memref<8x4x64xf32, #tpu.memory_space<vmem>>, vector<1x4x64xf32>
    %298 = vector.shape_cast %297 : vector<1x4x64xf32> to vector<4x64xf32>
    %c0_150 = arith.constant 0 : index
    %c0_151 = arith.constant 0 : index
    %299 = vector.load %arg9[%c0_150, %c0_151] : memref<4x16xf32, #tpu.memory_space<vmem>>, vector<4x16xf32>
    %c0_152 = arith.constant 0 : index
    %c0_153 = arith.constant 0 : index
    %300 = vector.load %arg10[%c0_152, %c0_153] : memref<4x16xf32, #tpu.memory_space<vmem>>, vector<4x16xf32>
    %301 = arith.truncf %299 : vector<4x16xf32> to vector<4x16xbf16>
    %c0_154 = arith.constant 0 : index
    %c0_155 = arith.constant 0 : index
    %302 = vector.load %arg4[%c0_154, %c0_155] : memref<16x64xbf16, #tpu.memory_space<vmem>>, vector<16x64xbf16>
    %cst_156 = arith.constant dense<0.000000e+00> : vector<4x64xf32>
    %303 = tpu.matmul %301, %302, %cst_156 {dimension_numbers = #tpu.dot_dimension_numbers<[1], [0], [0], [1], [0, 0, 1, 1], [], []>} : vector<4x16xbf16>, vector<16x64xbf16>, vector<4x64xf32> -> vector<4x64xf32>
    %304 = arith.addf %298, %303 : vector<4x64xf32>
    %305 = vector.extract_strided_slice %304 {offsets = [0, 0], sizes = [4, 48], strides = [1, 1]} : vector<4x64xf32> to vector<4x48xf32>
    %306 = arith.negf %305 : vector<4x48xf32>
    %307 = math.exp %306 : vector<4x48xf32>
    %cst_157 = arith.constant 1.000000e+00 : f32
    %308 = vector.broadcast %cst_157 : f32 to vector<4x48xf32>
    %309 = arith.addf %308, %307 : vector<4x48xf32>
    %310 = arith.divf %308, %309 : vector<4x48xf32>
    %311 = vector.extract_strided_slice %310 {offsets = [0, 0], sizes = [4, 16], strides = [1, 1]} : vector<4x48xf32> to vector<4x16xf32>
    %312 = vector.extract_strided_slice %310 {offsets = [0, 16], sizes = [4, 16], strides = [1, 1]} : vector<4x48xf32> to vector<4x16xf32>
    %313 = vector.extract_strided_slice %310 {offsets = [0, 32], sizes = [4, 16], strides = [1, 1]} : vector<4x48xf32> to vector<4x16xf32>
    %314 = vector.extract_strided_slice %304 {offsets = [0, 48], sizes = [4, 16], strides = [1, 1]} : vector<4x64xf32> to vector<4x16xf32>
    %315 = math.tanh %314 : vector<4x16xf32>
    %316 = arith.mulf %312, %300 : vector<4x16xf32>
    %317 = arith.mulf %311, %315 : vector<4x16xf32>
    %318 = arith.addf %316, %317 : vector<4x16xf32>
    %319 = math.tanh %318 : vector<4x16xf32>
    %320 = arith.mulf %313, %319 : vector<4x16xf32>
    %c0_158 = arith.constant 0 : index
    %c0_159 = arith.constant 0 : index
    %321 = vector.load %arg9[%c0_158, %c0_159] : memref<4x16xf32, #tpu.memory_space<vmem>>, vector<4x16xf32>
    tpu.vector_store %arg9[%c0_158, %c0_159], %320 {strides = array<i32>} : memref<4x16xf32, #tpu.memory_space<vmem>>, vector<4x16xf32>,
    %c0_160 = arith.constant 0 : index
    %c0_161 = arith.constant 0 : index
    %322 = vector.load %arg10[%c0_160, %c0_161] : memref<4x16xf32, #tpu.memory_space<vmem>>, vector<4x16xf32>
    tpu.vector_store %arg10[%c0_160, %c0_161], %318 {strides = array<i32>} : memref<4x16xf32, #tpu.memory_space<vmem>>, vector<4x16xf32>,
    %323 = arith.truncf %320 : vector<4x16xf32> to vector<4x16xbf16>
    %324 = arith.index_cast %295 : i32 to index
    %c0_162 = arith.constant 0 : index
    %c0_163 = arith.constant 0 : index
    %325 = vector.load %arg6[%324, %c0_162, %c0_163] : memref<8x4x16xbf16, #tpu.memory_space<vmem>>, vector<1x4x16xbf16>
    %326 = vector.shape_cast %325 : vector<1x4x16xbf16> to vector<4x16xbf16>
    %327 = vector.shape_cast %323 : vector<4x16xbf16> to vector<1x4x16xbf16>
    tpu.vector_store %arg6[%324, %c0_162, %c0_163], %327 {strides = array<i32>} : memref<8x4x16xbf16, #tpu.memory_space<vmem>>, vector<1x4x16xbf16>,
    %c5_i32 = arith.constant 5 : i32
    %328 = arith.index_cast %c5_i32 : i32 to index
    %c0_164 = arith.constant 0 : index
    %c0_165 = arith.constant 0 : index
    %329 = vector.load %arg1[%328, %c0_164, %c0_165] : memref<8x4x64xf32, #tpu.memory_space<vmem>>, vector<1x4x64xf32>
    %330 = vector.shape_cast %329 : vector<1x4x64xf32> to vector<4x64xf32>
    %c0_166 = arith.constant 0 : index
    %c0_167 = arith.constant 0 : index
    %331 = vector.load %arg7[%c0_166, %c0_167] : memref<4x16xf32, #tpu.memory_space<vmem>>, vector<4x16xf32>
    %c0_168 = arith.constant 0 : index
    %c0_169 = arith.constant 0 : index
    %332 = vector.load %arg8[%c0_168, %c0_169] : memref<4x16xf32, #tpu.memory_space<vmem>>, vector<4x16xf32>
    %333 = arith.truncf %331 : vector<4x16xf32> to vector<4x16xbf16>
    %c0_170 = arith.constant 0 : index
    %c0_171 = arith.constant 0 : index
    %334 = vector.load %arg3[%c0_170, %c0_171] : memref<16x64xbf16, #tpu.memory_space<vmem>>, vector<16x64xbf16>
    %cst_172 = arith.constant dense<0.000000e+00> : vector<4x64xf32>
    %335 = tpu.matmul %333, %334, %cst_172 {dimension_numbers = #tpu.dot_dimension_numbers<[1], [0], [0], [1], [0, 0, 1, 1], [], []>} : vector<4x16xbf16>, vector<16x64xbf16>, vector<4x64xf32> -> vector<4x64xf32>
    %336 = arith.addf %330, %335 : vector<4x64xf32>
    %337 = vector.extract_strided_slice %336 {offsets = [0, 0], sizes = [4, 48], strides = [1, 1]} : vector<4x64xf32> to vector<4x48xf32>
    %338 = arith.negf %337 : vector<4x48xf32>
    %339 = math.exp %338 : vector<4x48xf32>
    %cst_173 = arith.constant 1.000000e+00 : f32
    %340 = vector.broadcast %cst_173 : f32 to vector<4x48xf32>
    %341 = arith.addf %340, %339 : vector<4x48xf32>
    %342 = arith.divf %340, %341 : vector<4x48xf32>
    %343 = vector.extract_strided_slice %342 {offsets = [0, 0], sizes = [4, 16], strides = [1, 1]} : vector<4x48xf32> to vector<4x16xf32>
    %344 = vector.extract_strided_slice %342 {offsets = [0, 16], sizes = [4, 16], strides = [1, 1]} : vector<4x48xf32> to vector<4x16xf32>
    %345 = vector.extract_strided_slice %342 {offsets = [0, 32], sizes = [4, 16], strides = [1, 1]} : vector<4x48xf32> to vector<4x16xf32>
    %346 = vector.extract_strided_slice %336 {offsets = [0, 48], sizes = [4, 16], strides = [1, 1]} : vector<4x64xf32> to vector<4x16xf32>
    %347 = math.tanh %346 : vector<4x16xf32>
    %348 = arith.mulf %344, %332 : vector<4x16xf32>
    %349 = arith.mulf %343, %347 : vector<4x16xf32>
    %350 = arith.addf %348, %349 : vector<4x16xf32>
    %351 = math.tanh %350 : vector<4x16xf32>
    %352 = arith.mulf %345, %351 : vector<4x16xf32>
    %c0_174 = arith.constant 0 : index
    %c0_175 = arith.constant 0 : index
    %353 = vector.load %arg7[%c0_174, %c0_175] : memref<4x16xf32, #tpu.memory_space<vmem>>, vector<4x16xf32>
    tpu.vector_store %arg7[%c0_174, %c0_175], %352 {strides = array<i32>} : memref<4x16xf32, #tpu.memory_space<vmem>>, vector<4x16xf32>,
    %c0_176 = arith.constant 0 : index
    %c0_177 = arith.constant 0 : index
    %354 = vector.load %arg8[%c0_176, %c0_177] : memref<4x16xf32, #tpu.memory_space<vmem>>, vector<4x16xf32>
    tpu.vector_store %arg8[%c0_176, %c0_177], %350 {strides = array<i32>} : memref<4x16xf32, #tpu.memory_space<vmem>>, vector<4x16xf32>,
    %355 = arith.truncf %352 : vector<4x16xf32> to vector<4x16xbf16>
    %356 = arith.index_cast %c5_i32 : i32 to index
    %c0_178 = arith.constant 0 : index
    %c0_179 = arith.constant 0 : index
    %357 = vector.load %arg5[%356, %c0_178, %c0_179] : memref<8x4x16xbf16, #tpu.memory_space<vmem>>, vector<1x4x16xbf16>
    %358 = vector.shape_cast %357 : vector<1x4x16xbf16> to vector<4x16xbf16>
    %359 = vector.shape_cast %355 : vector<4x16xbf16> to vector<1x4x16xbf16>
    tpu.vector_store %arg5[%356, %c0_178, %c0_179], %359 {strides = array<i32>} : memref<8x4x16xbf16, #tpu.memory_space<vmem>>, vector<1x4x16xbf16>,
    %c7_i32_180 = arith.constant 7 : i32
    %360 = arith.subi %c7_i32_180, %c5_i32 : i32
    %361 = arith.index_cast %360 : i32 to index
    %c0_181 = arith.constant 0 : index
    %c0_182 = arith.constant 0 : index
    %362 = vector.load %arg2[%361, %c0_181, %c0_182] : memref<8x4x64xf32, #tpu.memory_space<vmem>>, vector<1x4x64xf32>
    %363 = vector.shape_cast %362 : vector<1x4x64xf32> to vector<4x64xf32>
    %c0_183 = arith.constant 0 : index
    %c0_184 = arith.constant 0 : index
    %364 = vector.load %arg9[%c0_183, %c0_184] : memref<4x16xf32, #tpu.memory_space<vmem>>, vector<4x16xf32>
    %c0_185 = arith.constant 0 : index
    %c0_186 = arith.constant 0 : index
    %365 = vector.load %arg10[%c0_185, %c0_186] : memref<4x16xf32, #tpu.memory_space<vmem>>, vector<4x16xf32>
    %366 = arith.truncf %364 : vector<4x16xf32> to vector<4x16xbf16>
    %c0_187 = arith.constant 0 : index
    %c0_188 = arith.constant 0 : index
    %367 = vector.load %arg4[%c0_187, %c0_188] : memref<16x64xbf16, #tpu.memory_space<vmem>>, vector<16x64xbf16>
    %cst_189 = arith.constant dense<0.000000e+00> : vector<4x64xf32>
    %368 = tpu.matmul %366, %367, %cst_189 {dimension_numbers = #tpu.dot_dimension_numbers<[1], [0], [0], [1], [0, 0, 1, 1], [], []>} : vector<4x16xbf16>, vector<16x64xbf16>, vector<4x64xf32> -> vector<4x64xf32>
    %369 = arith.addf %363, %368 : vector<4x64xf32>
    %370 = vector.extract_strided_slice %369 {offsets = [0, 0], sizes = [4, 48], strides = [1, 1]} : vector<4x64xf32> to vector<4x48xf32>
    %371 = arith.negf %370 : vector<4x48xf32>
    %372 = math.exp %371 : vector<4x48xf32>
    %cst_190 = arith.constant 1.000000e+00 : f32
    %373 = vector.broadcast %cst_190 : f32 to vector<4x48xf32>
    %374 = arith.addf %373, %372 : vector<4x48xf32>
    %375 = arith.divf %373, %374 : vector<4x48xf32>
    %376 = vector.extract_strided_slice %375 {offsets = [0, 0], sizes = [4, 16], strides = [1, 1]} : vector<4x48xf32> to vector<4x16xf32>
    %377 = vector.extract_strided_slice %375 {offsets = [0, 16], sizes = [4, 16], strides = [1, 1]} : vector<4x48xf32> to vector<4x16xf32>
    %378 = vector.extract_strided_slice %375 {offsets = [0, 32], sizes = [4, 16], strides = [1, 1]} : vector<4x48xf32> to vector<4x16xf32>
    %379 = vector.extract_strided_slice %369 {offsets = [0, 48], sizes = [4, 16], strides = [1, 1]} : vector<4x64xf32> to vector<4x16xf32>
    %380 = math.tanh %379 : vector<4x16xf32>
    %381 = arith.mulf %377, %365 : vector<4x16xf32>
    %382 = arith.mulf %376, %380 : vector<4x16xf32>
    %383 = arith.addf %381, %382 : vector<4x16xf32>
    %384 = math.tanh %383 : vector<4x16xf32>
    %385 = arith.mulf %378, %384 : vector<4x16xf32>
    %c0_191 = arith.constant 0 : index
    %c0_192 = arith.constant 0 : index
    %386 = vector.load %arg9[%c0_191, %c0_192] : memref<4x16xf32, #tpu.memory_space<vmem>>, vector<4x16xf32>
    tpu.vector_store %arg9[%c0_191, %c0_192], %385 {strides = array<i32>} : memref<4x16xf32, #tpu.memory_space<vmem>>, vector<4x16xf32>,
    %c0_193 = arith.constant 0 : index
    %c0_194 = arith.constant 0 : index
    %387 = vector.load %arg10[%c0_193, %c0_194] : memref<4x16xf32, #tpu.memory_space<vmem>>, vector<4x16xf32>
    tpu.vector_store %arg10[%c0_193, %c0_194], %383 {strides = array<i32>} : memref<4x16xf32, #tpu.memory_space<vmem>>, vector<4x16xf32>,
    %388 = arith.truncf %385 : vector<4x16xf32> to vector<4x16xbf16>
    %389 = arith.index_cast %360 : i32 to index
    %c0_195 = arith.constant 0 : index
    %c0_196 = arith.constant 0 : index
    %390 = vector.load %arg6[%389, %c0_195, %c0_196] : memref<8x4x16xbf16, #tpu.memory_space<vmem>>, vector<1x4x16xbf16>
    %391 = vector.shape_cast %390 : vector<1x4x16xbf16> to vector<4x16xbf16>
    %392 = vector.shape_cast %388 : vector<4x16xbf16> to vector<1x4x16xbf16>
    tpu.vector_store %arg6[%389, %c0_195, %c0_196], %392 {strides = array<i32>} : memref<8x4x16xbf16, #tpu.memory_space<vmem>>, vector<1x4x16xbf16>,
    %c6_i32 = arith.constant 6 : i32
    %393 = arith.index_cast %c6_i32 : i32 to index
    %c0_197 = arith.constant 0 : index
    %c0_198 = arith.constant 0 : index
    %394 = vector.load %arg1[%393, %c0_197, %c0_198] : memref<8x4x64xf32, #tpu.memory_space<vmem>>, vector<1x4x64xf32>
    %395 = vector.shape_cast %394 : vector<1x4x64xf32> to vector<4x64xf32>
    %c0_199 = arith.constant 0 : index
    %c0_200 = arith.constant 0 : index
    %396 = vector.load %arg7[%c0_199, %c0_200] : memref<4x16xf32, #tpu.memory_space<vmem>>, vector<4x16xf32>
    %c0_201 = arith.constant 0 : index
    %c0_202 = arith.constant 0 : index
    %397 = vector.load %arg8[%c0_201, %c0_202] : memref<4x16xf32, #tpu.memory_space<vmem>>, vector<4x16xf32>
    %398 = arith.truncf %396 : vector<4x16xf32> to vector<4x16xbf16>
    %c0_203 = arith.constant 0 : index
    %c0_204 = arith.constant 0 : index
    %399 = vector.load %arg3[%c0_203, %c0_204] : memref<16x64xbf16, #tpu.memory_space<vmem>>, vector<16x64xbf16>
    %cst_205 = arith.constant dense<0.000000e+00> : vector<4x64xf32>
    %400 = tpu.matmul %398, %399, %cst_205 {dimension_numbers = #tpu.dot_dimension_numbers<[1], [0], [0], [1], [0, 0, 1, 1], [], []>} : vector<4x16xbf16>, vector<16x64xbf16>, vector<4x64xf32> -> vector<4x64xf32>
    %401 = arith.addf %395, %400 : vector<4x64xf32>
    %402 = vector.extract_strided_slice %401 {offsets = [0, 0], sizes = [4, 48], strides = [1, 1]} : vector<4x64xf32> to vector<4x48xf32>
    %403 = arith.negf %402 : vector<4x48xf32>
    %404 = math.exp %403 : vector<4x48xf32>
    %cst_206 = arith.constant 1.000000e+00 : f32
    %405 = vector.broadcast %cst_206 : f32 to vector<4x48xf32>
    %406 = arith.addf %405, %404 : vector<4x48xf32>
    %407 = arith.divf %405, %406 : vector<4x48xf32>
    %408 = vector.extract_strided_slice %407 {offsets = [0, 0], sizes = [4, 16], strides = [1, 1]} : vector<4x48xf32> to vector<4x16xf32>
    %409 = vector.extract_strided_slice %407 {offsets = [0, 16], sizes = [4, 16], strides = [1, 1]} : vector<4x48xf32> to vector<4x16xf32>
    %410 = vector.extract_strided_slice %407 {offsets = [0, 32], sizes = [4, 16], strides = [1, 1]} : vector<4x48xf32> to vector<4x16xf32>
    %411 = vector.extract_strided_slice %401 {offsets = [0, 48], sizes = [4, 16], strides = [1, 1]} : vector<4x64xf32> to vector<4x16xf32>
    %412 = math.tanh %411 : vector<4x16xf32>
    %413 = arith.mulf %409, %397 : vector<4x16xf32>
    %414 = arith.mulf %408, %412 : vector<4x16xf32>
    %415 = arith.addf %413, %414 : vector<4x16xf32>
    %416 = math.tanh %415 : vector<4x16xf32>
    %417 = arith.mulf %410, %416 : vector<4x16xf32>
    %c0_207 = arith.constant 0 : index
    %c0_208 = arith.constant 0 : index
    %418 = vector.load %arg7[%c0_207, %c0_208] : memref<4x16xf32, #tpu.memory_space<vmem>>, vector<4x16xf32>
    tpu.vector_store %arg7[%c0_207, %c0_208], %417 {strides = array<i32>} : memref<4x16xf32, #tpu.memory_space<vmem>>, vector<4x16xf32>,
    %c0_209 = arith.constant 0 : index
    %c0_210 = arith.constant 0 : index
    %419 = vector.load %arg8[%c0_209, %c0_210] : memref<4x16xf32, #tpu.memory_space<vmem>>, vector<4x16xf32>
    tpu.vector_store %arg8[%c0_209, %c0_210], %415 {strides = array<i32>} : memref<4x16xf32, #tpu.memory_space<vmem>>, vector<4x16xf32>,
    %420 = arith.truncf %417 : vector<4x16xf32> to vector<4x16xbf16>
    %421 = arith.index_cast %c6_i32 : i32 to index
    %c0_211 = arith.constant 0 : index
    %c0_212 = arith.constant 0 : index
    %422 = vector.load %arg5[%421, %c0_211, %c0_212] : memref<8x4x16xbf16, #tpu.memory_space<vmem>>, vector<1x4x16xbf16>
    %423 = vector.shape_cast %422 : vector<1x4x16xbf16> to vector<4x16xbf16>
    %424 = vector.shape_cast %420 : vector<4x16xbf16> to vector<1x4x16xbf16>
    tpu.vector_store %arg5[%421, %c0_211, %c0_212], %424 {strides = array<i32>} : memref<8x4x16xbf16, #tpu.memory_space<vmem>>, vector<1x4x16xbf16>,
    %c7_i32_213 = arith.constant 7 : i32
    %425 = arith.subi %c7_i32_213, %c6_i32 : i32
    %426 = arith.index_cast %425 : i32 to index
    %c0_214 = arith.constant 0 : index
    %c0_215 = arith.constant 0 : index
    %427 = vector.load %arg2[%426, %c0_214, %c0_215] : memref<8x4x64xf32, #tpu.memory_space<vmem>>, vector<1x4x64xf32>
    %428 = vector.shape_cast %427 : vector<1x4x64xf32> to vector<4x64xf32>
    %c0_216 = arith.constant 0 : index
    %c0_217 = arith.constant 0 : index
    %429 = vector.load %arg9[%c0_216, %c0_217] : memref<4x16xf32, #tpu.memory_space<vmem>>, vector<4x16xf32>
    %c0_218 = arith.constant 0 : index
    %c0_219 = arith.constant 0 : index
    %430 = vector.load %arg10[%c0_218, %c0_219] : memref<4x16xf32, #tpu.memory_space<vmem>>, vector<4x16xf32>
    %431 = arith.truncf %429 : vector<4x16xf32> to vector<4x16xbf16>
    %c0_220 = arith.constant 0 : index
    %c0_221 = arith.constant 0 : index
    %432 = vector.load %arg4[%c0_220, %c0_221] : memref<16x64xbf16, #tpu.memory_space<vmem>>, vector<16x64xbf16>
    %cst_222 = arith.constant dense<0.000000e+00> : vector<4x64xf32>
    %433 = tpu.matmul %431, %432, %cst_222 {dimension_numbers = #tpu.dot_dimension_numbers<[1], [0], [0], [1], [0, 0, 1, 1], [], []>} : vector<4x16xbf16>, vector<16x64xbf16>, vector<4x64xf32> -> vector<4x64xf32>
    %434 = arith.addf %428, %433 : vector<4x64xf32>
    %435 = vector.extract_strided_slice %434 {offsets = [0, 0], sizes = [4, 48], strides = [1, 1]} : vector<4x64xf32> to vector<4x48xf32>
    %436 = arith.negf %435 : vector<4x48xf32>
    %437 = math.exp %436 : vector<4x48xf32>
    %cst_223 = arith.constant 1.000000e+00 : f32
    %438 = vector.broadcast %cst_223 : f32 to vector<4x48xf32>
    %439 = arith.addf %438, %437 : vector<4x48xf32>
    %440 = arith.divf %438, %439 : vector<4x48xf32>
    %441 = vector.extract_strided_slice %440 {offsets = [0, 0], sizes = [4, 16], strides = [1, 1]} : vector<4x48xf32> to vector<4x16xf32>
    %442 = vector.extract_strided_slice %440 {offsets = [0, 16], sizes = [4, 16], strides = [1, 1]} : vector<4x48xf32> to vector<4x16xf32>
    %443 = vector.extract_strided_slice %440 {offsets = [0, 32], sizes = [4, 16], strides = [1, 1]} : vector<4x48xf32> to vector<4x16xf32>
    %444 = vector.extract_strided_slice %434 {offsets = [0, 48], sizes = [4, 16], strides = [1, 1]} : vector<4x64xf32> to vector<4x16xf32>
    %445 = math.tanh %444 : vector<4x16xf32>
    %446 = arith.mulf %442, %430 : vector<4x16xf32>
    %447 = arith.mulf %441, %445 : vector<4x16xf32>
    %448 = arith.addf %446, %447 : vector<4x16xf32>
    %449 = math.tanh %448 : vector<4x16xf32>
    %450 = arith.mulf %443, %449 : vector<4x16xf32>
    %c0_224 = arith.constant 0 : index
    %c0_225 = arith.constant 0 : index
    %451 = vector.load %arg9[%c0_224, %c0_225] : memref<4x16xf32, #tpu.memory_space<vmem>>, vector<4x16xf32>
    tpu.vector_store %arg9[%c0_224, %c0_225], %450 {strides = array<i32>} : memref<4x16xf32, #tpu.memory_space<vmem>>, vector<4x16xf32>,
    %c0_226 = arith.constant 0 : index
    %c0_227 = arith.constant 0 : index
    %452 = vector.load %arg10[%c0_226, %c0_227] : memref<4x16xf32, #tpu.memory_space<vmem>>, vector<4x16xf32>
    tpu.vector_store %arg10[%c0_226, %c0_227], %448 {strides = array<i32>} : memref<4x16xf32, #tpu.memory_space<vmem>>, vector<4x16xf32>,
    %453 = arith.truncf %450 : vector<4x16xf32> to vector<4x16xbf16>
    %454 = arith.index_cast %425 : i32 to index
    %c0_228 = arith.constant 0 : index
    %c0_229 = arith.constant 0 : index
    %455 = vector.load %arg6[%454, %c0_228, %c0_229] : memref<8x4x16xbf16, #tpu.memory_space<vmem>>, vector<1x4x16xbf16>
    %456 = vector.shape_cast %455 : vector<1x4x16xbf16> to vector<4x16xbf16>
    %457 = vector.shape_cast %453 : vector<4x16xbf16> to vector<1x4x16xbf16>
    tpu.vector_store %arg6[%454, %c0_228, %c0_229], %457 {strides = array<i32>} : memref<8x4x16xbf16, #tpu.memory_space<vmem>>, vector<1x4x16xbf16>,
    %c7_i32_230 = arith.constant 7 : i32
    %458 = arith.index_cast %c7_i32_230 : i32 to index
    %c0_231 = arith.constant 0 : index
    %c0_232 = arith.constant 0 : index
    %459 = vector.load %arg1[%458, %c0_231, %c0_232] : memref<8x4x64xf32, #tpu.memory_space<vmem>>, vector<1x4x64xf32>
    %460 = vector.shape_cast %459 : vector<1x4x64xf32> to vector<4x64xf32>
    %c0_233 = arith.constant 0 : index
    %c0_234 = arith.constant 0 : index
    %461 = vector.load %arg7[%c0_233, %c0_234] : memref<4x16xf32, #tpu.memory_space<vmem>>, vector<4x16xf32>
    %c0_235 = arith.constant 0 : index
    %c0_236 = arith.constant 0 : index
    %462 = vector.load %arg8[%c0_235, %c0_236] : memref<4x16xf32, #tpu.memory_space<vmem>>, vector<4x16xf32>
    %463 = arith.truncf %461 : vector<4x16xf32> to vector<4x16xbf16>
    %c0_237 = arith.constant 0 : index
    %c0_238 = arith.constant 0 : index
    %464 = vector.load %arg3[%c0_237, %c0_238] : memref<16x64xbf16, #tpu.memory_space<vmem>>, vector<16x64xbf16>
    %cst_239 = arith.constant dense<0.000000e+00> : vector<4x64xf32>
    %465 = tpu.matmul %463, %464, %cst_239 {dimension_numbers = #tpu.dot_dimension_numbers<[1], [0], [0], [1], [0, 0, 1, 1], [], []>} : vector<4x16xbf16>, vector<16x64xbf16>, vector<4x64xf32> -> vector<4x64xf32>
    %466 = arith.addf %460, %465 : vector<4x64xf32>
    %467 = vector.extract_strided_slice %466 {offsets = [0, 0], sizes = [4, 48], strides = [1, 1]} : vector<4x64xf32> to vector<4x48xf32>
    %468 = arith.negf %467 : vector<4x48xf32>
    %469 = math.exp %468 : vector<4x48xf32>
    %cst_240 = arith.constant 1.000000e+00 : f32
    %470 = vector.broadcast %cst_240 : f32 to vector<4x48xf32>
    %471 = arith.addf %470, %469 : vector<4x48xf32>
    %472 = arith.divf %470, %471 : vector<4x48xf32>
    %473 = vector.extract_strided_slice %472 {offsets = [0, 0], sizes = [4, 16], strides = [1, 1]} : vector<4x48xf32> to vector<4x16xf32>
    %474 = vector.extract_strided_slice %472 {offsets = [0, 16], sizes = [4, 16], strides = [1, 1]} : vector<4x48xf32> to vector<4x16xf32>
    %475 = vector.extract_strided_slice %472 {offsets = [0, 32], sizes = [4, 16], strides = [1, 1]} : vector<4x48xf32> to vector<4x16xf32>
    %476 = vector.extract_strided_slice %466 {offsets = [0, 48], sizes = [4, 16], strides = [1, 1]} : vector<4x64xf32> to vector<4x16xf32>
    %477 = math.tanh %476 : vector<4x16xf32>
    %478 = arith.mulf %474, %462 : vector<4x16xf32>
    %479 = arith.mulf %473, %477 : vector<4x16xf32>
    %480 = arith.addf %478, %479 : vector<4x16xf32>
    %481 = math.tanh %480 : vector<4x16xf32>
    %482 = arith.mulf %475, %481 : vector<4x16xf32>
    %c0_241 = arith.constant 0 : index
    %c0_242 = arith.constant 0 : index
    %483 = vector.load %arg7[%c0_241, %c0_242] : memref<4x16xf32, #tpu.memory_space<vmem>>, vector<4x16xf32>
    tpu.vector_store %arg7[%c0_241, %c0_242], %482 {strides = array<i32>} : memref<4x16xf32, #tpu.memory_space<vmem>>, vector<4x16xf32>,
    %c0_243 = arith.constant 0 : index
    %c0_244 = arith.constant 0 : index
    %484 = vector.load %arg8[%c0_243, %c0_244] : memref<4x16xf32, #tpu.memory_space<vmem>>, vector<4x16xf32>
    tpu.vector_store %arg8[%c0_243, %c0_244], %480 {strides = array<i32>} : memref<4x16xf32, #tpu.memory_space<vmem>>, vector<4x16xf32>,
    %485 = arith.truncf %482 : vector<4x16xf32> to vector<4x16xbf16>
    %486 = arith.index_cast %c7_i32_230 : i32 to index
    %c0_245 = arith.constant 0 : index
    %c0_246 = arith.constant 0 : index
    %487 = vector.load %arg5[%486, %c0_245, %c0_246] : memref<8x4x16xbf16, #tpu.memory_space<vmem>>, vector<1x4x16xbf16>
    %488 = vector.shape_cast %487 : vector<1x4x16xbf16> to vector<4x16xbf16>
    %489 = vector.shape_cast %485 : vector<4x16xbf16> to vector<1x4x16xbf16>
    tpu.vector_store %arg5[%486, %c0_245, %c0_246], %489 {strides = array<i32>} : memref<8x4x16xbf16, #tpu.memory_space<vmem>>, vector<1x4x16xbf16>,
    %c7_i32_247 = arith.constant 7 : i32
    %490 = arith.subi %c7_i32_247, %c7_i32_230 : i32
    %491 = arith.index_cast %490 : i32 to index
    %c0_248 = arith.constant 0 : index
    %c0_249 = arith.constant 0 : index
    %492 = vector.load %arg2[%491, %c0_248, %c0_249] : memref<8x4x64xf32, #tpu.memory_space<vmem>>, vector<1x4x64xf32>
    %493 = vector.shape_cast %492 : vector<1x4x64xf32> to vector<4x64xf32>
    %c0_250 = arith.constant 0 : index
    %c0_251 = arith.constant 0 : index
    %494 = vector.load %arg9[%c0_250, %c0_251] : memref<4x16xf32, #tpu.memory_space<vmem>>, vector<4x16xf32>
    %c0_252 = arith.constant 0 : index
    %c0_253 = arith.constant 0 : index
    %495 = vector.load %arg10[%c0_252, %c0_253] : memref<4x16xf32, #tpu.memory_space<vmem>>, vector<4x16xf32>
    %496 = arith.truncf %494 : vector<4x16xf32> to vector<4x16xbf16>
    %c0_254 = arith.constant 0 : index
    %c0_255 = arith.constant 0 : index
    %497 = vector.load %arg4[%c0_254, %c0_255] : memref<16x64xbf16, #tpu.memory_space<vmem>>, vector<16x64xbf16>
    %cst_256 = arith.constant dense<0.000000e+00> : vector<4x64xf32>
    %498 = tpu.matmul %496, %497, %cst_256 {dimension_numbers = #tpu.dot_dimension_numbers<[1], [0], [0], [1], [0, 0, 1, 1], [], []>} : vector<4x16xbf16>, vector<16x64xbf16>, vector<4x64xf32> -> vector<4x64xf32>
    %499 = arith.addf %493, %498 : vector<4x64xf32>
    %500 = vector.extract_strided_slice %499 {offsets = [0, 0], sizes = [4, 48], strides = [1, 1]} : vector<4x64xf32> to vector<4x48xf32>
    %501 = arith.negf %500 : vector<4x48xf32>
    %502 = math.exp %501 : vector<4x48xf32>
    %cst_257 = arith.constant 1.000000e+00 : f32
    %503 = vector.broadcast %cst_257 : f32 to vector<4x48xf32>
    %504 = arith.addf %503, %502 : vector<4x48xf32>
    %505 = arith.divf %503, %504 : vector<4x48xf32>
    %506 = vector.extract_strided_slice %505 {offsets = [0, 0], sizes = [4, 16], strides = [1, 1]} : vector<4x48xf32> to vector<4x16xf32>
    %507 = vector.extract_strided_slice %505 {offsets = [0, 16], sizes = [4, 16], strides = [1, 1]} : vector<4x48xf32> to vector<4x16xf32>
    %508 = vector.extract_strided_slice %505 {offsets = [0, 32], sizes = [4, 16], strides = [1, 1]} : vector<4x48xf32> to vector<4x16xf32>
    %509 = vector.extract_strided_slice %499 {offsets = [0, 48], sizes = [4, 16], strides = [1, 1]} : vector<4x64xf32> to vector<4x16xf32>
    %510 = math.tanh %509 : vector<4x16xf32>
    %511 = arith.mulf %507, %495 : vector<4x16xf32>
    %512 = arith.mulf %506, %510 : vector<4x16xf32>
    %513 = arith.addf %511, %512 : vector<4x16xf32>
    %514 = math.tanh %513 : vector<4x16xf32>
    %515 = arith.mulf %508, %514 : vector<4x16xf32>
    %c0_258 = arith.constant 0 : index
    %c0_259 = arith.constant 0 : index
    %516 = vector.load %arg9[%c0_258, %c0_259] : memref<4x16xf32, #tpu.memory_space<vmem>>, vector<4x16xf32>
    tpu.vector_store %arg9[%c0_258, %c0_259], %515 {strides = array<i32>} : memref<4x16xf32, #tpu.memory_space<vmem>>, vector<4x16xf32>,
    %c0_260 = arith.constant 0 : index
    %c0_261 = arith.constant 0 : index
    %517 = vector.load %arg10[%c0_260, %c0_261] : memref<4x16xf32, #tpu.memory_space<vmem>>, vector<4x16xf32>
    tpu.vector_store %arg10[%c0_260, %c0_261], %513 {strides = array<i32>} : memref<4x16xf32, #tpu.memory_space<vmem>>, vector<4x16xf32>,
    %518 = arith.truncf %515 : vector<4x16xf32> to vector<4x16xbf16>
    %519 = arith.index_cast %490 : i32 to index
    %c0_262 = arith.constant 0 : index
    %c0_263 = arith.constant 0 : index
    %520 = vector.load %arg6[%519, %c0_262, %c0_263] : memref<8x4x16xbf16, #tpu.memory_space<vmem>>, vector<1x4x16xbf16>
    %521 = vector.shape_cast %520 : vector<1x4x16xbf16> to vector<4x16xbf16>
    %522 = vector.shape_cast %518 : vector<4x16xbf16> to vector<1x4x16xbf16>
    tpu.vector_store %arg6[%519, %c0_262, %c0_263], %522 {strides = array<i32>} : memref<8x4x16xbf16, #tpu.memory_space<vmem>>, vector<1x4x16xbf16>,
    %c8_i32 = arith.constant 8 : i32
    return
  }
  func.func @transform_0(%arg0: i32) -> (i32, i32, i32) {
    %c0_i32 = arith.constant 0 : i32
    %c0_i32_0 = arith.constant 0 : i32
    %c0_i32_1 = arith.constant 0 : i32
    return %arg0, %c0_i32, %c0_i32_0 : i32, i32, i32
  }
  func.func @transform_1(%arg0: i32) -> (i32, i32, i32) {
    %c1_i32 = arith.constant 1 : i32
    %0 = arith.subi %c1_i32, %arg0 : i32
    %c0_i32 = arith.constant 0 : i32
    %c0_i32_0 = arith.constant 0 : i32
    %c0_i32_1 = arith.constant 0 : i32
    return %0, %c0_i32, %c0_i32_0 : i32, i32, i32
  }
  func.func @transform_2(%arg0: i32) -> (i32, i32) {
    %c0_i32 = arith.constant 0 : i32
    %c0_i32_0 = arith.constant 0 : i32
    %c0_i32_1 = arith.constant 0 : i32
    return %c0_i32, %c0_i32_0 : i32, i32
  }
  func.func @transform_3(%arg0: i32) -> (i32, i32) {
    %c0_i32 = arith.constant 0 : i32
    %c0_i32_0 = arith.constant 0 : i32
    %c0_i32_1 = arith.constant 0 : i32
    return %c0_i32, %c0_i32_0 : i32, i32
  }
  func.func @transform_4(%arg0: i32) -> (i32, i32, i32) {
    %c0_i32 = arith.constant 0 : i32
    %c0_i32_0 = arith.constant 0 : i32
    %c0_i32_1 = arith.constant 0 : i32
    return %arg0, %c0_i32, %c0_i32_0 : i32, i32, i32
  }
  func.func @transform_5(%arg0: i32) -> (i32, i32, i32) {
    %c1_i32 = arith.constant 1 : i32
    %0 = arith.subi %c1_i32, %arg0 : i32
    %c0_i32 = arith.constant 0 : i32
    %c0_i32_0 = arith.constant 0 : i32
    %c0_i32_1 = arith.constant 0 : i32
    return %0, %c0_i32, %c0_i32_0 : i32, i32, i32
  }
}

module attributes {stable_mosaic.version = 11 : i64} {
  func.func @_fc_ln_add_kernel(%arg0: i32, %arg1: memref<1x16x16xbf16, #tpu.memory_space<vmem>>, %arg2: memref<1x16x16xbf16, #tpu.memory_space<vmem>>, %arg3: memref<16x32xbf16, #tpu.memory_space<vmem>>, %arg4: memref<16x32xbf16, #tpu.memory_space<vmem>>, %arg5: memref<1x32xf32, #tpu.memory_space<vmem>>, %arg6: memref<1x32x16xf32, #tpu.memory_space<vmem>>, %arg7: memref<1x32x16xf32, #tpu.memory_space<vmem>>) attributes {dimension_semantics = [#tpu.dimension_semantics<parallel>], iteration_bounds = array<i64: 4>, scalar_prefetch = 0 : i64, scratch_operands = 0 : i64, tpu.core_type = #tpu.core_type<tc>, window_params = [{transform_indices = @transform_0, window_bounds = array<i64: 1, 16, 16>}, {transform_indices = @transform_1, window_bounds = array<i64: 1, 16, 16>}, {pipeline_mode = #tpu.pipeline_mode<synchronous>, transform_indices = @transform_2, window_bounds = array<i64: 16, 32>}, {pipeline_mode = #tpu.pipeline_mode<synchronous>, transform_indices = @transform_3, window_bounds = array<i64: 16, 32>}, {pipeline_mode = #tpu.pipeline_mode<synchronous>, transform_indices = @transform_4, window_bounds = array<i64: 1, 32>}, {transform_indices = @transform_5, window_bounds = array<i64: 1, 32, 16>}, {transform_indices = @transform_6, window_bounds = array<i64: 1, 32, 16>}]} {
    %c0 = arith.constant 0 : index
    %c0_0 = arith.constant 0 : index
    %c0_1 = arith.constant 0 : index
    %0 = vector.load %arg1[%c0, %c0_0, %c0_1] : memref<1x16x16xbf16, #tpu.memory_space<vmem>>, vector<1x16x16xbf16>
    %1 = vector.shape_cast %0 : vector<1x16x16xbf16> to vector<16x16xbf16>
    %c0_2 = arith.constant 0 : index
    %c0_3 = arith.constant 0 : index
    %c0_4 = arith.constant 0 : index
    %2 = vector.load %arg2[%c0_2, %c0_3, %c0_4] : memref<1x16x16xbf16, #tpu.memory_space<vmem>>, vector<1x16x16xbf16>
    %3 = vector.shape_cast %2 : vector<1x16x16xbf16> to vector<16x16xbf16>
    %c0_5 = arith.constant 0 : index
    %c0_6 = arith.constant 0 : index
    %4 = vector.load %arg3[%c0_5, %c0_6] : memref<16x32xbf16, #tpu.memory_space<vmem>>, vector<16x32xbf16>
    %cst = arith.constant dense<0.000000e+00> : vector<16x32xf32>
    %5 = tpu.matmul %1, %4, %cst {dimension_numbers = #tpu.dot_dimension_numbers<[1], [0], [0], [1], [0, 0, 1, 1], [], []>} : vector<16x16xbf16>, vector<16x32xbf16>, vector<16x32xf32> -> vector<16x32xf32>
    %c0_7 = arith.constant 0 : index
    %c0_8 = arith.constant 0 : index
    %6 = vector.load %arg4[%c0_7, %c0_8] : memref<16x32xbf16, #tpu.memory_space<vmem>>, vector<16x32xbf16>
    %cst_9 = arith.constant dense<0.000000e+00> : vector<16x32xf32>
    %7 = tpu.matmul %3, %6, %cst_9 {dimension_numbers = #tpu.dot_dimension_numbers<[1], [0], [0], [1], [0, 0, 1, 1], [], []>} : vector<16x16xbf16>, vector<16x32xbf16>, vector<16x32xf32> -> vector<16x32xf32>
    %8 = arith.addf %5, %7 : vector<16x32xf32>
    %c0_10 = arith.constant 0 : index
    %c0_11 = arith.constant 0 : index
    %9 = vector.load %arg5[%c0_10, %c0_11] : memref<1x32xf32, #tpu.memory_space<vmem>>, vector<1x32xf32>
    %10 = vector.broadcast %9 : vector<1x32xf32> to vector<16x32xf32>
    %11 = arith.addf %8, %10 : vector<16x32xf32>
    %cst_12 = arith.constant dense<0.000000e+00> : vector<32xf32>
    %12 = vector.multi_reduction <add>, %11, %cst_12 [0] : vector<16x32xf32> to vector<32xf32>
    %13 = vector.shape_cast %12 : vector<32xf32> to vector<1x32xf32>
    %cst_13 = arith.constant 1.600000e+01 : f32
    %14 = vector.broadcast %cst_13 : f32 to vector<1x32xf32>
    %15 = arith.divf %13, %14 : vector<1x32xf32>
    %16 = vector.broadcast %15 : vector<1x32xf32> to vector<16x32xf32>
    %17 = arith.subf %11, %16 : vector<16x32xf32>
    %18 = arith.mulf %17, %17 : vector<16x32xf32>
    %cst_14 = arith.constant dense<0.000000e+00> : vector<32xf32>
    %19 = vector.multi_reduction <add>, %18, %cst_14 [0] : vector<16x32xf32> to vector<32xf32>
    %20 = vector.shape_cast %19 : vector<32xf32> to vector<1x32xf32>
    %cst_15 = arith.constant 1.600000e+01 : f32
    %21 = vector.broadcast %cst_15 : f32 to vector<1x32xf32>
    %22 = arith.divf %20, %21 : vector<1x32xf32>
    %23 = vector.broadcast %15 : vector<1x32xf32> to vector<16x32xf32>
    %24 = arith.subf %11, %23 : vector<16x32xf32>
    %cst_16 = arith.constant 9.99999974E-6 : f32
    %25 = vector.broadcast %cst_16 : f32 to vector<1x32xf32>
    %26 = arith.addf %22, %25 : vector<1x32xf32>
    %27 = math.rsqrt %26 : vector<1x32xf32>
    %28 = vector.broadcast %27 : vector<1x32xf32> to vector<16x32xf32>
    %29 = arith.mulf %24, %28 : vector<16x32xf32>
    %30 = tpu.transpose %29, [1, 0] : vector<16x32xf32> -> vector<32x16xf32>
    %c0_17 = arith.constant 0 : index
    %c0_18 = arith.constant 0 : index
    %c0_19 = arith.constant 0 : index
    %31 = vector.load %arg6[%c0_17, %c0_18, %c0_19] : memref<1x32x16xf32, #tpu.memory_space<vmem>>, vector<1x32x16xf32>
    %32 = vector.shape_cast %31 : vector<1x32x16xf32> to vector<32x16xf32>
    %33 = arith.addf %30, %32 : vector<32x16xf32>
    %c0_20 = arith.constant 0 : index
    %c0_21 = arith.constant 0 : index
    %c0_22 = arith.constant 0 : index
    %34 = vector.load %arg7[%c0_20, %c0_21, %c0_22] : memref<1x32x16xf32, #tpu.memory_space<vmem>>, vector<1x32x16xf32>
    %35 = vector.shape_cast %34 : vector<1x32x16xf32> to vector<32x16xf32>
    %36 = vector.shape_cast %33 : vector<32x16xf32> to vector<1x32x16xf32>
    tpu.vector_store %arg7[%c0_20, %c0_21, %c0_22], %36 {strides = array<i32>} : memref<1x32x16xf32, #tpu.memory_space<vmem>>, vector<1x32x16xf32>,
    return
  }
  func.func @transform_0(%arg0: i32) -> (i32, i32, i32) {
    %c0_i32 = arith.constant 0 : i32
    %c0_i32_0 = arith.constant 0 : i32
    %c0_i32_1 = arith.constant 0 : i32
    return %arg0, %c0_i32, %c0_i32_0 : i32, i32, i32
  }
  func.func @transform_1(%arg0: i32) -> (i32, i32, i32) {
    %c0_i32 = arith.constant 0 : i32
    %c0_i32_0 = arith.constant 0 : i32
    %c0_i32_1 = arith.constant 0 : i32
    return %arg0, %c0_i32, %c0_i32_0 : i32, i32, i32
  }
  func.func @transform_2(%arg0: i32) -> (i32, i32) {
    %c0_i32 = arith.constant 0 : i32
    %c0_i32_0 = arith.constant 0 : i32
    %c0_i32_1 = arith.constant 0 : i32
    return %c0_i32, %c0_i32_0 : i32, i32
  }
  func.func @transform_3(%arg0: i32) -> (i32, i32) {
    %c0_i32 = arith.constant 0 : i32
    %c0_i32_0 = arith.constant 0 : i32
    %c0_i32_1 = arith.constant 0 : i32
    return %c0_i32, %c0_i32_0 : i32, i32
  }
  func.func @transform_4(%arg0: i32) -> (i32, i32) {
    %c0_i32 = arith.constant 0 : i32
    %c0_i32_0 = arith.constant 0 : i32
    %c0_i32_1 = arith.constant 0 : i32
    return %c0_i32, %c0_i32_0 : i32, i32
  }
  func.func @transform_5(%arg0: i32) -> (i32, i32, i32) {
    %c0_i32 = arith.constant 0 : i32
    %c0_i32_0 = arith.constant 0 : i32
    %c0_i32_1 = arith.constant 0 : i32
    return %arg0, %c0_i32, %c0_i32_0 : i32, i32, i32
  }
  func.func @transform_6(%arg0: i32) -> (i32, i32, i32) {
    %c0_i32 = arith.constant 0 : i32
    %c0_i32_0 = arith.constant 0 : i32
    %c0_i32_1 = arith.constant 0 : i32
    return %arg0, %c0_i32, %c0_i32_0 : i32, i32, i32
  }
}

module attributes {stable_mosaic.version = 11 : i64} {
  func.func @_bilstm_kernel(%arg0: i32, %arg1: memref<4x16x64xf32, #tpu.memory_space<vmem>>, %arg2: memref<4x16x64xf32, #tpu.memory_space<vmem>>, %arg3: memref<16x64xbf16, #tpu.memory_space<vmem>>, %arg4: memref<16x64xbf16, #tpu.memory_space<vmem>>, %arg5: memref<4x16x16xbf16, #tpu.memory_space<vmem>>, %arg6: memref<4x16x16xbf16, #tpu.memory_space<vmem>>, %arg7: memref<16x16xf32, #tpu.memory_space<vmem>>, %arg8: memref<16x16xf32, #tpu.memory_space<vmem>>, %arg9: memref<16x16xf32, #tpu.memory_space<vmem>>, %arg10: memref<16x16xf32, #tpu.memory_space<vmem>>) attributes {dimension_semantics = [#tpu.dimension_semantics<arbitrary>], iteration_bounds = array<i64: 1>, scalar_prefetch = 0 : i64, scratch_operands = 4 : i64, tpu.core_type = #tpu.core_type<tc>, window_params = [{transform_indices = @transform_0, window_bounds = array<i64: 4, 16, 64>}, {transform_indices = @transform_1, window_bounds = array<i64: 4, 16, 64>}, {pipeline_mode = #tpu.pipeline_mode<synchronous>, transform_indices = @transform_2, window_bounds = array<i64: 16, 64>}, {pipeline_mode = #tpu.pipeline_mode<synchronous>, transform_indices = @transform_3, window_bounds = array<i64: 16, 64>}, {transform_indices = @transform_4, window_bounds = array<i64: 4, 16, 16>}, {transform_indices = @transform_5, window_bounds = array<i64: 4, 16, 16>}]} {
    %c0_i32 = arith.constant 0 : i32
    %0 = arith.cmpi eq, %arg0, %c0_i32 : i32
    %1 = arith.extui %0 : i1 to i32
    %c0_i32_0 = arith.constant 0 : i32
    %2 = arith.cmpi ne, %1, %c0_i32_0 : i32
    scf.if %2 {
      %cst_132 = arith.constant 0.000000e+00 : f32
      %263 = vector.broadcast %cst_132 : f32 to vector<16x16xf32>
      %c0_133 = arith.constant 0 : index
      %c0_134 = arith.constant 0 : index
      %264 = vector.load %arg7[%c0_133, %c0_134] : memref<16x16xf32, #tpu.memory_space<vmem>>, vector<16x16xf32>
      tpu.vector_store %arg7[%c0_133, %c0_134], %263 {strides = array<i32>} : memref<16x16xf32, #tpu.memory_space<vmem>>, vector<16x16xf32>,
      %cst_135 = arith.constant 0.000000e+00 : f32
      %265 = vector.broadcast %cst_135 : f32 to vector<16x16xf32>
      %c0_136 = arith.constant 0 : index
      %c0_137 = arith.constant 0 : index
      %266 = vector.load %arg8[%c0_136, %c0_137] : memref<16x16xf32, #tpu.memory_space<vmem>>, vector<16x16xf32>
      tpu.vector_store %arg8[%c0_136, %c0_137], %265 {strides = array<i32>} : memref<16x16xf32, #tpu.memory_space<vmem>>, vector<16x16xf32>,
      %cst_138 = arith.constant 0.000000e+00 : f32
      %267 = vector.broadcast %cst_138 : f32 to vector<16x16xf32>
      %c0_139 = arith.constant 0 : index
      %c0_140 = arith.constant 0 : index
      %268 = vector.load %arg9[%c0_139, %c0_140] : memref<16x16xf32, #tpu.memory_space<vmem>>, vector<16x16xf32>
      tpu.vector_store %arg9[%c0_139, %c0_140], %267 {strides = array<i32>} : memref<16x16xf32, #tpu.memory_space<vmem>>, vector<16x16xf32>,
      %cst_141 = arith.constant 0.000000e+00 : f32
      %269 = vector.broadcast %cst_141 : f32 to vector<16x16xf32>
      %c0_142 = arith.constant 0 : index
      %c0_143 = arith.constant 0 : index
      %270 = vector.load %arg10[%c0_142, %c0_143] : memref<16x16xf32, #tpu.memory_space<vmem>>, vector<16x16xf32>
      tpu.vector_store %arg10[%c0_142, %c0_143], %269 {strides = array<i32>} : memref<16x16xf32, #tpu.memory_space<vmem>>, vector<16x16xf32>,
    } else {
    }
    %c0_i32_1 = arith.constant 0 : i32
    %3 = arith.index_cast %c0_i32_1 : i32 to index
    %c0 = arith.constant 0 : index
    %c0_2 = arith.constant 0 : index
    %4 = vector.load %arg1[%3, %c0, %c0_2] : memref<4x16x64xf32, #tpu.memory_space<vmem>>, vector<1x16x64xf32>
    %5 = vector.shape_cast %4 : vector<1x16x64xf32> to vector<16x64xf32>
    %c0_3 = arith.constant 0 : index
    %c0_4 = arith.constant 0 : index
    %6 = vector.load %arg7[%c0_3, %c0_4] : memref<16x16xf32, #tpu.memory_space<vmem>>, vector<16x16xf32>
    %c0_5 = arith.constant 0 : index
    %c0_6 = arith.constant 0 : index
    %7 = vector.load %arg8[%c0_5, %c0_6] : memref<16x16xf32, #tpu.memory_space<vmem>>, vector<16x16xf32>
    %8 = arith.truncf %6 : vector<16x16xf32> to vector<16x16xbf16>
    %c0_7 = arith.constant 0 : index
    %c0_8 = arith.constant 0 : index
    %9 = vector.load %arg3[%c0_7, %c0_8] : memref<16x64xbf16, #tpu.memory_space<vmem>>, vector<16x64xbf16>
    %cst = arith.constant dense<0.000000e+00> : vector<16x64xf32>
    %10 = tpu.matmul %8, %9, %cst {dimension_numbers = #tpu.dot_dimension_numbers<[1], [0], [0], [1], [0, 0, 1, 1], [], []>} : vector<16x16xbf16>, vector<16x64xbf16>, vector<16x64xf32> -> vector<16x64xf32>
    %11 = arith.addf %5, %10 : vector<16x64xf32>
    %12 = vector.extract_strided_slice %11 {offsets = [0, 0], sizes = [16, 48], strides = [1, 1]} : vector<16x64xf32> to vector<16x48xf32>
    %13 = arith.negf %12 : vector<16x48xf32>
    %14 = math.exp %13 : vector<16x48xf32>
    %cst_9 = arith.constant 1.000000e+00 : f32
    %15 = vector.broadcast %cst_9 : f32 to vector<16x48xf32>
    %16 = arith.addf %15, %14 : vector<16x48xf32>
    %17 = arith.divf %15, %16 : vector<16x48xf32>
    %18 = vector.extract_strided_slice %17 {offsets = [0, 0], sizes = [16, 16], strides = [1, 1]} : vector<16x48xf32> to vector<16x16xf32>
    %19 = vector.extract_strided_slice %17 {offsets = [0, 16], sizes = [16, 16], strides = [1, 1]} : vector<16x48xf32> to vector<16x16xf32>
    %20 = vector.extract_strided_slice %17 {offsets = [0, 32], sizes = [16, 16], strides = [1, 1]} : vector<16x48xf32> to vector<16x16xf32>
    %21 = vector.extract_strided_slice %11 {offsets = [0, 48], sizes = [16, 16], strides = [1, 1]} : vector<16x64xf32> to vector<16x16xf32>
    %22 = math.tanh %21 : vector<16x16xf32>
    %23 = arith.mulf %19, %7 : vector<16x16xf32>
    %24 = arith.mulf %18, %22 : vector<16x16xf32>
    %25 = arith.addf %23, %24 : vector<16x16xf32>
    %26 = math.tanh %25 : vector<16x16xf32>
    %27 = arith.mulf %20, %26 : vector<16x16xf32>
    %c0_10 = arith.constant 0 : index
    %c0_11 = arith.constant 0 : index
    %28 = vector.load %arg7[%c0_10, %c0_11] : memref<16x16xf32, #tpu.memory_space<vmem>>, vector<16x16xf32>
    tpu.vector_store %arg7[%c0_10, %c0_11], %27 {strides = array<i32>} : memref<16x16xf32, #tpu.memory_space<vmem>>, vector<16x16xf32>,
    %c0_12 = arith.constant 0 : index
    %c0_13 = arith.constant 0 : index
    %29 = vector.load %arg8[%c0_12, %c0_13] : memref<16x16xf32, #tpu.memory_space<vmem>>, vector<16x16xf32>
    tpu.vector_store %arg8[%c0_12, %c0_13], %25 {strides = array<i32>} : memref<16x16xf32, #tpu.memory_space<vmem>>, vector<16x16xf32>,
    %30 = arith.truncf %27 : vector<16x16xf32> to vector<16x16xbf16>
    %31 = arith.index_cast %c0_i32_1 : i32 to index
    %c0_14 = arith.constant 0 : index
    %c0_15 = arith.constant 0 : index
    %32 = vector.load %arg5[%31, %c0_14, %c0_15] : memref<4x16x16xbf16, #tpu.memory_space<vmem>>, vector<1x16x16xbf16>
    %33 = vector.shape_cast %32 : vector<1x16x16xbf16> to vector<16x16xbf16>
    %34 = vector.shape_cast %30 : vector<16x16xbf16> to vector<1x16x16xbf16>
    tpu.vector_store %arg5[%31, %c0_14, %c0_15], %34 {strides = array<i32>} : memref<4x16x16xbf16, #tpu.memory_space<vmem>>, vector<1x16x16xbf16>,
    %c3_i32 = arith.constant 3 : i32
    %35 = arith.subi %c3_i32, %c0_i32_1 : i32
    %36 = arith.index_cast %35 : i32 to index
    %c0_16 = arith.constant 0 : index
    %c0_17 = arith.constant 0 : index
    %37 = vector.load %arg2[%36, %c0_16, %c0_17] : memref<4x16x64xf32, #tpu.memory_space<vmem>>, vector<1x16x64xf32>
    %38 = vector.shape_cast %37 : vector<1x16x64xf32> to vector<16x64xf32>
    %c0_18 = arith.constant 0 : index
    %c0_19 = arith.constant 0 : index
    %39 = vector.load %arg9[%c0_18, %c0_19] : memref<16x16xf32, #tpu.memory_space<vmem>>, vector<16x16xf32>
    %c0_20 = arith.constant 0 : index
    %c0_21 = arith.constant 0 : index
    %40 = vector.load %arg10[%c0_20, %c0_21] : memref<16x16xf32, #tpu.memory_space<vmem>>, vector<16x16xf32>
    %41 = arith.truncf %39 : vector<16x16xf32> to vector<16x16xbf16>
    %c0_22 = arith.constant 0 : index
    %c0_23 = arith.constant 0 : index
    %42 = vector.load %arg4[%c0_22, %c0_23] : memref<16x64xbf16, #tpu.memory_space<vmem>>, vector<16x64xbf16>
    %cst_24 = arith.constant dense<0.000000e+00> : vector<16x64xf32>
    %43 = tpu.matmul %41, %42, %cst_24 {dimension_numbers = #tpu.dot_dimension_numbers<[1], [0], [0], [1], [0, 0, 1, 1], [], []>} : vector<16x16xbf16>, vector<16x64xbf16>, vector<16x64xf32> -> vector<16x64xf32>
    %44 = arith.addf %38, %43 : vector<16x64xf32>
    %45 = vector.extract_strided_slice %44 {offsets = [0, 0], sizes = [16, 48], strides = [1, 1]} : vector<16x64xf32> to vector<16x48xf32>
    %46 = arith.negf %45 : vector<16x48xf32>
    %47 = math.exp %46 : vector<16x48xf32>
    %cst_25 = arith.constant 1.000000e+00 : f32
    %48 = vector.broadcast %cst_25 : f32 to vector<16x48xf32>
    %49 = arith.addf %48, %47 : vector<16x48xf32>
    %50 = arith.divf %48, %49 : vector<16x48xf32>
    %51 = vector.extract_strided_slice %50 {offsets = [0, 0], sizes = [16, 16], strides = [1, 1]} : vector<16x48xf32> to vector<16x16xf32>
    %52 = vector.extract_strided_slice %50 {offsets = [0, 16], sizes = [16, 16], strides = [1, 1]} : vector<16x48xf32> to vector<16x16xf32>
    %53 = vector.extract_strided_slice %50 {offsets = [0, 32], sizes = [16, 16], strides = [1, 1]} : vector<16x48xf32> to vector<16x16xf32>
    %54 = vector.extract_strided_slice %44 {offsets = [0, 48], sizes = [16, 16], strides = [1, 1]} : vector<16x64xf32> to vector<16x16xf32>
    %55 = math.tanh %54 : vector<16x16xf32>
    %56 = arith.mulf %52, %40 : vector<16x16xf32>
    %57 = arith.mulf %51, %55 : vector<16x16xf32>
    %58 = arith.addf %56, %57 : vector<16x16xf32>
    %59 = math.tanh %58 : vector<16x16xf32>
    %60 = arith.mulf %53, %59 : vector<16x16xf32>
    %c0_26 = arith.constant 0 : index
    %c0_27 = arith.constant 0 : index
    %61 = vector.load %arg9[%c0_26, %c0_27] : memref<16x16xf32, #tpu.memory_space<vmem>>, vector<16x16xf32>
    tpu.vector_store %arg9[%c0_26, %c0_27], %60 {strides = array<i32>} : memref<16x16xf32, #tpu.memory_space<vmem>>, vector<16x16xf32>,
    %c0_28 = arith.constant 0 : index
    %c0_29 = arith.constant 0 : index
    %62 = vector.load %arg10[%c0_28, %c0_29] : memref<16x16xf32, #tpu.memory_space<vmem>>, vector<16x16xf32>
    tpu.vector_store %arg10[%c0_28, %c0_29], %58 {strides = array<i32>} : memref<16x16xf32, #tpu.memory_space<vmem>>, vector<16x16xf32>,
    %63 = arith.truncf %60 : vector<16x16xf32> to vector<16x16xbf16>
    %64 = arith.index_cast %35 : i32 to index
    %c0_30 = arith.constant 0 : index
    %c0_31 = arith.constant 0 : index
    %65 = vector.load %arg6[%64, %c0_30, %c0_31] : memref<4x16x16xbf16, #tpu.memory_space<vmem>>, vector<1x16x16xbf16>
    %66 = vector.shape_cast %65 : vector<1x16x16xbf16> to vector<16x16xbf16>
    %67 = vector.shape_cast %63 : vector<16x16xbf16> to vector<1x16x16xbf16>
    tpu.vector_store %arg6[%64, %c0_30, %c0_31], %67 {strides = array<i32>} : memref<4x16x16xbf16, #tpu.memory_space<vmem>>, vector<1x16x16xbf16>,
    %c1_i32 = arith.constant 1 : i32
    %68 = arith.index_cast %c1_i32 : i32 to index
    %c0_32 = arith.constant 0 : index
    %c0_33 = arith.constant 0 : index
    %69 = vector.load %arg1[%68, %c0_32, %c0_33] : memref<4x16x64xf32, #tpu.memory_space<vmem>>, vector<1x16x64xf32>
    %70 = vector.shape_cast %69 : vector<1x16x64xf32> to vector<16x64xf32>
    %c0_34 = arith.constant 0 : index
    %c0_35 = arith.constant 0 : index
    %71 = vector.load %arg7[%c0_34, %c0_35] : memref<16x16xf32, #tpu.memory_space<vmem>>, vector<16x16xf32>
    %c0_36 = arith.constant 0 : index
    %c0_37 = arith.constant 0 : index
    %72 = vector.load %arg8[%c0_36, %c0_37] : memref<16x16xf32, #tpu.memory_space<vmem>>, vector<16x16xf32>
    %73 = arith.truncf %71 : vector<16x16xf32> to vector<16x16xbf16>
    %c0_38 = arith.constant 0 : index
    %c0_39 = arith.constant 0 : index
    %74 = vector.load %arg3[%c0_38, %c0_39] : memref<16x64xbf16, #tpu.memory_space<vmem>>, vector<16x64xbf16>
    %cst_40 = arith.constant dense<0.000000e+00> : vector<16x64xf32>
    %75 = tpu.matmul %73, %74, %cst_40 {dimension_numbers = #tpu.dot_dimension_numbers<[1], [0], [0], [1], [0, 0, 1, 1], [], []>} : vector<16x16xbf16>, vector<16x64xbf16>, vector<16x64xf32> -> vector<16x64xf32>
    %76 = arith.addf %70, %75 : vector<16x64xf32>
    %77 = vector.extract_strided_slice %76 {offsets = [0, 0], sizes = [16, 48], strides = [1, 1]} : vector<16x64xf32> to vector<16x48xf32>
    %78 = arith.negf %77 : vector<16x48xf32>
    %79 = math.exp %78 : vector<16x48xf32>
    %cst_41 = arith.constant 1.000000e+00 : f32
    %80 = vector.broadcast %cst_41 : f32 to vector<16x48xf32>
    %81 = arith.addf %80, %79 : vector<16x48xf32>
    %82 = arith.divf %80, %81 : vector<16x48xf32>
    %83 = vector.extract_strided_slice %82 {offsets = [0, 0], sizes = [16, 16], strides = [1, 1]} : vector<16x48xf32> to vector<16x16xf32>
    %84 = vector.extract_strided_slice %82 {offsets = [0, 16], sizes = [16, 16], strides = [1, 1]} : vector<16x48xf32> to vector<16x16xf32>
    %85 = vector.extract_strided_slice %82 {offsets = [0, 32], sizes = [16, 16], strides = [1, 1]} : vector<16x48xf32> to vector<16x16xf32>
    %86 = vector.extract_strided_slice %76 {offsets = [0, 48], sizes = [16, 16], strides = [1, 1]} : vector<16x64xf32> to vector<16x16xf32>
    %87 = math.tanh %86 : vector<16x16xf32>
    %88 = arith.mulf %84, %72 : vector<16x16xf32>
    %89 = arith.mulf %83, %87 : vector<16x16xf32>
    %90 = arith.addf %88, %89 : vector<16x16xf32>
    %91 = math.tanh %90 : vector<16x16xf32>
    %92 = arith.mulf %85, %91 : vector<16x16xf32>
    %c0_42 = arith.constant 0 : index
    %c0_43 = arith.constant 0 : index
    %93 = vector.load %arg7[%c0_42, %c0_43] : memref<16x16xf32, #tpu.memory_space<vmem>>, vector<16x16xf32>
    tpu.vector_store %arg7[%c0_42, %c0_43], %92 {strides = array<i32>} : memref<16x16xf32, #tpu.memory_space<vmem>>, vector<16x16xf32>,
    %c0_44 = arith.constant 0 : index
    %c0_45 = arith.constant 0 : index
    %94 = vector.load %arg8[%c0_44, %c0_45] : memref<16x16xf32, #tpu.memory_space<vmem>>, vector<16x16xf32>
    tpu.vector_store %arg8[%c0_44, %c0_45], %90 {strides = array<i32>} : memref<16x16xf32, #tpu.memory_space<vmem>>, vector<16x16xf32>,
    %95 = arith.truncf %92 : vector<16x16xf32> to vector<16x16xbf16>
    %96 = arith.index_cast %c1_i32 : i32 to index
    %c0_46 = arith.constant 0 : index
    %c0_47 = arith.constant 0 : index
    %97 = vector.load %arg5[%96, %c0_46, %c0_47] : memref<4x16x16xbf16, #tpu.memory_space<vmem>>, vector<1x16x16xbf16>
    %98 = vector.shape_cast %97 : vector<1x16x16xbf16> to vector<16x16xbf16>
    %99 = vector.shape_cast %95 : vector<16x16xbf16> to vector<1x16x16xbf16>
    tpu.vector_store %arg5[%96, %c0_46, %c0_47], %99 {strides = array<i32>} : memref<4x16x16xbf16, #tpu.memory_space<vmem>>, vector<1x16x16xbf16>,
    %c3_i32_48 = arith.constant 3 : i32
    %100 = arith.subi %c3_i32_48, %c1_i32 : i32
    %101 = arith.index_cast %100 : i32 to index
    %c0_49 = arith.constant 0 : index
    %c0_50 = arith.constant 0 : index
    %102 = vector.load %arg2[%101, %c0_49, %c0_50] : memref<4x16x64xf32, #tpu.memory_space<vmem>>, vector<1x16x64xf32>
    %103 = vector.shape_cast %102 : vector<1x16x64xf32> to vector<16x64xf32>
    %c0_51 = arith.constant 0 : index
    %c0_52 = arith.constant 0 : index
    %104 = vector.load %arg9[%c0_51, %c0_52] : memref<16x16xf32, #tpu.memory_space<vmem>>, vector<16x16xf32>
    %c0_53 = arith.constant 0 : index
    %c0_54 = arith.constant 0 : index
    %105 = vector.load %arg10[%c0_53, %c0_54] : memref<16x16xf32, #tpu.memory_space<vmem>>, vector<16x16xf32>
    %106 = arith.truncf %104 : vector<16x16xf32> to vector<16x16xbf16>
    %c0_55 = arith.constant 0 : index
    %c0_56 = arith.constant 0 : index
    %107 = vector.load %arg4[%c0_55, %c0_56] : memref<16x64xbf16, #tpu.memory_space<vmem>>, vector<16x64xbf16>
    %cst_57 = arith.constant dense<0.000000e+00> : vector<16x64xf32>
    %108 = tpu.matmul %106, %107, %cst_57 {dimension_numbers = #tpu.dot_dimension_numbers<[1], [0], [0], [1], [0, 0, 1, 1], [], []>} : vector<16x16xbf16>, vector<16x64xbf16>, vector<16x64xf32> -> vector<16x64xf32>
    %109 = arith.addf %103, %108 : vector<16x64xf32>
    %110 = vector.extract_strided_slice %109 {offsets = [0, 0], sizes = [16, 48], strides = [1, 1]} : vector<16x64xf32> to vector<16x48xf32>
    %111 = arith.negf %110 : vector<16x48xf32>
    %112 = math.exp %111 : vector<16x48xf32>
    %cst_58 = arith.constant 1.000000e+00 : f32
    %113 = vector.broadcast %cst_58 : f32 to vector<16x48xf32>
    %114 = arith.addf %113, %112 : vector<16x48xf32>
    %115 = arith.divf %113, %114 : vector<16x48xf32>
    %116 = vector.extract_strided_slice %115 {offsets = [0, 0], sizes = [16, 16], strides = [1, 1]} : vector<16x48xf32> to vector<16x16xf32>
    %117 = vector.extract_strided_slice %115 {offsets = [0, 16], sizes = [16, 16], strides = [1, 1]} : vector<16x48xf32> to vector<16x16xf32>
    %118 = vector.extract_strided_slice %115 {offsets = [0, 32], sizes = [16, 16], strides = [1, 1]} : vector<16x48xf32> to vector<16x16xf32>
    %119 = vector.extract_strided_slice %109 {offsets = [0, 48], sizes = [16, 16], strides = [1, 1]} : vector<16x64xf32> to vector<16x16xf32>
    %120 = math.tanh %119 : vector<16x16xf32>
    %121 = arith.mulf %117, %105 : vector<16x16xf32>
    %122 = arith.mulf %116, %120 : vector<16x16xf32>
    %123 = arith.addf %121, %122 : vector<16x16xf32>
    %124 = math.tanh %123 : vector<16x16xf32>
    %125 = arith.mulf %118, %124 : vector<16x16xf32>
    %c0_59 = arith.constant 0 : index
    %c0_60 = arith.constant 0 : index
    %126 = vector.load %arg9[%c0_59, %c0_60] : memref<16x16xf32, #tpu.memory_space<vmem>>, vector<16x16xf32>
    tpu.vector_store %arg9[%c0_59, %c0_60], %125 {strides = array<i32>} : memref<16x16xf32, #tpu.memory_space<vmem>>, vector<16x16xf32>,
    %c0_61 = arith.constant 0 : index
    %c0_62 = arith.constant 0 : index
    %127 = vector.load %arg10[%c0_61, %c0_62] : memref<16x16xf32, #tpu.memory_space<vmem>>, vector<16x16xf32>
    tpu.vector_store %arg10[%c0_61, %c0_62], %123 {strides = array<i32>} : memref<16x16xf32, #tpu.memory_space<vmem>>, vector<16x16xf32>,
    %128 = arith.truncf %125 : vector<16x16xf32> to vector<16x16xbf16>
    %129 = arith.index_cast %100 : i32 to index
    %c0_63 = arith.constant 0 : index
    %c0_64 = arith.constant 0 : index
    %130 = vector.load %arg6[%129, %c0_63, %c0_64] : memref<4x16x16xbf16, #tpu.memory_space<vmem>>, vector<1x16x16xbf16>
    %131 = vector.shape_cast %130 : vector<1x16x16xbf16> to vector<16x16xbf16>
    %132 = vector.shape_cast %128 : vector<16x16xbf16> to vector<1x16x16xbf16>
    tpu.vector_store %arg6[%129, %c0_63, %c0_64], %132 {strides = array<i32>} : memref<4x16x16xbf16, #tpu.memory_space<vmem>>, vector<1x16x16xbf16>,
    %c2_i32 = arith.constant 2 : i32
    %133 = arith.index_cast %c2_i32 : i32 to index
    %c0_65 = arith.constant 0 : index
    %c0_66 = arith.constant 0 : index
    %134 = vector.load %arg1[%133, %c0_65, %c0_66] : memref<4x16x64xf32, #tpu.memory_space<vmem>>, vector<1x16x64xf32>
    %135 = vector.shape_cast %134 : vector<1x16x64xf32> to vector<16x64xf32>
    %c0_67 = arith.constant 0 : index
    %c0_68 = arith.constant 0 : index
    %136 = vector.load %arg7[%c0_67, %c0_68] : memref<16x16xf32, #tpu.memory_space<vmem>>, vector<16x16xf32>
    %c0_69 = arith.constant 0 : index
    %c0_70 = arith.constant 0 : index
    %137 = vector.load %arg8[%c0_69, %c0_70] : memref<16x16xf32, #tpu.memory_space<vmem>>, vector<16x16xf32>
    %138 = arith.truncf %136 : vector<16x16xf32> to vector<16x16xbf16>
    %c0_71 = arith.constant 0 : index
    %c0_72 = arith.constant 0 : index
    %139 = vector.load %arg3[%c0_71, %c0_72] : memref<16x64xbf16, #tpu.memory_space<vmem>>, vector<16x64xbf16>
    %cst_73 = arith.constant dense<0.000000e+00> : vector<16x64xf32>
    %140 = tpu.matmul %138, %139, %cst_73 {dimension_numbers = #tpu.dot_dimension_numbers<[1], [0], [0], [1], [0, 0, 1, 1], [], []>} : vector<16x16xbf16>, vector<16x64xbf16>, vector<16x64xf32> -> vector<16x64xf32>
    %141 = arith.addf %135, %140 : vector<16x64xf32>
    %142 = vector.extract_strided_slice %141 {offsets = [0, 0], sizes = [16, 48], strides = [1, 1]} : vector<16x64xf32> to vector<16x48xf32>
    %143 = arith.negf %142 : vector<16x48xf32>
    %144 = math.exp %143 : vector<16x48xf32>
    %cst_74 = arith.constant 1.000000e+00 : f32
    %145 = vector.broadcast %cst_74 : f32 to vector<16x48xf32>
    %146 = arith.addf %145, %144 : vector<16x48xf32>
    %147 = arith.divf %145, %146 : vector<16x48xf32>
    %148 = vector.extract_strided_slice %147 {offsets = [0, 0], sizes = [16, 16], strides = [1, 1]} : vector<16x48xf32> to vector<16x16xf32>
    %149 = vector.extract_strided_slice %147 {offsets = [0, 16], sizes = [16, 16], strides = [1, 1]} : vector<16x48xf32> to vector<16x16xf32>
    %150 = vector.extract_strided_slice %147 {offsets = [0, 32], sizes = [16, 16], strides = [1, 1]} : vector<16x48xf32> to vector<16x16xf32>
    %151 = vector.extract_strided_slice %141 {offsets = [0, 48], sizes = [16, 16], strides = [1, 1]} : vector<16x64xf32> to vector<16x16xf32>
    %152 = math.tanh %151 : vector<16x16xf32>
    %153 = arith.mulf %149, %137 : vector<16x16xf32>
    %154 = arith.mulf %148, %152 : vector<16x16xf32>
    %155 = arith.addf %153, %154 : vector<16x16xf32>
    %156 = math.tanh %155 : vector<16x16xf32>
    %157 = arith.mulf %150, %156 : vector<16x16xf32>
    %c0_75 = arith.constant 0 : index
    %c0_76 = arith.constant 0 : index
    %158 = vector.load %arg7[%c0_75, %c0_76] : memref<16x16xf32, #tpu.memory_space<vmem>>, vector<16x16xf32>
    tpu.vector_store %arg7[%c0_75, %c0_76], %157 {strides = array<i32>} : memref<16x16xf32, #tpu.memory_space<vmem>>, vector<16x16xf32>,
    %c0_77 = arith.constant 0 : index
    %c0_78 = arith.constant 0 : index
    %159 = vector.load %arg8[%c0_77, %c0_78] : memref<16x16xf32, #tpu.memory_space<vmem>>, vector<16x16xf32>
    tpu.vector_store %arg8[%c0_77, %c0_78], %155 {strides = array<i32>} : memref<16x16xf32, #tpu.memory_space<vmem>>, vector<16x16xf32>,
    %160 = arith.truncf %157 : vector<16x16xf32> to vector<16x16xbf16>
    %161 = arith.index_cast %c2_i32 : i32 to index
    %c0_79 = arith.constant 0 : index
    %c0_80 = arith.constant 0 : index
    %162 = vector.load %arg5[%161, %c0_79, %c0_80] : memref<4x16x16xbf16, #tpu.memory_space<vmem>>, vector<1x16x16xbf16>
    %163 = vector.shape_cast %162 : vector<1x16x16xbf16> to vector<16x16xbf16>
    %164 = vector.shape_cast %160 : vector<16x16xbf16> to vector<1x16x16xbf16>
    tpu.vector_store %arg5[%161, %c0_79, %c0_80], %164 {strides = array<i32>} : memref<4x16x16xbf16, #tpu.memory_space<vmem>>, vector<1x16x16xbf16>,
    %c3_i32_81 = arith.constant 3 : i32
    %165 = arith.subi %c3_i32_81, %c2_i32 : i32
    %166 = arith.index_cast %165 : i32 to index
    %c0_82 = arith.constant 0 : index
    %c0_83 = arith.constant 0 : index
    %167 = vector.load %arg2[%166, %c0_82, %c0_83] : memref<4x16x64xf32, #tpu.memory_space<vmem>>, vector<1x16x64xf32>
    %168 = vector.shape_cast %167 : vector<1x16x64xf32> to vector<16x64xf32>
    %c0_84 = arith.constant 0 : index
    %c0_85 = arith.constant 0 : index
    %169 = vector.load %arg9[%c0_84, %c0_85] : memref<16x16xf32, #tpu.memory_space<vmem>>, vector<16x16xf32>
    %c0_86 = arith.constant 0 : index
    %c0_87 = arith.constant 0 : index
    %170 = vector.load %arg10[%c0_86, %c0_87] : memref<16x16xf32, #tpu.memory_space<vmem>>, vector<16x16xf32>
    %171 = arith.truncf %169 : vector<16x16xf32> to vector<16x16xbf16>
    %c0_88 = arith.constant 0 : index
    %c0_89 = arith.constant 0 : index
    %172 = vector.load %arg4[%c0_88, %c0_89] : memref<16x64xbf16, #tpu.memory_space<vmem>>, vector<16x64xbf16>
    %cst_90 = arith.constant dense<0.000000e+00> : vector<16x64xf32>
    %173 = tpu.matmul %171, %172, %cst_90 {dimension_numbers = #tpu.dot_dimension_numbers<[1], [0], [0], [1], [0, 0, 1, 1], [], []>} : vector<16x16xbf16>, vector<16x64xbf16>, vector<16x64xf32> -> vector<16x64xf32>
    %174 = arith.addf %168, %173 : vector<16x64xf32>
    %175 = vector.extract_strided_slice %174 {offsets = [0, 0], sizes = [16, 48], strides = [1, 1]} : vector<16x64xf32> to vector<16x48xf32>
    %176 = arith.negf %175 : vector<16x48xf32>
    %177 = math.exp %176 : vector<16x48xf32>
    %cst_91 = arith.constant 1.000000e+00 : f32
    %178 = vector.broadcast %cst_91 : f32 to vector<16x48xf32>
    %179 = arith.addf %178, %177 : vector<16x48xf32>
    %180 = arith.divf %178, %179 : vector<16x48xf32>
    %181 = vector.extract_strided_slice %180 {offsets = [0, 0], sizes = [16, 16], strides = [1, 1]} : vector<16x48xf32> to vector<16x16xf32>
    %182 = vector.extract_strided_slice %180 {offsets = [0, 16], sizes = [16, 16], strides = [1, 1]} : vector<16x48xf32> to vector<16x16xf32>
    %183 = vector.extract_strided_slice %180 {offsets = [0, 32], sizes = [16, 16], strides = [1, 1]} : vector<16x48xf32> to vector<16x16xf32>
    %184 = vector.extract_strided_slice %174 {offsets = [0, 48], sizes = [16, 16], strides = [1, 1]} : vector<16x64xf32> to vector<16x16xf32>
    %185 = math.tanh %184 : vector<16x16xf32>
    %186 = arith.mulf %182, %170 : vector<16x16xf32>
    %187 = arith.mulf %181, %185 : vector<16x16xf32>
    %188 = arith.addf %186, %187 : vector<16x16xf32>
    %189 = math.tanh %188 : vector<16x16xf32>
    %190 = arith.mulf %183, %189 : vector<16x16xf32>
    %c0_92 = arith.constant 0 : index
    %c0_93 = arith.constant 0 : index
    %191 = vector.load %arg9[%c0_92, %c0_93] : memref<16x16xf32, #tpu.memory_space<vmem>>, vector<16x16xf32>
    tpu.vector_store %arg9[%c0_92, %c0_93], %190 {strides = array<i32>} : memref<16x16xf32, #tpu.memory_space<vmem>>, vector<16x16xf32>,
    %c0_94 = arith.constant 0 : index
    %c0_95 = arith.constant 0 : index
    %192 = vector.load %arg10[%c0_94, %c0_95] : memref<16x16xf32, #tpu.memory_space<vmem>>, vector<16x16xf32>
    tpu.vector_store %arg10[%c0_94, %c0_95], %188 {strides = array<i32>} : memref<16x16xf32, #tpu.memory_space<vmem>>, vector<16x16xf32>,
    %193 = arith.truncf %190 : vector<16x16xf32> to vector<16x16xbf16>
    %194 = arith.index_cast %165 : i32 to index
    %c0_96 = arith.constant 0 : index
    %c0_97 = arith.constant 0 : index
    %195 = vector.load %arg6[%194, %c0_96, %c0_97] : memref<4x16x16xbf16, #tpu.memory_space<vmem>>, vector<1x16x16xbf16>
    %196 = vector.shape_cast %195 : vector<1x16x16xbf16> to vector<16x16xbf16>
    %197 = vector.shape_cast %193 : vector<16x16xbf16> to vector<1x16x16xbf16>
    tpu.vector_store %arg6[%194, %c0_96, %c0_97], %197 {strides = array<i32>} : memref<4x16x16xbf16, #tpu.memory_space<vmem>>, vector<1x16x16xbf16>,
    %c3_i32_98 = arith.constant 3 : i32
    %198 = arith.index_cast %c3_i32_98 : i32 to index
    %c0_99 = arith.constant 0 : index
    %c0_100 = arith.constant 0 : index
    %199 = vector.load %arg1[%198, %c0_99, %c0_100] : memref<4x16x64xf32, #tpu.memory_space<vmem>>, vector<1x16x64xf32>
    %200 = vector.shape_cast %199 : vector<1x16x64xf32> to vector<16x64xf32>
    %c0_101 = arith.constant 0 : index
    %c0_102 = arith.constant 0 : index
    %201 = vector.load %arg7[%c0_101, %c0_102] : memref<16x16xf32, #tpu.memory_space<vmem>>, vector<16x16xf32>
    %c0_103 = arith.constant 0 : index
    %c0_104 = arith.constant 0 : index
    %202 = vector.load %arg8[%c0_103, %c0_104] : memref<16x16xf32, #tpu.memory_space<vmem>>, vector<16x16xf32>
    %203 = arith.truncf %201 : vector<16x16xf32> to vector<16x16xbf16>
    %c0_105 = arith.constant 0 : index
    %c0_106 = arith.constant 0 : index
    %204 = vector.load %arg3[%c0_105, %c0_106] : memref<16x64xbf16, #tpu.memory_space<vmem>>, vector<16x64xbf16>
    %cst_107 = arith.constant dense<0.000000e+00> : vector<16x64xf32>
    %205 = tpu.matmul %203, %204, %cst_107 {dimension_numbers = #tpu.dot_dimension_numbers<[1], [0], [0], [1], [0, 0, 1, 1], [], []>} : vector<16x16xbf16>, vector<16x64xbf16>, vector<16x64xf32> -> vector<16x64xf32>
    %206 = arith.addf %200, %205 : vector<16x64xf32>
    %207 = vector.extract_strided_slice %206 {offsets = [0, 0], sizes = [16, 48], strides = [1, 1]} : vector<16x64xf32> to vector<16x48xf32>
    %208 = arith.negf %207 : vector<16x48xf32>
    %209 = math.exp %208 : vector<16x48xf32>
    %cst_108 = arith.constant 1.000000e+00 : f32
    %210 = vector.broadcast %cst_108 : f32 to vector<16x48xf32>
    %211 = arith.addf %210, %209 : vector<16x48xf32>
    %212 = arith.divf %210, %211 : vector<16x48xf32>
    %213 = vector.extract_strided_slice %212 {offsets = [0, 0], sizes = [16, 16], strides = [1, 1]} : vector<16x48xf32> to vector<16x16xf32>
    %214 = vector.extract_strided_slice %212 {offsets = [0, 16], sizes = [16, 16], strides = [1, 1]} : vector<16x48xf32> to vector<16x16xf32>
    %215 = vector.extract_strided_slice %212 {offsets = [0, 32], sizes = [16, 16], strides = [1, 1]} : vector<16x48xf32> to vector<16x16xf32>
    %216 = vector.extract_strided_slice %206 {offsets = [0, 48], sizes = [16, 16], strides = [1, 1]} : vector<16x64xf32> to vector<16x16xf32>
    %217 = math.tanh %216 : vector<16x16xf32>
    %218 = arith.mulf %214, %202 : vector<16x16xf32>
    %219 = arith.mulf %213, %217 : vector<16x16xf32>
    %220 = arith.addf %218, %219 : vector<16x16xf32>
    %221 = math.tanh %220 : vector<16x16xf32>
    %222 = arith.mulf %215, %221 : vector<16x16xf32>
    %c0_109 = arith.constant 0 : index
    %c0_110 = arith.constant 0 : index
    %223 = vector.load %arg7[%c0_109, %c0_110] : memref<16x16xf32, #tpu.memory_space<vmem>>, vector<16x16xf32>
    tpu.vector_store %arg7[%c0_109, %c0_110], %222 {strides = array<i32>} : memref<16x16xf32, #tpu.memory_space<vmem>>, vector<16x16xf32>,
    %c0_111 = arith.constant 0 : index
    %c0_112 = arith.constant 0 : index
    %224 = vector.load %arg8[%c0_111, %c0_112] : memref<16x16xf32, #tpu.memory_space<vmem>>, vector<16x16xf32>
    tpu.vector_store %arg8[%c0_111, %c0_112], %220 {strides = array<i32>} : memref<16x16xf32, #tpu.memory_space<vmem>>, vector<16x16xf32>,
    %225 = arith.truncf %222 : vector<16x16xf32> to vector<16x16xbf16>
    %226 = arith.index_cast %c3_i32_98 : i32 to index
    %c0_113 = arith.constant 0 : index
    %c0_114 = arith.constant 0 : index
    %227 = vector.load %arg5[%226, %c0_113, %c0_114] : memref<4x16x16xbf16, #tpu.memory_space<vmem>>, vector<1x16x16xbf16>
    %228 = vector.shape_cast %227 : vector<1x16x16xbf16> to vector<16x16xbf16>
    %229 = vector.shape_cast %225 : vector<16x16xbf16> to vector<1x16x16xbf16>
    tpu.vector_store %arg5[%226, %c0_113, %c0_114], %229 {strides = array<i32>} : memref<4x16x16xbf16, #tpu.memory_space<vmem>>, vector<1x16x16xbf16>,
    %c3_i32_115 = arith.constant 3 : i32
    %230 = arith.subi %c3_i32_115, %c3_i32_98 : i32
    %231 = arith.index_cast %230 : i32 to index
    %c0_116 = arith.constant 0 : index
    %c0_117 = arith.constant 0 : index
    %232 = vector.load %arg2[%231, %c0_116, %c0_117] : memref<4x16x64xf32, #tpu.memory_space<vmem>>, vector<1x16x64xf32>
    %233 = vector.shape_cast %232 : vector<1x16x64xf32> to vector<16x64xf32>
    %c0_118 = arith.constant 0 : index
    %c0_119 = arith.constant 0 : index
    %234 = vector.load %arg9[%c0_118, %c0_119] : memref<16x16xf32, #tpu.memory_space<vmem>>, vector<16x16xf32>
    %c0_120 = arith.constant 0 : index
    %c0_121 = arith.constant 0 : index
    %235 = vector.load %arg10[%c0_120, %c0_121] : memref<16x16xf32, #tpu.memory_space<vmem>>, vector<16x16xf32>
    %236 = arith.truncf %234 : vector<16x16xf32> to vector<16x16xbf16>
    %c0_122 = arith.constant 0 : index
    %c0_123 = arith.constant 0 : index
    %237 = vector.load %arg4[%c0_122, %c0_123] : memref<16x64xbf16, #tpu.memory_space<vmem>>, vector<16x64xbf16>
    %cst_124 = arith.constant dense<0.000000e+00> : vector<16x64xf32>
    %238 = tpu.matmul %236, %237, %cst_124 {dimension_numbers = #tpu.dot_dimension_numbers<[1], [0], [0], [1], [0, 0, 1, 1], [], []>} : vector<16x16xbf16>, vector<16x64xbf16>, vector<16x64xf32> -> vector<16x64xf32>
    %239 = arith.addf %233, %238 : vector<16x64xf32>
    %240 = vector.extract_strided_slice %239 {offsets = [0, 0], sizes = [16, 48], strides = [1, 1]} : vector<16x64xf32> to vector<16x48xf32>
    %241 = arith.negf %240 : vector<16x48xf32>
    %242 = math.exp %241 : vector<16x48xf32>
    %cst_125 = arith.constant 1.000000e+00 : f32
    %243 = vector.broadcast %cst_125 : f32 to vector<16x48xf32>
    %244 = arith.addf %243, %242 : vector<16x48xf32>
    %245 = arith.divf %243, %244 : vector<16x48xf32>
    %246 = vector.extract_strided_slice %245 {offsets = [0, 0], sizes = [16, 16], strides = [1, 1]} : vector<16x48xf32> to vector<16x16xf32>
    %247 = vector.extract_strided_slice %245 {offsets = [0, 16], sizes = [16, 16], strides = [1, 1]} : vector<16x48xf32> to vector<16x16xf32>
    %248 = vector.extract_strided_slice %245 {offsets = [0, 32], sizes = [16, 16], strides = [1, 1]} : vector<16x48xf32> to vector<16x16xf32>
    %249 = vector.extract_strided_slice %239 {offsets = [0, 48], sizes = [16, 16], strides = [1, 1]} : vector<16x64xf32> to vector<16x16xf32>
    %250 = math.tanh %249 : vector<16x16xf32>
    %251 = arith.mulf %247, %235 : vector<16x16xf32>
    %252 = arith.mulf %246, %250 : vector<16x16xf32>
    %253 = arith.addf %251, %252 : vector<16x16xf32>
    %254 = math.tanh %253 : vector<16x16xf32>
    %255 = arith.mulf %248, %254 : vector<16x16xf32>
    %c0_126 = arith.constant 0 : index
    %c0_127 = arith.constant 0 : index
    %256 = vector.load %arg9[%c0_126, %c0_127] : memref<16x16xf32, #tpu.memory_space<vmem>>, vector<16x16xf32>
    tpu.vector_store %arg9[%c0_126, %c0_127], %255 {strides = array<i32>} : memref<16x16xf32, #tpu.memory_space<vmem>>, vector<16x16xf32>,
    %c0_128 = arith.constant 0 : index
    %c0_129 = arith.constant 0 : index
    %257 = vector.load %arg10[%c0_128, %c0_129] : memref<16x16xf32, #tpu.memory_space<vmem>>, vector<16x16xf32>
    tpu.vector_store %arg10[%c0_128, %c0_129], %253 {strides = array<i32>} : memref<16x16xf32, #tpu.memory_space<vmem>>, vector<16x16xf32>,
    %258 = arith.truncf %255 : vector<16x16xf32> to vector<16x16xbf16>
    %259 = arith.index_cast %230 : i32 to index
    %c0_130 = arith.constant 0 : index
    %c0_131 = arith.constant 0 : index
    %260 = vector.load %arg6[%259, %c0_130, %c0_131] : memref<4x16x16xbf16, #tpu.memory_space<vmem>>, vector<1x16x16xbf16>
    %261 = vector.shape_cast %260 : vector<1x16x16xbf16> to vector<16x16xbf16>
    %262 = vector.shape_cast %258 : vector<16x16xbf16> to vector<1x16x16xbf16>
    tpu.vector_store %arg6[%259, %c0_130, %c0_131], %262 {strides = array<i32>} : memref<4x16x16xbf16, #tpu.memory_space<vmem>>, vector<1x16x16xbf16>,
    %c4_i32 = arith.constant 4 : i32
    return
  }
  func.func @transform_0(%arg0: i32) -> (i32, i32, i32) {
    %c0_i32 = arith.constant 0 : i32
    %c0_i32_0 = arith.constant 0 : i32
    %c0_i32_1 = arith.constant 0 : i32
    return %arg0, %c0_i32, %c0_i32_0 : i32, i32, i32
  }
  func.func @transform_1(%arg0: i32) -> (i32, i32, i32) {
    %c0_i32 = arith.constant 0 : i32
    %0 = arith.subi %c0_i32, %arg0 : i32
    %c0_i32_0 = arith.constant 0 : i32
    %c0_i32_1 = arith.constant 0 : i32
    %c0_i32_2 = arith.constant 0 : i32
    return %0, %c0_i32_0, %c0_i32_1 : i32, i32, i32
  }
  func.func @transform_2(%arg0: i32) -> (i32, i32) {
    %c0_i32 = arith.constant 0 : i32
    %c0_i32_0 = arith.constant 0 : i32
    %c0_i32_1 = arith.constant 0 : i32
    return %c0_i32, %c0_i32_0 : i32, i32
  }
  func.func @transform_3(%arg0: i32) -> (i32, i32) {
    %c0_i32 = arith.constant 0 : i32
    %c0_i32_0 = arith.constant 0 : i32
    %c0_i32_1 = arith.constant 0 : i32
    return %c0_i32, %c0_i32_0 : i32, i32
  }
  func.func @transform_4(%arg0: i32) -> (i32, i32, i32) {
    %c0_i32 = arith.constant 0 : i32
    %c0_i32_0 = arith.constant 0 : i32
    %c0_i32_1 = arith.constant 0 : i32
    return %arg0, %c0_i32, %c0_i32_0 : i32, i32, i32
  }
  func.func @transform_5(%arg0: i32) -> (i32, i32, i32) {
    %c0_i32 = arith.constant 0 : i32
    %0 = arith.subi %c0_i32, %arg0 : i32
    %c0_i32_0 = arith.constant 0 : i32
    %c0_i32_1 = arith.constant 0 : i32
    %c0_i32_2 = arith.constant 0 : i32
    return %0, %c0_i32_0, %c0_i32_1 : i32, i32, i32
  }
}

</mosaic_0001>

<bundles_post_ra>
// kernel: dprnn_block_forward.6
= control target key start
LH: loop header
LB: loop body
LE: loop exit
PB: predicated region body
PF: predicated region fallthrough
CT: control target
= control target key end

     0   :  { %vm71_vm0 = vcmask 261120   ;;  %vm113_vm1 = vcmask 523264   ;;  %s370_s1 = inlined_call_operand.vmem [shape: bf16[32,64], index: 1, kind: input, shape index: {}]   ;;  %s371_s2 = inlined_call_operand.vmem [shape: bf16[32,64], index: 2, kind: input, shape index: {}]   ;;  %s372_s3 = inlined_call_operand.vmem [shape: f32[1,64], index: 3, kind: input, shape index: {}]   ;;  %s373_s0 = inlined_call_operand.vmem [shape: bf16[64,32], index: 0, kind: input, shape index: {}]   ;;  %s374_s4 = inlined_call_operand.vmem [shape: f32[1,64], index: 4, kind: input, shape index: {}]   ;;  %s375_s5 = inlined_call_operand.vmem [shape: f32[64,64], index: 5, kind: output, shape index: {0}]   ;;  %s376_s6 = inlined_call_operand.vmem [shape: f32[64,64], index: 6, kind: output, shape index: {1}]  }
   0x1   :  { %v232_v0 = vld [vmem:[%s370_s1 + $0x8] sm:$0xff]  ;;  %v231_v2 = vld [vmem:[%s370_s1] sm:$0xff]  ;;  %v229_v5 = vld [vmem:[%s373_s0 + $0x10] sm:$0xff] }
   0x2   :  { %v234_v1 = vld [vmem:[%s371_s2 + $0x8] sm:$0xff]  ;;  %90 = vmatpush.bf16.msra.mxu0 %v232_v0  ;;  %235 = vmatpush.bf16.msra.mxu2 %v232_v0  ;;  %v233_v3 = vld [vmem:[%s371_s2] sm:$0xff]  ;;  %v230_v7 = vld [vmem:[%s373_s0 + $0x18] sm:$0xff] }
   0x3   :  { %148 = vmatpush.bf16.msra.mxu1 %v234_v1  ;;  %237 = vmatpush.bf16.msra.mxu3 %v234_v1  ;;  %v227_v4 = vld [vmem:[%s373_s0] sm:$0xff]  ;;  %v228_v6 = vld [vmem:[%s373_s0 + $0x8] sm:$0xff] }
   0x4   :  { %v239_v8 = vld [vmem:[%s372_s3] ss:$0 sm:$0xff] }
   0x5   :  { %v240_v9 = vld [vmem:[%s374_s4] ss:$0 sm:$0xff] }
   0x6   :  { %91 = vmatpush.bf16.msra.mxu0 %v231_v2  ;;  %236 = vmatpush.bf16.msra.mxu2 %v231_v2 }
   0x7   :  { %149 = vmatpush.bf16.msra.mxu1 %v233_v3  ;;  %238 = vmatpush.bf16.msra.mxu3 %v233_v3 }
   0x9   :  { %211 = vmatmul.msk.bf16.vlgmr.msra.gmra.mxu0 %vm71_vm0, %v227_v4  ;;  %213 = vmatmul.msk.bf16.vlgmr.msra.gmra.mxu2 %vm71_vm0, %v229_v5 }
   0xa   :  { %223 = vmatmul.msk.bf16.vlgmr.msra.gmra.mxu1 %vm71_vm0, %v227_v4  ;;  %225 = vmatmul.msk.bf16.vlgmr.msra.gmra.mxu3 %vm71_vm0, %v229_v5 }
  0x19   :  { %212 = vmatmul.msk.bf16.gmra.mxu0 %vm71_vm0, %v228_v6  ;;  %214 = vmatmul.msk.bf16.gmra.mxu2 %vm71_vm0, %v230_v7 }
  0x1a   :  { %224 = vmatmul.msk.bf16.gmra.mxu1 %vm71_vm0, %v228_v6  ;;  %226 = vmatmul.msk.bf16.gmra.mxu3 %vm71_vm0, %v230_v7 }
  0x86   :  { %v93_v10 = vpop.f32.mrf.mxu0 }
  0x87   :  { %v94_v11 = vadd.f32 %v239_v8, %v93_v10  ;;  %v151_v12 = vpop.f32.mrf.mxu1 }
  0x88   :  { %v152_v13 = vadd.f32 %v240_v9, %v151_v12 }
  0x89   :  { %114 = vst.msk [vmem:[%s375_s5] sm:$0xff] %vm113_vm1, %v94_v11 }
  0x8a   :  { %171 = vst.msk [vmem:[%s376_s6] sm:$0xff] %vm113_vm1, %v152_v13 }
  0x8c   :  { %v103_v14 = vpop.f32.mrf.mxu2 }
  0x8d   :  { %v104_v15 = vadd.f32 %v239_v8, %v103_v14  ;;  %v161_v16 = vpop.f32.mrf.mxu3 }
  0x8e   :  { %v162_v17 = vadd.f32 %v240_v9, %v161_v16  ;;  %v95_v18 = vpop.f32.mrf.mxu0 }
  0x8f   :  { %118 = vst.msk [vmem:[%s375_s5 + $0x20] sm:$0xff] %vm113_vm1, %v104_v15  ;;  %v96_v19 = vadd.f32 %v239_v8, %v95_v18  ;;  %v153_v20 = vpop.f32.mrf.mxu1 }
  0x90   :  { %175 = vst.msk [vmem:[%s376_s6 + $0x20] sm:$0xff] %vm113_vm1, %v162_v17  ;;  %v154_v21 = vadd.f32 %v240_v9, %v153_v20 }
  0x91   :  { %115 = vst.msk [vmem:[%s375_s5 + $0x8] sm:$0xff] %vm113_vm1, %v96_v19 }
  0x92   :  { %172 = vst.msk [vmem:[%s376_s6 + $0x8] sm:$0xff] %vm113_vm1, %v154_v21 }
  0x94   :  { %v105_v22 = vpop.f32.mrf.mxu2 }
  0x95   :  { %v106_v23 = vadd.f32 %v239_v8, %v105_v22  ;;  %v163_v24 = vpop.f32.mrf.mxu3 }
  0x96   :  { %v164_v25 = vadd.f32 %v240_v9, %v163_v24  ;;  %v98_v26 = vpop.f32.mrf.mxu0 }
  0x97   :  { %119 = vst.msk [vmem:[%s375_s5 + $0x28] sm:$0xff] %vm113_vm1, %v106_v23  ;;  %v99_v27 = vadd.f32 %v239_v8, %v98_v26  ;;  %v156_v28 = vpop.f32.mrf.mxu1 }
  0x98   :  { %176 = vst.msk [vmem:[%s376_s6 + $0x28] sm:$0xff] %vm113_vm1, %v164_v25  ;;  %v157_v29 = vadd.f32 %v240_v9, %v156_v28 }
  0x99   :  { %116 = vst.msk [vmem:[%s375_s5 + $0x10] sm:$0xff] %vm113_vm1, %v99_v27 }
  0x9a   :  { %173 = vst.msk [vmem:[%s376_s6 + $0x10] sm:$0xff] %vm113_vm1, %v157_v29 }
  0x9c   :  { %v108_v30 = vpop.f32.mrf.mxu2 }
  0x9d   :  { %v109_v31 = vadd.f32 %v239_v8, %v108_v30  ;;  %v166_v32 = vpop.f32.mrf.mxu3 }
  0x9e   :  { %v167_v33 = vadd.f32 %v240_v9, %v166_v32  ;;  %v100_v34 = vpop.f32.mrf.mxu0 }
  0x9f   :  { %120 = vst.msk [vmem:[%s375_s5 + $0x30] sm:$0xff] %vm113_vm1, %v109_v31  ;;  %v101_v35 = vadd.f32 %v239_v8, %v100_v34  ;;  %v158_v36 = vpop.f32.mrf.mxu1 }
  0xa0   :  { %177 = vst.msk [vmem:[%s376_s6 + $0x30] sm:$0xff] %vm113_vm1, %v167_v33  ;;  %v159_v37 = vadd.f32 %v240_v9, %v158_v36 }
  0xa1   :  { %117 = vst.msk [vmem:[%s375_s5 + $0x18] sm:$0xff] %vm113_vm1, %v101_v35 }
  0xa2   :  { %174 = vst.msk [vmem:[%s376_s6 + $0x18] sm:$0xff] %vm113_vm1, %v159_v37 }
  0xa4   :  { %v110_v38 = vpop.f32.mrf.mxu2 }
  0xa5   :  { %v111_v39 = vadd.f32 %v239_v8, %v110_v38  ;;  %v168_v40 = vpop.f32.mrf.mxu3 }
  0xa6   :  { %v169_v41 = vadd.f32 %v240_v9, %v168_v40 }
  0xa7   :  { %121 = vst.msk [vmem:[%s375_s5 + $0x38] sm:$0xff] %vm113_vm1, %v111_v39 }
  0xa8   :  { %178 = vst.msk [vmem:[%s376_s6 + $0x38] sm:$0xff] %vm113_vm1, %v169_v41 }

// kernel: dprnn_block_forward.8
= control target key start
LH: loop header
LB: loop body
LE: loop exit
PB: predicated region body
PF: predicated region fallthrough
CT: control target
= control target key end

     0   :  { %s632_s21 = smov 0   ;;  %s678_s0 = inlined_call_operand.vmem [shape: bf16[4,16,16], index: 0, kind: input, shape index: {}]   ;;  %s679_s1 = inlined_call_operand.vmem [shape: bf16[4,16,16], index: 1, kind: input, shape index: {}]   ;;  %s680_s2 = inlined_call_operand.vmem [shape: bf16[16,32], index: 2, kind: input, shape index: {}]   ;;  %s681_s3 = inlined_call_operand.vmem [shape: bf16[16,32], index: 3, kind: input, shape index: {}]   ;;  %s682_s4 = inlined_call_operand.vmem [shape: f32[1,32], index: 4, kind: input, shape index: {}]   ;;  %s683_s5 = inlined_call_operand.vmem [shape: f32[4,32,16], index: 5, kind: input, shape index: {}]   ;;  %s684_s6 = inlined_call_operand.vmem [shape: f32[4,32,16], index: 6, kind: output, shape index: {}]  }
   0x1 LB: > { %s532_s22 = sadd.s32 4294967295, %s594_s21   ;;  %p536_p0 = scmp.ge.s32.totalorder %s594_s21, 1  ;;  %s594_s21 = sphi %s632_s21, %s16_s21  }
   0x2   : > { %p232_p1 = scmp.lt.s32.totalorder %s594_s21, 5 }
   0x4   : > { %p233_p2 = pnand %p536_p0, %p232_p1 }
   0x5   : > { %p272_p3 = scmp.lt.s32.totalorder (!%p233_p2), %s532_s22, 3 }
   0x6   : > { %236 = sbr.rel (%p233_p2) target bundleno = 406 (0x196), region = 44 }
   0xb   : > { %v572_v0 = vld [vmem:[%s681_s3] sm:$0xff]  ;;  %s686_s22 = smov (!%p272_p3, %s532_s22), 3  ;;  %vm312_vm0 = vcmask 130048   ;;  %v596_v6 = vmov 16.0   ;;  %vm364_vm1 = vcmask 261120  }
   0xc   : > { %v571_v1 = vld [vmem:[%s680_s2] sm:$0xff]  ;;  %323 = vmatpush.bf16.msra.mxu0 %v572_v0  ;;  %s565_s27 = sshll.u32 %s686_s22, 3  ;;  %584 = vrcp.f32 %v596_v6  ;;  %s567_s12 = sshll.u32 %s686_s22, 5 }
   0xd   : > { %351 = vmatpush.bf16.msra.mxu1 %v571_v1  ;;  %s281_s30 = scalar_lea.vmem %s679_s1, %s565_s27  ;;  %s276_s9 = scalar_lea.vmem %s678_s0, %s565_s27  ;;  %v583_v8 = vld [vmem:[%s682_s4] ss:$0 sm:$0xff] }
   0xe   : > { %v570_v2 = vld [vmem:[%s281_s30] sm:$0xff]  ;;  %s286_s15 = scalar_lea.vmem %s683_s5, %s567_s12  ;;  %s291_s18 = scalar_lea.vmem %s684_s6, %s567_s12 }
   0xf   : > { %v569_v3 = vld [vmem:[%s276_s9] sm:$0xff]  ;;  %553 = vmatmul.msk.bf16.vlgmr.msra.gmra.mxu0 %vm312_vm0, %v570_v2  ;;  %v442_v57 = vld [vmem:[%s286_s15 + $0x8] sm:$0xff]  ;;  %v443_v60 = vld [vmem:[%s286_s15 + $0x10] sm:$0xff] }
  0x10   : > { %562 = vmatmul.msk.bf16.vlgmr.msra.gmra.mxu1 %vm312_vm0, %v569_v3  ;;  %v441_v54 = vld [vmem:[%s286_s15] sm:$0xff]  ;;  %v444_v63 = vld [vmem:[%s286_s15 + $0x18] sm:$0xff] }
  0x12   : > { %v585_v9 = vpop.eup %584 }
  0x13   : > { %v375_v14 = vmul.f32 16.0, %v585_v9  ;;  %vm379_vm2 = vweird.f32 %v585_v9 }
  0x15   : > { %v376_v18 = vsub.f32 1.0, %v375_v14 }
  0x17   : > { %v377_v21 = vmul.f32 %v585_v9, %v376_v18 }
  0x19   : > { %v378_v24 = vadd.f32 %v585_v9, %v377_v21 }
  0x1b   : > { %v380_v27 = vsel %vm379_vm2, %v585_v9, %v378_v24 }
  0x8c   : > { %v325_v4 = vpop.f32.mrf.mxu0 }
  0x8d   : > { %v353_v5 = vpop.f32.mrf.mxu1 }
  0x8e   : > { %v354_v7 = vadd.f32 %v353_v5, %v325_v4 }
  0x90   : > { %v362_v12 = vadd.f32 %v583_v8, %v354_v7 }
  0x92   : > { %v365_v16 = vsel %vm364_vm1, %v362_v12, 0.0 }
  0x94   : > { %v327_v10 = vpop.f32.mrf.mxu0 }
  0x95   : > { %v355_v11 = vpop.f32.mrf.mxu1 }
  0x96   : > { %v356_v13 = vadd.f32 %v355_v11, %v327_v10 }
  0x98   : > { %v363_v15 = vadd.f32 %v583_v8, %v356_v13 }
  0x9a   : > { %v366_v17 = vsel %vm364_vm1, %v363_v15, 0.0 }
  0x9b   : > { %v367_v19 = vadd.f32 %v366_v17, %v365_v16 }
  0x9d   : > { %v368_v20 = vrot.slane %v367_v19, 4 }
  0x9f   : > { %v369_v22 = vadd.f32 %v368_v20, %v367_v19 }
  0xa1   : > { %v370_v23 = vrot.slane %v369_v22, 2 }
  0xa3   : > { %v371_v25 = vadd.f32 %v370_v23, %v369_v22 }
  0xa5   : > { %v372_v26 = vrot.slane %v371_v25, 1 }
  0xa7   : > { %v373_v28 = vadd.f32 %v372_v26, %v371_v25 }
  0xa9   : > { %v381_v29 = vmul.f32 %v380_v27, %v373_v28 }
  0xab   : > { %v382_v30 = vsub.f32 %v362_v12, %v381_v29  ;;  %v383_v31 = vsub.f32 %v363_v15, %v381_v29 }
  0xad   : > { %v384_v32 = vmul.f32 %v382_v30, %v382_v30  ;;  %v385_v33 = vmul.f32 %v383_v31, %v383_v31 }
  0xaf   : > { %v386_v34 = vsel %vm364_vm1, %v384_v32, 0.0  ;;  %v387_v35 = vsel %vm364_vm1, %v385_v33, 0.0 }
  0xb0   : > { %v388_v36 = vadd.f32 %v387_v35, %v386_v34 }
  0xb2   : > { %v389_v37 = vrot.slane %v388_v36, 4 }
  0xb4   : > { %v390_v38 = vadd.f32 %v389_v37, %v388_v36 }
  0xb6   : > { %v391_v39 = vrot.slane %v390_v38, 2 }
  0xb8   : > { %v392_v40 = vadd.f32 %v391_v39, %v390_v38 }
  0xba   : > { %v393_v41 = vrot.slane %v392_v40, 1 }
  0xbc   : > { %v394_v42 = vadd.f32 %v393_v41, %v392_v40 }
  0xbe   : > { %v395_v43 = vmul.f32 %v394_v42, %v380_v27 }
  0xc0   : > { %v396_v44 = vadd.f32 1e-05, %v395_v43 }
  0xc2   : > { %586 = vrsqrt.f32 %v396_v44  ;;  %vm403_vm4 = vweird.f32 %v396_v44 }
  0xc8   : > { %v587_v45 = vpop.eup %586 }
  0xc9   : > { %v398_v46 = vmul.f32 %v587_v45, %v396_v44  ;;  %vm404_vm3 = vweird.f32 %v587_v45 }
  0xca   : > { %vm405_vm5 = vmor %vm403_vm4, %vm404_vm3 }
  0xcb   : > { %v399_v47 = vmul.f32 %v587_v45, %v398_v46 }
  0xcd   : > { %v400_v48 = vmul.f32 0.5, %v399_v47 }
  0xcf   : > { %v401_v49 = vsub.f32 1.5, %v400_v48 }
  0xd1   : > { %v402_v50 = vmul.f32 %v587_v45, %v401_v49 }
  0xd3   : > { %v406_v51 = vsel %vm405_vm5, %v587_v45, %v402_v50 }
  0xd4   : > { %v407_v52 = vmul.f32 %v406_v51, %v382_v30  ;;  %v408_v53 = vmul.f32 %v406_v51, %v383_v31 }
  0xd6   : > { %409 = vxpose.xlu0.b32.start [1/2] (short) (narrow) %v407_v52, 32 }
  0xde   : > { %410 = vxpose.xlu0.b32.end [2/2] (short) (narrow) %v408_v53, 32 }
 0x17a   : > { %v425_v55 = vpop.trf.xlu0 }
 0x17b   : > { %v445_v56 = vadd.f32 %v441_v54, %v425_v55 }
 0x17d   : > { %449 = vst.msk [vmem:[%s291_s18] sm:$0xff] %vm312_vm0, %v445_v56 }
 0x182   : > { %v426_v58 = vpop.trf.xlu0 }
 0x183   : > { %v446_v59 = vadd.f32 %v442_v57, %v426_v58 }
 0x185   : > { %450 = vst.msk [vmem:[%s291_s18 + $0x8] sm:$0xff] %vm312_vm0, %v446_v59 }
 0x18a   : > { %v427_v61 = vpop.trf.xlu0 }
 0x18b   : > { %v447_v62 = vadd.f32 %v443_v60, %v427_v61 }
 0x18d   : > { %451 = vst.msk [vmem:[%s291_s18 + $0x10] sm:$0xff] %vm312_vm0, %v447_v62 }
 0x192   : > { %v428_v0 = vpop.trf.xlu0 }
 0x193   : > { %v448_v1 = vadd.f32 %v444_v63, %v428_v0 }
 0x195   : > { %452 = vst.msk [vmem:[%s291_s18 + $0x18] sm:$0xff] %vm312_vm0, %v448_v1 }
 0x196 PF: > { %s16_s21 = sadd.s32 1, %s594_s21  }
 0x197   : > { %p13_p4 = scmp.ge.s32.totalorder %s16_s21, 6  }
 0x199   :  { %15 = sbr.rel (!%p13_p4) target bundleno = 1 (0x1), region = 80 }

// kernel: dprnn_block_forward.7
= control target key start
LH: loop header
LB: loop body
LE: loop exit
PB: predicated region body
PF: predicated region fallthrough
CT: control target
= control target key end

     0   :  { %s2219_s18 = smov 0   ;;  %s2602_s0 = inlined_call_operand.vmem [shape: f32[16,4,64], index: 0, kind: input, shape index: {}]   ;;  %s2603_s1 = inlined_call_operand.vmem [shape: f32[16,4,64], index: 1, kind: input, shape index: {}]   ;;  %s2604_s2 = inlined_call_operand.vmem [shape: bf16[16,64], index: 2, kind: input, shape index: {}]   ;;  %s2605_s3 = inlined_call_operand.vmem [shape: bf16[16,64], index: 3, kind: input, shape index: {}]   ;;  %s2606_s4 = inlined_call_operand.vmem [shape: bf16[16,4,16], index: 4, kind: output, shape index: {0}]   ;;  %s2607_s5 = inlined_call_operand.vmem [shape: bf16[16,4,16], index: 5, kind: output, shape index: {1}]  }
   0x1 LB: > { %s1879_s19 = sadd.s32 4294967295, %s2182_s18   ;;  %p1883_p0 = scmp.ge.s32.totalorder %s2182_s18, 1  ;;  %s2182_s18 = sphi %s2219_s18, %s16_s18  }
   0x2   : > { %p208_p1 = scmp.lt.s32.totalorder %s2182_s18, 3 }
   0x4   : > { %p209_p2 = pnand %p1883_p0, %p208_p1 }
   0x5   : > { %s1884_s20 = sshll.u32 (!%p209_p2), %s1879_s19, 3  ;;  %s254_s21 = ssub.s32 (!%p209_p2), 1, %s1879_s19 }
   0x6   : > { %212 = sbr.rel (%p209_p2) target bundleno = 4811 (0x12cb), region = 36  ;;  %p249_p3 = scmp.lt.s32.totalorder (!%p209_p2), %s1884_s20, 15 }
   0x7   : > { %s1886_s22 = sshll.u32 (!%p209_p2), %s254_s21, 3  ;;  %p1892_p5 = scmp.ne.s32.totalorder (!%p209_p2), %s1879_s19, 0 }
   0x8   : > { %p256_p4 = scmp.lt.s32.totalorder (!%p209_p2), %s1886_s22, 15 }
   0xb   : > { %s2609_s20 = smov (!%p249_p3, %s1884_s20), 15  ;;  %s2611_s22 = smov (!%p256_p4, %s1886_s22), 15 }
   0xc   : > { %s1885_s23 = sshll.u32 %s2609_s20, 2  ;;  %s1889_s24 = sshll.u32 %s2609_s20, 1 }
   0xd   : > { %s2230_s27 = scalar_lea.vmem %s2602_s0, %s1885_s23  ;;  %s1887_s28 = sshll.u32 %s2611_s22, 2 }
   0xe   : > { %s2235_s6 = scalar_lea.vmem %s2603_s1, %s1887_s28  ;;  %s2240_s9 = scalar_lea.vmem %s2606_s4, %s1889_s24 }
   0xf   : > { %s1891_s10 = sshll.u32 %s2611_s22, 1  ;;  %280 = sbr.rel (%p1892_p5) target bundleno = 25 (0x19), region = 40 }
  0x10   : > { %s2245_s13 = scalar_lea.vmem %s2607_s5, %s1891_s10 }
  0x14   : > { %vm281_vm0 = vcmask 125952   ;;  %v2184_v0 = vmov 0.0  }
  0x15   : > { %282 = vst.msk [vmem:[#allocation2] sm:$0xf] %vm281_vm0, %v2184_v0 }
  0x16   : > { %283 = vst.msk [vmem:[#allocation3] sm:$0xf] %vm281_vm0, %v2184_v0 }
  0x17   : > { %284 = vst.msk [vmem:[#allocation4] sm:$0xf] %vm281_vm0, %v2184_v0 }
  0x18   : > { %285 = vst.msk [vmem:[#allocation5] sm:$0xf] %vm281_vm0, %v2184_v0 }
  0x19 PF: > { %v2019_v1 = vld [vmem:[%s2604_s2] sm:$0xff]  ;;  %vm298_vm1 = vcmask 130048   ;;  %s2185_s19 = smov 16   ;;  %v1899_v13 = vld [vmem:[%s2235_s6 + $0x1c] sm:$0xf]  ;;  %s2186_s20 = smov 80  }
  0x1a   : > { %v2020_v2 = vld [vmem:[%s2605_s3] sm:$0xff]  ;;  %309 = vmatpush.bf16.msra.mxu0 %v2019_v1  ;;  %s2187_s21 = smov 112   ;;  %s2188_s22 = smov 96   ;;  %vm361_vm10 = vcmask 125952  }
  0x1b   : > { %404 = vmatpush.bf16.msra.mxu1 %v2020_v2  ;;  %v286_v9 = vld [vmem:[%s2230_s27] sm:$0xf] }
  0x1c   : > { %v287_v3 = vld [vmem:[#allocation2] sm:$0xf] }
  0x1d   : > { %v289_v4 = vpack.c.bf16 %v287_v3, %v287_v3  ;;  %v288_v6 = vld [vmem:[#allocation3] sm:$0xf] }
  0x1e   : > { %v383_v5 = vld [vmem:[#allocation4] sm:$0xf]  ;;  %337 = vrot.lane.b32.xlu1 %v288_v6, %s2185_s19  ;;  %v2021_v1 = vld [vmem:[%s2604_s2] sm:$0xff] }
  0x1f   : > { %v385_v7 = vpack.c.bf16 %v383_v5, %v383_v5  ;;  %1897 = vmatmul.msk.bf16.vlgmr.msra.gmra.mxu0 %vm298_vm1, %v289_v4  ;;  %v384_v8 = vld [vmem:[#allocation5] sm:$0xf]  ;;  %497 = vmatpush.bf16.msra.mxu2 %v2021_v1  ;;  %v2022_v3 = vld [vmem:[%s2605_s3] sm:$0xff] }
  0x20   : > { %590 = vmatpush.bf16.msra.mxu3 %v2022_v3 }
  0x21   : > { %1904 = vmatmul.msk.bf16.vlgmr.msra.gmra.mxu1 %vm298_vm1, %v385_v7 }
  0x26   : > { %432 = vrot.lane.b32.xlu1 %v384_v8, %s2185_s19 }
  0x90   : > { %v338_v49 = vpop.permute.xlu1 %337 }
  0x98   : > { %v433_v53 = vpop.permute.xlu1 %432 }
  0x9c   : > { %v311_v10 = vpop.f32.mrf.mxu0 }
  0x9d   : > { %v315_v12 = vadd.f32 %v311_v10, %v286_v9  ;;  %v1907_v10 = vld [vmem:[%s2230_s27 + $0x4] sm:$0xf] }
  0x9e   : > { %v406_v11 = vpop.f32.mrf.mxu1 }
  0x9f   : > { %2048 = vtanh.f32 %v315_v12  ;;  %v410_v14 = vadd.f32 %v1899_v13, %v406_v11  ;;  %v1898_v19 = vmul.f32 -1.442695, %v315_v12 }
  0xa1   : > { %2050 = vtanh.f32 %v410_v14  ;;  %v1905_v20 = vmul.f32 -1.442695, %v410_v14 }
  0xa2   : > { %2052 = vpow2.f32 %v1898_v19 }
  0xa3   : > { %2054 = vpow2.f32 %v1905_v20 }
  0xa4   : > { %v313_v15 = vpop.f32.mrf.mxu0 }
  0xa5   : > { %v2049_v17 = vpop.eup %2048 }
  0xa6   : > { %v408_v16 = vpop.f32.mrf.mxu1  ;;  %342 = vrot.lane.b32.xlu0 %v2049_v17, %s2186_s20 }
  0xa7   : > { %v2051_v18 = vpop.eup %2050  ;;  %v1915_v16 = vld [vmem:[%s2235_s6 + $0x18] sm:$0xf] }
  0xa8   : > { %v2053_v21 = vpop.eup %2052 }
  0xa9   : > { %v319_v22 = vadd.f32 1.0, %v2053_v21  ;;  %v2055_v23 = vpop.eup %2054 }
  0xaa   : > { %v414_v24 = vadd.f32 1.0, %v2055_v23 }
  0xab   : > { %2056 = vrcp.f32 %v319_v22  ;;  %v331_v33 = vand.u32 2147483648, %v319_v22  ;;  %vm325_vm3 = vweird.f32 %v319_v22  ;;  %v329_v34 = vand.u32 2147483647, %v319_v22 }
  0xac   : > { %2058 = vrcp.f32 %v414_v24  ;;  %vm420_vm6 = vweird.f32 %v414_v24  ;;  %v426_v42 = vand.u32 2147483648, %v414_v24  ;;  %v424_v43 = vand.u32 2147483647, %v414_v24 }
  0xad   : > { %v332_v37 = vor.u32 1.1754944e-38, %v331_v33  ;;  %vm330_vm5 = vcmp.eq.f32.partialorder %v329_v34, 8.507059e+37 }
  0xae   : > { %437 = vrot.lane.b32.xlu0 %v2051_v18, %s2186_s20  ;;  %v427_v45 = vor.u32 1.1754944e-38, %v426_v42  ;;  %vm425_vm9 = vcmp.eq.f32.partialorder %v424_v43, 8.507059e+37 }
  0xb1   : > { %v2057_v25 = vpop.eup %2056 }
  0xb2   : > { %v321_v26 = vmul.f32 %v2057_v25, %v319_v22  ;;  %v2059_v28 = vpop.eup %2058  ;;  %vm326_vm2 = vweird.f32 %v2057_v25 }
  0xb3   : > { %v416_v30 = vmul.f32 %v2059_v28, %v414_v24  ;;  %vm327_vm4 = vmor %vm325_vm3, %vm326_vm2  ;;  %vm421_vm7 = vweird.f32 %v2059_v28 }
  0xb4   : > { %v322_v27 = vsub.f32 1.0, %v321_v26  ;;  %vm422_vm8 = vmor %vm420_vm6, %vm421_vm7 }
  0xb5   : > { %v417_v32 = vsub.f32 1.0, %v416_v30 }
  0xb6   : > { %v323_v29 = vmul.f32 %v2057_v25, %v322_v27 }
  0xb7   : > { %v418_v36 = vmul.f32 %v2059_v28, %v417_v32 }
  0xb8   : > { %v324_v31 = vadd.f32 %v2057_v25, %v323_v29 }
  0xb9   : > { %v419_v40 = vadd.f32 %v2059_v28, %v418_v36 }
  0xba   : > { %v328_v35 = vsel %vm327_vm4, %v2057_v25, %v324_v31 }
  0xbb   : > { %v333_v38 = vsel %vm330_vm5, %v332_v37, %v328_v35  ;;  %v423_v44 = vsel %vm422_vm8, %v2059_v28, %v419_v40 }
  0xbc   : > { %v428_v46 = vsel %vm425_vm9, %v427_v45, %v423_v44  ;;  %v340_v50 = vmul.f32 %v338_v49, %v333_v38 }
  0xbd   : > { %v435_v54 = vmul.f32 %v433_v53, %v428_v46 }
 0x118   : > { %v343_v39 = vpop.permute.xlu0 %342 }
 0x119   : > { %v345_v41 = vmul.f32 %v343_v39, %v333_v38 }
 0x11b   : > { %347 = vrot.lane.b32.xlu2 %v345_v41, %s2185_s19 }
 0x120   : > { %v438_v47 = vpop.permute.xlu0 %437 }
 0x121   : > { %v440_v48 = vmul.f32 %v438_v47, %v428_v46 }
 0x123   : > { %442 = vrot.lane.b32.xlu2 %v440_v48, %s2185_s19 }
 0x175   : > { %v348_v51 = vpop.permute.xlu2 %347 }
 0x176   : > { %v350_v52 = vadd.f32 %v348_v51, %v340_v50 }
 0x178   : > { %2060 = vtanh.f32 %v350_v52 }
 0x17d   : > { %v443_v55 = vpop.permute.xlu2 %442 }
 0x17e   : > { %v2061_v56 = vpop.eup %2060  ;;  %v445_v57 = vadd.f32 %v443_v55, %v435_v54 }
 0x17f   : > { %353 = vrot.lane.b32.xlu0 %v2061_v56, %s2185_s19 }
 0x180   : > { %2062 = vtanh.f32 %v445_v57 }
 0x186   : > { %v2063_v58 = vpop.eup %2062 }
 0x187   : > { %448 = vrot.lane.b32.xlu1 %v2063_v58, %s2185_s19 }
 0x18f   : > { %364 = vrot.lane.b32.xlu1 %v350_v52, %s2187_s21 }
 0x1f1   : > { %v354_v59 = vpop.permute.xlu0 %353 }
 0x1f2   : > { %v2266_v60 = vmul.f32 %v354_v59, %v333_v38 }
 0x1f4   : > { %358 = vrot.lane.b32.xlu2 %v2266_v60, %s2188_s22 }
 0x1f9   : > { %v449_v61 = vpop.permute.xlu1 %448 }
 0x1fa   : > { %v2270_v62 = vmul.f32 %v449_v61, %v428_v46 }
 0x1fc   : > { %453 = vrot.lane.b32.xlu0 %v2270_v62, %s2188_s22  ;;  %458 = vrot.lane.b32.xlu2 %v445_v57, %s2187_s21 }
 0x201   : > { %v365_v63 = vpop.permute.xlu1 %364 }
 0x202   : > { %367 = vst.msk [vmem:[#allocation3] sm:$0xf] %vm361_vm10, %v365_v63  ;;  %v2023_v63 = vld [vmem:[%s2604_s2] sm:$0xff] }
 0x203   : > { %683 = vmatpush.bf16.msrb.mxu0 %v2023_v63 }
 0x209   : > { %v477_v0 = vld [vmem:[#allocation3] sm:$0xf] }
 0x20a   : > { %525 = vrot.lane.b32.xlu2 %v477_v0, %s2185_s19 }
 0x24e   : > { %v359_v2 = vpop.permute.xlu2 %358 }
 0x24f   : > { %362 = vst.msk [vmem:[#allocation2] sm:$0xf] %vm361_vm10, %v359_v2 }
 0x256   : > { %v459_v4 = vpop.permute.xlu2 %458  ;;  %v476_v5 = vld [vmem:[#allocation2] sm:$0xf] }
 0x257   : > { %461 = vst.msk [vmem:[#allocation5] sm:$0xf] %vm361_vm10, %v459_v4  ;;  %v478_v6 = vpack.c.bf16 %v476_v5, %v476_v5 }
 0x259   : > { %1912 = vmatmul.msk.bf16.vlgmr.msra.gmra.mxu2 %vm298_vm1, %v478_v6  ;;  %v2024_v6 = vld [vmem:[%s2605_s3] sm:$0xff] }
 0x25a   : > { %776 = vmatpush.bf16.msrb.mxu1 %v2024_v6 }
 0x25e   : > { %v570_v15 = vld [vmem:[#allocation5] sm:$0xf] }
 0x264   : > { %v526_v51 = vpop.permute.xlu2 %525 }
 0x26e   : > { %v454_v7 = vpop.permute.xlu0 %453 }
 0x26f   : > { %456 = vst.msk [vmem:[#allocation4] sm:$0xf] %vm361_vm10, %v454_v7 }
 0x276   : > { %v569_v8 = vld [vmem:[#allocation4] sm:$0xf] }
 0x277   : > { %v571_v9 = vpack.c.bf16 %v569_v8, %v569_v8 }
 0x279   : > { %1920 = vmatmul.msk.bf16.vlgmr.msra.gmra.mxu3 %vm298_vm1, %v571_v9 }
 0x2dc   : > { %v499_v11 = vpop.f32.mrf.mxu2 }
 0x2dd   : > { %v503_v12 = vadd.f32 %v1907_v10, %v499_v11 }
 0x2df   : > { %2064 = vtanh.f32 %v503_v12  ;;  %v1913_v21 = vmul.f32 -1.442695, %v503_v12 }
 0x2e4   : > { %v501_v13 = vpop.f32.mrf.mxu2 }
 0x2e5   : > { %v2065_v14 = vpop.eup %2064 }
 0x2e6   : > { %530 = vrot.lane.b32.xlu0 %v2065_v14, %s2186_s20  ;;  %v1923_v14 = vld [vmem:[%s2230_s27 + $0x8] sm:$0xf] }
 0x2ee   : > { %618 = vrot.lane.b32.xlu0 %v570_v15, %s2185_s19 }
 0x2fc   : > { %v592_v17 = vpop.f32.mrf.mxu3 }
 0x2fd   : > { %v596_v18 = vadd.f32 %v1915_v16, %v592_v17 }
 0x2ff   : > { %2066 = vtanh.f32 %v596_v18  ;;  %v1921_v27 = vmul.f32 -1.442695, %v596_v18 }
 0x300   : > { %2068 = vpow2.f32 %v1913_v21 }
 0x304   : > { %v594_v19 = vpop.f32.mrf.mxu3 }
 0x305   : > { %v2067_v20 = vpop.eup %2066 }
 0x306   : > { %623 = vrot.lane.b32.xlu1 %v2067_v20, %s2186_s20  ;;  %v2069_v22 = vpop.eup %2068  ;;  %v1931_v20 = vld [vmem:[%s2235_s6 + $0x14] sm:$0xf] }
 0x307   : > { %v507_v23 = vadd.f32 1.0, %v2069_v22 }
 0x309   : > { %2070 = vrcp.f32 %v507_v23  ;;  %v519_v30 = vand.u32 2147483648, %v507_v23  ;;  %vm513_vm12 = vweird.f32 %v507_v23  ;;  %v517_v31 = vand.u32 2147483647, %v507_v23 }
 0x30a   : > { %2072 = vpow2.f32 %v1921_v27 }
 0x30b   : > { %v520_v34 = vor.u32 1.1754944e-38, %v519_v30  ;;  %vm518_vm14 = vcmp.eq.f32.partialorder %v517_v31, 8.507059e+37 }
 0x30f   : > { %v2071_v24 = vpop.eup %2070 }
 0x310   : > { %v509_v25 = vmul.f32 %v2071_v24, %v507_v23  ;;  %vm514_vm11 = vweird.f32 %v2071_v24  ;;  %v2073_v32 = vpop.eup %2072 }
 0x311   : > { %vm515_vm13 = vmor %vm513_vm12, %vm514_vm11  ;;  %v600_v35 = vadd.f32 1.0, %v2073_v32 }
 0x312   : > { %v510_v26 = vsub.f32 1.0, %v509_v25 }
 0x313   : > { %2074 = vrcp.f32 %v600_v35  ;;  %v612_v44 = vand.u32 2147483648, %v600_v35  ;;  %vm606_vm0 = vweird.f32 %v600_v35  ;;  %v610_v45 = vand.u32 2147483647, %v600_v35 }
 0x314   : > { %v511_v28 = vmul.f32 %v2071_v24, %v510_v26 }
 0x315   : > { %v613_v47 = vor.u32 1.1754944e-38, %v612_v44  ;;  %vm611_vm3 = vcmp.eq.f32.partialorder %v610_v45, 8.507059e+37 }
 0x316   : > { %v512_v29 = vadd.f32 %v2071_v24, %v511_v28 }
 0x318   : > { %v516_v33 = vsel %vm515_vm13, %v2071_v24, %v512_v29 }
 0x319   : > { %v521_v36 = vsel %vm518_vm14, %v520_v34, %v516_v33  ;;  %v2075_v39 = vpop.eup %2074 }
 0x31a   : > { %v602_v40 = vmul.f32 %v2075_v39, %v600_v35  ;;  %vm607_vm15 = vweird.f32 %v2075_v39  ;;  %v528_v52 = vmul.f32 %v526_v51, %v521_v36 }
 0x31b   : > { %vm608_vm2 = vmor %vm606_vm0, %vm607_vm15 }
 0x31c   : > { %v603_v41 = vsub.f32 1.0, %v602_v40 }
 0x31e   : > { %v604_v42 = vmul.f32 %v2075_v39, %v603_v41 }
 0x320   : > { %v605_v43 = vadd.f32 %v2075_v39, %v604_v42 }
 0x322   : > { %v609_v46 = vsel %vm608_vm2, %v2075_v39, %v605_v43 }
 0x323   : > { %v614_v48 = vsel %vm611_vm3, %v613_v47, %v609_v46 }
 0x358   : > { %v531_v37 = vpop.permute.xlu0 %530 }
 0x359   : > { %v533_v38 = vmul.f32 %v531_v37, %v521_v36 }
 0x35b   : > { %535 = vrot.lane.b32.xlu1 %v533_v38, %s2185_s19 }
 0x360   : > { %v619_v55 = vpop.permute.xlu0 %618 }
 0x361   : > { %v621_v56 = vmul.f32 %v619_v55, %v614_v48 }
 0x378   : > { %v624_v49 = vpop.permute.xlu1 %623 }
 0x379   : > { %v626_v50 = vmul.f32 %v624_v49, %v614_v48 }
 0x37b   : > { %628 = vrot.lane.b32.xlu2 %v626_v50, %s2185_s19 }
 0x3cd   : > { %v536_v53 = vpop.permute.xlu1 %535 }
 0x3ce   : > { %v538_v54 = vadd.f32 %v536_v53, %v528_v52 }
 0x3d0   : > { %2076 = vtanh.f32 %v538_v54 }
 0x3d5   : > { %v629_v57 = vpop.permute.xlu2 %628 }
 0x3d6   : > { %v2077_v58 = vpop.eup %2076  ;;  %v631_v59 = vadd.f32 %v629_v57, %v621_v56 }
 0x3d7   : > { %541 = vrot.lane.b32.xlu0 %v2077_v58, %s2185_s19 }
 0x3d8   : > { %2078 = vtanh.f32 %v631_v59 }
 0x3de   : > { %v2079_v61 = vpop.eup %2078 }
 0x3df   : > { %634 = vrot.lane.b32.xlu1 %v2079_v61, %s2185_s19 }
 0x3e7   : > { %551 = vrot.lane.b32.xlu1 %v538_v54, %s2187_s21 }
 0x449   : > { %v542_v0 = vpop.permute.xlu0 %541 }
 0x44a   : > { %v2301_v1 = vmul.f32 %v542_v0, %v521_v36 }
 0x44c   : > { %546 = vrot.lane.b32.xlu2 %v2301_v1, %s2188_s22 }
 0x451   : > { %v635_v2 = vpop.permute.xlu1 %634 }
 0x452   : > { %v2305_v3 = vmul.f32 %v635_v2, %v614_v48 }
 0x454   : > { %639 = vrot.lane.b32.xlu0 %v2305_v3, %s2188_s22  ;;  %644 = vrot.lane.b32.xlu2 %v631_v59, %s2187_s21 }
 0x459   : > { %v552_v4 = vpop.permute.xlu1 %551 }
 0x45a   : > { %554 = vst.msk [vmem:[#allocation3] sm:$0xf] %vm361_vm10, %v552_v4 }
 0x461   : > { %v663_v5 = vld [vmem:[#allocation3] sm:$0xf] }
 0x462   : > { %711 = vrot.lane.b32.xlu2 %v663_v5, %s2185_s19  ;;  %v2025_v5 = vld [vmem:[%s2604_s2] sm:$0xff] }
 0x463   : > { %869 = vmatpush.bf16.msrb.mxu2 %v2025_v5 }
 0x4a6   : > { %v547_v7 = vpop.permute.xlu2 %546 }
 0x4a7   : > { %549 = vst.msk [vmem:[#allocation2] sm:$0xf] %vm361_vm10, %v547_v7 }
 0x4ae   : > { %v645_v8 = vpop.permute.xlu2 %644  ;;  %v662_v9 = vld [vmem:[#allocation2] sm:$0xf] }
 0x4af   : > { %647 = vst.msk [vmem:[#allocation5] sm:$0xf] %vm361_vm10, %v645_v8  ;;  %v664_v10 = vpack.c.bf16 %v662_v9, %v662_v9 }
 0x4b1   : > { %1928 = vmatmul.msk.bf16.vlgmr.msrb.gmra.mxu0 %vm298_vm1, %v664_v10 }
 0x4b6   : > { %v756_v19 = vld [vmem:[#allocation5] sm:$0xf] }
 0x4bc   : > { %v712_v55 = vpop.permute.xlu2 %711 }
 0x4c6   : > { %v640_v11 = vpop.permute.xlu0 %639 }
 0x4c7   : > { %642 = vst.msk [vmem:[#allocation4] sm:$0xf] %vm361_vm10, %v640_v11 }
 0x4ce   : > { %v755_v12 = vld [vmem:[#allocation4] sm:$0xf] }
 0x4cf   : > { %v757_v13 = vpack.c.bf16 %v755_v12, %v755_v12  ;;  %v2026_v12 = vld [vmem:[%s2605_s3] sm:$0xff] }
 0x4d0   : > { %962 = vmatpush.bf16.msrb.mxu3 %v2026_v12 }
 0x4d1   : > { %1936 = vmatmul.msk.bf16.vlgmr.msrb.gmra.mxu1 %vm298_vm1, %v757_v13 }
 0x52e   : > { %v685_v15 = vpop.f32.mrf.mxu0 }
 0x52f   : > { %v689_v16 = vadd.f32 %v1923_v14, %v685_v15 }
 0x531   : > { %2080 = vtanh.f32 %v689_v16  ;;  %v1929_v25 = vmul.f32 -1.442695, %v689_v16 }
 0x536   : > { %v687_v17 = vpop.f32.mrf.mxu0 }
 0x537   : > { %v2081_v18 = vpop.eup %2080 }
 0x538   : > { %716 = vrot.lane.b32.xlu0 %v2081_v18, %s2186_s20 }
 0x540   : > { %804 = vrot.lane.b32.xlu0 %v756_v19, %s2185_s19 }
 0x54e   : > { %v778_v21 = vpop.f32.mrf.mxu1 }
 0x54f   : > { %v782_v22 = vadd.f32 %v1931_v20, %v778_v21  ;;  %v1939_v20 = vld [vmem:[%s2230_s27 + $0xc] sm:$0xf] }
 0x551   : > { %2082 = vtanh.f32 %v782_v22  ;;  %v1937_v31 = vmul.f32 -1.442695, %v782_v22 }
 0x552   : > { %2084 = vpow2.f32 %v1929_v25 }
 0x556   : > { %v780_v23 = vpop.f32.mrf.mxu1 }
 0x557   : > { %v2083_v24 = vpop.eup %2082 }
 0x558   : > { %809 = vrot.lane.b32.xlu1 %v2083_v24, %s2186_s20  ;;  %v2085_v26 = vpop.eup %2084 }
 0x559   : > { %v693_v27 = vadd.f32 1.0, %v2085_v26  ;;  %v1947_v26 = vld [vmem:[%s2235_s6 + $0x10] sm:$0xf] }
 0x55b   : > { %2086 = vrcp.f32 %v693_v27  ;;  %v705_v34 = vand.u32 2147483648, %v693_v27  ;;  %vm699_vm5 = vweird.f32 %v693_v27  ;;  %v703_v35 = vand.u32 2147483647, %v693_v27 }
 0x55c   : > { %2088 = vpow2.f32 %v1937_v31 }
 0x55d   : > { %v706_v38 = vor.u32 1.1754944e-38, %v705_v34  ;;  %vm704_vm7 = vcmp.eq.f32.partialorder %v703_v35, 8.507059e+37 }
 0x561   : > { %v2087_v28 = vpop.eup %2086 }
 0x562   : > { %v695_v29 = vmul.f32 %v2087_v28, %v693_v27  ;;  %vm700_vm4 = vweird.f32 %v2087_v28  ;;  %v2089_v36 = vpop.eup %2088 }
 0x563   : > { %vm701_vm6 = vmor %vm699_vm5, %vm700_vm4  ;;  %v786_v39 = vadd.f32 1.0, %v2089_v36 }
 0x564   : > { %v696_v30 = vsub.f32 1.0, %v695_v29 }
 0x565   : > { %2090 = vrcp.f32 %v786_v39  ;;  %v798_v48 = vand.u32 2147483648, %v786_v39  ;;  %vm792_vm9 = vweird.f32 %v786_v39  ;;  %v796_v49 = vand.u32 2147483647, %v786_v39 }
 0x566   : > { %v697_v32 = vmul.f32 %v2087_v28, %v696_v30 }
 0x567   : > { %v799_v51 = vor.u32 1.1754944e-38, %v798_v48  ;;  %vm797_vm12 = vcmp.eq.f32.partialorder %v796_v49, 8.507059e+37 }
 0x568   : > { %v698_v33 = vadd.f32 %v2087_v28, %v697_v32 }
 0x56a   : > { %v702_v37 = vsel %vm701_vm6, %v2087_v28, %v698_v33 }
 0x56b   : > { %v707_v40 = vsel %vm704_vm7, %v706_v38, %v702_v37  ;;  %v2091_v43 = vpop.eup %2090 }
 0x56c   : > { %v788_v44 = vmul.f32 %v2091_v43, %v786_v39  ;;  %vm793_vm8 = vweird.f32 %v2091_v43  ;;  %v714_v56 = vmul.f32 %v712_v55, %v707_v40 }
 0x56d   : > { %vm794_vm11 = vmor %vm792_vm9, %vm793_vm8 }
 0x56e   : > { %v789_v45 = vsub.f32 1.0, %v788_v44 }
 0x570   : > { %v790_v46 = vmul.f32 %v2091_v43, %v789_v45 }
 0x572   : > { %v791_v47 = vadd.f32 %v2091_v43, %v790_v46 }
 0x574   : > { %v795_v50 = vsel %vm794_vm11, %v2091_v43, %v791_v47 }
 0x575   : > { %v800_v52 = vsel %vm797_vm12, %v799_v51, %v795_v50 }
 0x5aa   : > { %v717_v41 = vpop.permute.xlu0 %716 }
 0x5ab   : > { %v719_v42 = vmul.f32 %v717_v41, %v707_v40 }
 0x5ad   : > { %721 = vrot.lane.b32.xlu1 %v719_v42, %s2185_s19 }
 0x5b2   : > { %v805_v59 = vpop.permute.xlu0 %804 }
 0x5b3   : > { %v807_v61 = vmul.f32 %v805_v59, %v800_v52 }
 0x5ca   : > { %v810_v53 = vpop.permute.xlu1 %809 }
 0x5cb   : > { %v812_v54 = vmul.f32 %v810_v53, %v800_v52 }
 0x5cd   : > { %814 = vrot.lane.b32.xlu2 %v812_v54, %s2185_s19 }
 0x61f   : > { %v722_v57 = vpop.permute.xlu1 %721 }
 0x620   : > { %v724_v58 = vadd.f32 %v722_v57, %v714_v56 }
 0x622   : > { %2092 = vtanh.f32 %v724_v58 }
 0x627   : > { %v815_v63 = vpop.permute.xlu2 %814 }
 0x628   : > { %v2093_v0 = vpop.eup %2092  ;;  %v817_v2 = vadd.f32 %v815_v63, %v807_v61 }
 0x629   : > { %727 = vrot.lane.b32.xlu0 %v2093_v0, %s2185_s19 }
 0x62a   : > { %2094 = vtanh.f32 %v817_v2 }
 0x630   : > { %v2095_v4 = vpop.eup %2094 }
 0x631   : > { %820 = vrot.lane.b32.xlu1 %v2095_v4, %s2185_s19 }
 0x639   : > { %737 = vrot.lane.b32.xlu1 %v724_v58, %s2187_s21 }
 0x69b   : > { %v728_v6 = vpop.permute.xlu0 %727 }
 0x69c   : > { %v2333_v7 = vmul.f32 %v728_v6, %v707_v40 }
 0x69e   : > { %732 = vrot.lane.b32.xlu2 %v2333_v7, %s2188_s22 }
 0x6a3   : > { %v821_v8 = vpop.permute.xlu1 %820 }
 0x6a4   : > { %v2337_v9 = vmul.f32 %v821_v8, %v800_v52 }
 0x6a6   : > { %825 = vrot.lane.b32.xlu0 %v2337_v9, %s2188_s22  ;;  %830 = vrot.lane.b32.xlu2 %v817_v2, %s2187_s21 }
 0x6ab   : > { %v738_v10 = vpop.permute.xlu1 %737 }
 0x6ac   : > { %740 = vst.msk [vmem:[#allocation3] sm:$0xf] %vm361_vm10, %v738_v10 }
 0x6b3   : > { %v849_v11 = vld [vmem:[#allocation3] sm:$0xf] }
 0x6b4   : > { %897 = vrot.lane.b32.xlu2 %v849_v11, %s2185_s19 }
 0x6f8   : > { %v733_v13 = vpop.permute.xlu2 %732 }
 0x6f9   : > { %735 = vst.msk [vmem:[#allocation2] sm:$0xf] %vm361_vm10, %v733_v13  ;;  %v2027_v13 = vld [vmem:[%s2604_s2] sm:$0xff] }
 0x6fa   : > { %1055 = vmatpush.bf16.msra.mxu0 %v2027_v13 }
 0x700   : > { %v831_v14 = vpop.permute.xlu2 %830  ;;  %v848_v15 = vld [vmem:[#allocation2] sm:$0xf] }
 0x701   : > { %833 = vst.msk [vmem:[#allocation5] sm:$0xf] %vm361_vm10, %v831_v14  ;;  %v850_v16 = vpack.c.bf16 %v848_v15, %v848_v15 }
 0x703   : > { %1944 = vmatmul.msk.bf16.vlgmr.msrb.gmra.mxu2 %vm298_vm1, %v850_v16 }
 0x708   : > { %v942_v25 = vld [vmem:[#allocation5] sm:$0xf] }
 0x70e   : > { %v898_v63 = vpop.permute.xlu2 %897 }
 0x718   : > { %v826_v17 = vpop.permute.xlu0 %825 }
 0x719   : > { %828 = vst.msk [vmem:[#allocation4] sm:$0xf] %vm361_vm10, %v826_v17 }
 0x720   : > { %v941_v18 = vld [vmem:[#allocation4] sm:$0xf] }
 0x721   : > { %v943_v19 = vpack.c.bf16 %v941_v18, %v941_v18 }
 0x723   : > { %1952 = vmatmul.msk.bf16.vlgmr.msrb.gmra.mxu3 %vm298_vm1, %v943_v19 }
 0x786   : > { %v871_v21 = vpop.f32.mrf.mxu2 }
 0x787   : > { %v875_v22 = vadd.f32 %v1939_v20, %v871_v21  ;;  %v2028_v20 = vld [vmem:[%s2605_s3] sm:$0xff] }
 0x788   : > { %1148 = vmatpush.bf16.msra.mxu1 %v2028_v20 }
 0x789   : > { %2096 = vtanh.f32 %v875_v22  ;;  %v1945_v31 = vmul.f32 -1.442695, %v875_v22 }
 0x78e   : > { %v873_v23 = vpop.f32.mrf.mxu2 }
 0x78f   : > { %v2097_v24 = vpop.eup %2096 }
 0x790   : > { %902 = vrot.lane.b32.xlu0 %v2097_v24, %s2186_s20 }
 0x798   : > { %990 = vrot.lane.b32.xlu0 %v942_v25, %s2185_s19 }
 0x7a6   : > { %v964_v27 = vpop.f32.mrf.mxu3 }
 0x7a7   : > { %v968_v28 = vadd.f32 %v1947_v26, %v964_v27 }
 0x7a9   : > { %2098 = vtanh.f32 %v968_v28  ;;  %v1953_v37 = vmul.f32 -1.442695, %v968_v28  ;;  %v1955_v28 = vld [vmem:[%s2230_s27 + $0x10] sm:$0xf] }
 0x7aa   : > { %2100 = vpow2.f32 %v1945_v31 }
 0x7ae   : > { %v966_v29 = vpop.f32.mrf.mxu3 }
 0x7af   : > { %v2099_v30 = vpop.eup %2098 }
 0x7b0   : > { %995 = vrot.lane.b32.xlu1 %v2099_v30, %s2186_s20  ;;  %v2101_v32 = vpop.eup %2100 }
 0x7b1   : > { %v879_v33 = vadd.f32 1.0, %v2101_v32 }
 0x7b3   : > { %2102 = vrcp.f32 %v879_v33  ;;  %v891_v40 = vand.u32 2147483648, %v879_v33  ;;  %vm885_vm14 = vweird.f32 %v879_v33  ;;  %v889_v41 = vand.u32 2147483647, %v879_v33 }
 0x7b4   : > { %2104 = vpow2.f32 %v1953_v37 }
 0x7b5   : > { %v892_v44 = vor.u32 1.1754944e-38, %v891_v40  ;;  %vm890_vm0 = vcmp.eq.f32.partialorder %v889_v41, 8.507059e+37 }
 0x7b9   : > { %v2103_v34 = vpop.eup %2102 }
 0x7ba   : > { %v881_v35 = vmul.f32 %v2103_v34, %v879_v33  ;;  %vm886_vm13 = vweird.f32 %v2103_v34  ;;  %v2105_v42 = vpop.eup %2104 }
 0x7bb   : > { %vm887_vm15 = vmor %vm885_vm14, %vm886_vm13  ;;  %v972_v45 = vadd.f32 1.0, %v2105_v42 }
 0x7bc   : > { %v882_v36 = vsub.f32 1.0, %v881_v35 }
 0x7bd   : > { %2106 = vrcp.f32 %v972_v45  ;;  %v984_v54 = vand.u32 2147483648, %v972_v45  ;;  %vm978_vm3 = vweird.f32 %v972_v45  ;;  %v982_v55 = vand.u32 2147483647, %v972_v45 }
 0x7be   : > { %v883_v38 = vmul.f32 %v2103_v34, %v882_v36 }
 0x7bf   : > { %v985_v57 = vor.u32 1.1754944e-38, %v984_v54  ;;  %vm983_vm5 = vcmp.eq.f32.partialorder %v982_v55, 8.507059e+37 }
 0x7c0   : > { %v884_v39 = vadd.f32 %v2103_v34, %v883_v38 }
 0x7c2   : > { %v888_v43 = vsel %vm887_vm15, %v2103_v34, %v884_v39  ;;  %v1963_v34 = vld [vmem:[%s2235_s6 + $0xc] sm:$0xf] }
 0x7c3   : > { %v893_v46 = vsel %vm890_vm0, %v892_v44, %v888_v43  ;;  %v2107_v49 = vpop.eup %2106 }
 0x7c4   : > { %v974_v50 = vmul.f32 %v2107_v49, %v972_v45  ;;  %vm979_vm2 = vweird.f32 %v2107_v49  ;;  %v900_v0 = vmul.f32 %v898_v63, %v893_v46 }
 0x7c5   : > { %vm980_vm4 = vmor %vm978_vm3, %vm979_vm2 }
 0x7c6   : > { %v975_v51 = vsub.f32 1.0, %v974_v50 }
 0x7c8   : > { %v976_v52 = vmul.f32 %v2107_v49, %v975_v51 }
 0x7ca   : > { %v977_v53 = vadd.f32 %v2107_v49, %v976_v52 }
 0x7cc   : > { %v981_v56 = vsel %vm980_vm4, %v2107_v49, %v977_v53 }
 0x7cd   : > { %v986_v58 = vsel %vm983_vm5, %v985_v57, %v981_v56 }
 0x802   : > { %v903_v47 = vpop.permute.xlu0 %902 }
 0x803   : > { %v905_v48 = vmul.f32 %v903_v47, %v893_v46 }
 0x805   : > { %907 = vrot.lane.b32.xlu1 %v905_v48, %s2185_s19 }
 0x80a   : > { %v991_v5 = vpop.permute.xlu0 %990 }
 0x80b   : > { %v993_v6 = vmul.f32 %v991_v5, %v986_v58 }
 0x822   : > { %v996_v59 = vpop.permute.xlu1 %995 }
 0x823   : > { %v998_v61 = vmul.f32 %v996_v59, %v986_v58 }
 0x825   : > { %1000 = vrot.lane.b32.xlu2 %v998_v61, %s2185_s19 }
 0x877   : > { %v908_v2 = vpop.permute.xlu1 %907 }
 0x878   : > { %v910_v4 = vadd.f32 %v908_v2, %v900_v0 }
 0x87a   : > { %2108 = vtanh.f32 %v910_v4 }
 0x87f   : > { %v1001_v8 = vpop.permute.xlu2 %1000 }
 0x880   : > { %v2109_v10 = vpop.eup %2108  ;;  %v1003_v11 = vadd.f32 %v1001_v8, %v993_v6 }
 0x881   : > { %913 = vrot.lane.b32.xlu0 %v2109_v10, %s2185_s19 }
 0x882   : > { %2110 = vtanh.f32 %v1003_v11 }
 0x888   : > { %v2111_v12 = vpop.eup %2110 }
 0x889   : > { %1006 = vrot.lane.b32.xlu1 %v2111_v12, %s2185_s19 }
 0x891   : > { %923 = vrot.lane.b32.xlu1 %v910_v4, %s2187_s21 }
 0x8f3   : > { %v914_v14 = vpop.permute.xlu0 %913 }
 0x8f4   : > { %v2365_v15 = vmul.f32 %v914_v14, %v893_v46 }
 0x8f6   : > { %918 = vrot.lane.b32.xlu2 %v2365_v15, %s2188_s22 }
 0x8fb   : > { %v1007_v16 = vpop.permute.xlu1 %1006 }
 0x8fc   : > { %v2369_v17 = vmul.f32 %v1007_v16, %v986_v58 }
 0x8fe   : > { %1011 = vrot.lane.b32.xlu0 %v2369_v17, %s2188_s22  ;;  %1016 = vrot.lane.b32.xlu2 %v1003_v11, %s2187_s21 }
 0x903   : > { %v924_v18 = vpop.permute.xlu1 %923 }
 0x904   : > { %926 = vst.msk [vmem:[#allocation3] sm:$0xf] %vm361_vm10, %v924_v18 }
 0x90b   : > { %v1035_v19 = vld [vmem:[#allocation3] sm:$0xf] }
 0x90c   : > { %1083 = vrot.lane.b32.xlu2 %v1035_v19, %s2185_s19 }
 0x950   : > { %v919_v21 = vpop.permute.xlu2 %918 }
 0x951   : > { %921 = vst.msk [vmem:[#allocation2] sm:$0xf] %vm361_vm10, %v919_v21 }
 0x958   : > { %v1017_v22 = vpop.permute.xlu2 %1016  ;;  %v1034_v23 = vld [vmem:[#allocation2] sm:$0xf] }
 0x959   : > { %1019 = vst.msk [vmem:[#allocation5] sm:$0xf] %vm361_vm10, %v1017_v22  ;;  %v1036_v24 = vpack.c.bf16 %v1034_v23, %v1034_v23  ;;  %v2029_v23 = vld [vmem:[%s2604_s2] sm:$0xff] }
 0x95a   : > { %1241 = vmatpush.bf16.msra.mxu2 %v2029_v23 }
 0x95b   : > { %1960 = vmatmul.msk.bf16.vlgmr.msra.gmra.mxu0 %vm298_vm1, %v1036_v24 }
 0x960   : > { %v1128_v33 = vld [vmem:[#allocation5] sm:$0xf] }
 0x966   : > { %v1084_v11 = vpop.permute.xlu2 %1083 }
 0x970   : > { %v1012_v25 = vpop.permute.xlu0 %1011 }
 0x971   : > { %1014 = vst.msk [vmem:[#allocation4] sm:$0xf] %vm361_vm10, %v1012_v25 }
 0x978   : > { %v1127_v26 = vld [vmem:[#allocation4] sm:$0xf] }
 0x979   : > { %v1129_v27 = vpack.c.bf16 %v1127_v26, %v1127_v26 }
 0x97b   : > { %1968 = vmatmul.msk.bf16.vlgmr.msra.gmra.mxu1 %vm298_vm1, %v1129_v27 }
 0x9d8   : > { %v1057_v29 = vpop.f32.mrf.mxu0 }
 0x9d9   : > { %v1061_v30 = vadd.f32 %v1955_v28, %v1057_v29 }
 0x9db   : > { %2112 = vtanh.f32 %v1061_v30  ;;  %v1961_v39 = vmul.f32 -1.442695, %v1061_v30  ;;  %v2030_v30 = vld [vmem:[%s2605_s3] sm:$0xff] }
 0x9dc   : > { %1334 = vmatpush.bf16.msra.mxu3 %v2030_v30 }
 0x9e0   : > { %v1059_v31 = vpop.f32.mrf.mxu0 }
 0x9e1   : > { %v2113_v32 = vpop.eup %2112 }
 0x9e2   : > { %1088 = vrot.lane.b32.xlu0 %v2113_v32, %s2186_s20 }
 0x9ea   : > { %1176 = vrot.lane.b32.xlu0 %v1128_v33, %s2185_s19 }
 0x9f8   : > { %v1150_v35 = vpop.f32.mrf.mxu1 }
 0x9f9   : > { %v1154_v36 = vadd.f32 %v1963_v34, %v1150_v35 }
 0x9fb   : > { %2114 = vtanh.f32 %v1154_v36  ;;  %v1969_v45 = vmul.f32 -1.442695, %v1154_v36 }
 0x9fc   : > { %2116 = vpow2.f32 %v1961_v39 }
 0xa00   : > { %v1152_v37 = vpop.f32.mrf.mxu1 }
 0xa01   : > { %v2115_v38 = vpop.eup %2114 }
 0xa02   : > { %1181 = vrot.lane.b32.xlu1 %v2115_v38, %s2186_s20  ;;  %v2117_v40 = vpop.eup %2116  ;;  %v1971_v38 = vld [vmem:[%s2230_s27 + $0x14] sm:$0xf] }
 0xa03   : > { %v1065_v41 = vadd.f32 1.0, %v2117_v40 }
 0xa05   : > { %2118 = vrcp.f32 %v1065_v41  ;;  %v1077_v48 = vand.u32 2147483648, %v1065_v41  ;;  %vm1071_vm7 = vweird.f32 %v1065_v41  ;;  %v1075_v49 = vand.u32 2147483647, %v1065_v41 }
 0xa06   : > { %2120 = vpow2.f32 %v1969_v45 }
 0xa07   : > { %v1078_v52 = vor.u32 1.1754944e-38, %v1077_v48  ;;  %vm1076_vm9 = vcmp.eq.f32.partialorder %v1075_v49, 8.507059e+37 }
 0xa0b   : > { %v2119_v42 = vpop.eup %2118 }
 0xa0c   : > { %v1067_v43 = vmul.f32 %v2119_v42, %v1065_v41  ;;  %vm1072_vm6 = vweird.f32 %v2119_v42  ;;  %v2121_v50 = vpop.eup %2120 }
 0xa0d   : > { %vm1073_vm8 = vmor %vm1071_vm7, %vm1072_vm6  ;;  %v1158_v53 = vadd.f32 1.0, %v2121_v50 }
 0xa0e   : > { %v1068_v44 = vsub.f32 1.0, %v1067_v43 }
 0xa0f   : > { %2122 = vrcp.f32 %v1158_v53  ;;  %v1170_v0 = vand.u32 2147483648, %v1158_v53  ;;  %vm1164_vm12 = vweird.f32 %v1158_v53  ;;  %v1168_v2 = vand.u32 2147483647, %v1158_v53 }
 0xa10   : > { %v1069_v46 = vmul.f32 %v2119_v42, %v1068_v44  ;;  %v1979_v44 = vld [vmem:[%s2235_s6 + $0x8] sm:$0xf] }
 0xa11   : > { %v1171_v5 = vor.u32 1.1754944e-38, %v1170_v0  ;;  %vm1169_vm14 = vcmp.eq.f32.partialorder %v1168_v2, 8.507059e+37 }
 0xa12   : > { %v1070_v47 = vadd.f32 %v2119_v42, %v1069_v46 }
 0xa14   : > { %v1074_v51 = vsel %vm1073_vm8, %v2119_v42, %v1070_v47 }
 0xa15   : > { %v1079_v54 = vsel %vm1076_vm9, %v1078_v52, %v1074_v51  ;;  %v2123_v57 = vpop.eup %2122 }
 0xa16   : > { %v1160_v58 = vmul.f32 %v2123_v57, %v1158_v53  ;;  %vm1165_vm11 = vweird.f32 %v2123_v57  ;;  %v1086_v12 = vmul.f32 %v1084_v11, %v1079_v54 }
 0xa17   : > { %vm1166_vm13 = vmor %vm1164_vm12, %vm1165_vm11 }
 0xa18   : > { %v1161_v59 = vsub.f32 1.0, %v1160_v58 }
 0xa1a   : > { %v1162_v61 = vmul.f32 %v2123_v57, %v1161_v59 }
 0xa1c   : > { %v1163_v63 = vadd.f32 %v2123_v57, %v1162_v61 }
 0xa1e   : > { %v1167_v4 = vsel %vm1166_vm13, %v2123_v57, %v1163_v63 }
 0xa1f   : > { %v1172_v6 = vsel %vm1169_vm14, %v1171_v5, %v1167_v4 }
 0xa54   : > { %v1089_v55 = vpop.permute.xlu0 %1088 }
 0xa55   : > { %v1091_v56 = vmul.f32 %v1089_v55, %v1079_v54 }
 0xa57   : > { %1093 = vrot.lane.b32.xlu1 %v1091_v56, %s2185_s19 }
 0xa5c   : > { %v1177_v16 = vpop.permute.xlu0 %1176 }
 0xa5d   : > { %v1179_v18 = vmul.f32 %v1177_v16, %v1172_v6 }
 0xa74   : > { %v1182_v8 = vpop.permute.xlu1 %1181 }
 0xa75   : > { %v1184_v10 = vmul.f32 %v1182_v8, %v1172_v6 }
 0xa77   : > { %1186 = vrot.lane.b32.xlu2 %v1184_v10, %s2185_s19 }
 0xac9   : > { %v1094_v13 = vpop.permute.xlu1 %1093 }
 0xaca   : > { %v1096_v14 = vadd.f32 %v1094_v13, %v1086_v12 }
 0xacc   : > { %2124 = vtanh.f32 %v1096_v14 }
 0xad1   : > { %v1187_v19 = vpop.permute.xlu2 %1186 }
 0xad2   : > { %v2125_v20 = vpop.eup %2124  ;;  %v1189_v21 = vadd.f32 %v1187_v19, %v1179_v18 }
 0xad3   : > { %1099 = vrot.lane.b32.xlu0 %v2125_v20, %s2185_s19 }
 0xad4   : > { %2126 = vtanh.f32 %v1189_v21 }
 0xada   : > { %v2127_v22 = vpop.eup %2126 }
 0xadb   : > { %1192 = vrot.lane.b32.xlu1 %v2127_v22, %s2185_s19 }
 0xae3   : > { %1109 = vrot.lane.b32.xlu1 %v1096_v14, %s2187_s21 }
 0xb45   : > { %v1100_v24 = vpop.permute.xlu0 %1099 }
 0xb46   : > { %v2397_v25 = vmul.f32 %v1100_v24, %v1079_v54 }
 0xb48   : > { %1104 = vrot.lane.b32.xlu2 %v2397_v25, %s2188_s22 }
 0xb4d   : > { %v1193_v26 = vpop.permute.xlu1 %1192 }
 0xb4e   : > { %v2401_v27 = vmul.f32 %v1193_v26, %v1172_v6 }
 0xb50   : > { %1197 = vrot.lane.b32.xlu0 %v2401_v27, %s2188_s22  ;;  %1202 = vrot.lane.b32.xlu2 %v1189_v21, %s2187_s21 }
 0xb55   : > { %v1110_v28 = vpop.permute.xlu1 %1109 }
 0xb56   : > { %1112 = vst.msk [vmem:[#allocation3] sm:$0xf] %vm361_vm10, %v1110_v28 }
 0xb5d   : > { %v1221_v29 = vld [vmem:[#allocation3] sm:$0xf] }
 0xb5e   : > { %1269 = vrot.lane.b32.xlu2 %v1221_v29, %s2185_s19 }
 0xba2   : > { %v1105_v31 = vpop.permute.xlu2 %1104 }
 0xba3   : > { %1107 = vst.msk [vmem:[#allocation2] sm:$0xf] %vm361_vm10, %v1105_v31 }
 0xbaa   : > { %v1203_v32 = vpop.permute.xlu2 %1202  ;;  %v1220_v33 = vld [vmem:[#allocation2] sm:$0xf] }
 0xbab   : > { %1205 = vst.msk [vmem:[#allocation5] sm:$0xf] %vm361_vm10, %v1203_v32  ;;  %v1222_v34 = vpack.c.bf16 %v1220_v33, %v1220_v33 }
 0xbad   : > { %1976 = vmatmul.msk.bf16.vlgmr.msra.gmra.mxu2 %vm298_vm1, %v1222_v34 }
 0xbb2   : > { %v1314_v43 = vld [vmem:[#allocation5] sm:$0xf] }
 0xbb8   : > { %v1270_v23 = vpop.permute.xlu2 %1269 }
 0xbc2   : > { %v1198_v35 = vpop.permute.xlu0 %1197 }
 0xbc3   : > { %1200 = vst.msk [vmem:[#allocation4] sm:$0xf] %vm361_vm10, %v1198_v35  ;;  %v2031_v35 = vld [vmem:[%s2604_s2] sm:$0xff] }
 0xbc4   : > { %1427 = vmatpush.bf16.msrb.mxu0 %v2031_v35 }
 0xbca   : > { %v1313_v36 = vld [vmem:[#allocation4] sm:$0xf] }
 0xbcb   : > { %v1315_v37 = vpack.c.bf16 %v1313_v36, %v1313_v36 }
 0xbcd   : > { %1984 = vmatmul.msk.bf16.vlgmr.msra.gmra.mxu3 %vm298_vm1, %v1315_v37 }
 0xc30   : > { %v1243_v39 = vpop.f32.mrf.mxu2 }
 0xc31   : > { %v1247_v40 = vadd.f32 %v1971_v38, %v1243_v39 }
 0xc33   : > { %2128 = vtanh.f32 %v1247_v40  ;;  %v1977_v49 = vmul.f32 -1.442695, %v1247_v40 }
 0xc38   : > { %v1245_v41 = vpop.f32.mrf.mxu2 }
 0xc39   : > { %v2129_v42 = vpop.eup %2128 }
 0xc3a   : > { %1274 = vrot.lane.b32.xlu0 %v2129_v42, %s2186_s20  ;;  %v2032_v42 = vld [vmem:[%s2605_s3] sm:$0xff] }
 0xc3b   : > { %1520 = vmatpush.bf16.msrb.mxu1 %v2032_v42 }
 0xc42   : > { %1362 = vrot.lane.b32.xlu0 %v1314_v43, %s2185_s19 }
 0xc50   : > { %v1336_v45 = vpop.f32.mrf.mxu3 }
 0xc51   : > { %v1340_v46 = vadd.f32 %v1979_v44, %v1336_v45 }
 0xc53   : > { %2130 = vtanh.f32 %v1340_v46  ;;  %v1985_v55 = vmul.f32 -1.442695, %v1340_v46 }
 0xc54   : > { %2132 = vpow2.f32 %v1977_v49 }
 0xc58   : > { %v1338_v47 = vpop.f32.mrf.mxu3 }
 0xc59   : > { %v2131_v48 = vpop.eup %2130 }
 0xc5a   : > { %1367 = vrot.lane.b32.xlu1 %v2131_v48, %s2186_s20  ;;  %v2133_v50 = vpop.eup %2132 }
 0xc5b   : > { %v1251_v51 = vadd.f32 1.0, %v2133_v50  ;;  %v1987_v50 = vld [vmem:[%s2230_s27 + $0x18] sm:$0xf] }
 0xc5d   : > { %2134 = vrcp.f32 %v1251_v51  ;;  %v1263_v58 = vand.u32 2147483648, %v1251_v51  ;;  %vm1257_vm0 = vweird.f32 %v1251_v51  ;;  %v1261_v59 = vand.u32 2147483647, %v1251_v51 }
 0xc5e   : > { %2136 = vpow2.f32 %v1985_v55 }
 0xc5f   : > { %v1264_v0 = vor.u32 1.1754944e-38, %v1263_v58  ;;  %vm1262_vm3 = vcmp.eq.f32.partialorder %v1261_v59, 8.507059e+37 }
 0xc63   : > { %v2135_v52 = vpop.eup %2134 }
 0xc64   : > { %v1253_v53 = vmul.f32 %v2135_v52, %v1251_v51  ;;  %vm1258_vm15 = vweird.f32 %v2135_v52  ;;  %v2137_v61 = vpop.eup %2136 }
 0xc65   : > { %vm1259_vm2 = vmor %vm1257_vm0, %vm1258_vm15  ;;  %v1344_v2 = vadd.f32 1.0, %v2137_v61 }
 0xc66   : > { %v1254_v54 = vsub.f32 1.0, %v1253_v53 }
 0xc67   : > { %2138 = vrcp.f32 %v1344_v2  ;;  %v1356_v14 = vand.u32 2147483648, %v1344_v2  ;;  %vm1350_vm5 = vweird.f32 %v1344_v2  ;;  %v1354_v16 = vand.u32 2147483647, %v1344_v2 }
 0xc68   : > { %v1255_v56 = vmul.f32 %v2135_v52, %v1254_v54 }
 0xc69   : > { %v1357_v19 = vor.u32 1.1754944e-38, %v1356_v14  ;;  %vm1355_vm7 = vcmp.eq.f32.partialorder %v1354_v16, 8.507059e+37 }
 0xc6a   : > { %v1256_v57 = vadd.f32 %v2135_v52, %v1255_v56  ;;  %v1995_v56 = vld [vmem:[%s2235_s6 + $0x4] sm:$0xf] }
 0xc6c   : > { %v1260_v63 = vsel %vm1259_vm2, %v2135_v52, %v1256_v57  ;;  %vm371_vm2 = vcmask 1041408  }
 0xc6d   : > { %v1265_v4 = vsel %vm1262_vm3, %v1264_v0, %v1260_v63  ;;  %v2139_v8 = vpop.eup %2138 }
 0xc6e   : > { %v1346_v10 = vmul.f32 %v2139_v8, %v1344_v2  ;;  %vm1351_vm4 = vweird.f32 %v2139_v8  ;;  %v1272_v24 = vmul.f32 %v1270_v23, %v1265_v4 }
 0xc6f   : > { %vm1352_vm6 = vmor %vm1350_vm5, %vm1351_vm4 }
 0xc70   : > { %v1347_v11 = vsub.f32 1.0, %v1346_v10 }
 0xc72   : > { %v1348_v12 = vmul.f32 %v2139_v8, %v1347_v11 }
 0xc74   : > { %v1349_v13 = vadd.f32 %v2139_v8, %v1348_v12 }
 0xc76   : > { %v1353_v18 = vsel %vm1352_vm6, %v2139_v8, %v1349_v13  ;;  %vm379_vm6 = vcmask 123904  }
 0xc77   : > { %v1358_v20 = vsel %vm1355_vm7, %v1357_v19, %v1353_v18 }
 0xcac   : > { %v1275_v5 = vpop.permute.xlu0 %1274 }
 0xcad   : > { %v1277_v6 = vmul.f32 %v1275_v5, %v1265_v4 }
 0xcaf   : > { %1279 = vrot.lane.b32.xlu1 %v1277_v6, %s2185_s19 }
 0xcb4   : > { %v1363_v29 = vpop.permute.xlu0 %1362 }
 0xcb5   : > { %v1365_v30 = vmul.f32 %v1363_v29, %v1358_v20 }
 0xccc   : > { %v1368_v21 = vpop.permute.xlu1 %1367 }
 0xccd   : > { %v1370_v22 = vmul.f32 %v1368_v21, %v1358_v20 }
 0xccf   : > { %1372 = vrot.lane.b32.xlu2 %v1370_v22, %s2185_s19 }
 0xd21   : > { %v1280_v26 = vpop.permute.xlu1 %1279 }
 0xd22   : > { %v1282_v28 = vadd.f32 %v1280_v26, %v1272_v24 }
 0xd24   : > { %2140 = vtanh.f32 %v1282_v28 }
 0xd29   : > { %v1373_v31 = vpop.permute.xlu2 %1372 }
 0xd2a   : > { %v2141_v32 = vpop.eup %2140  ;;  %v1375_v33 = vadd.f32 %v1373_v31, %v1365_v30 }
 0xd2b   : > { %1285 = vrot.lane.b32.xlu0 %v2141_v32, %s2185_s19 }
 0xd2c   : > { %2142 = vtanh.f32 %v1375_v33 }
 0xd32   : > { %v2143_v34 = vpop.eup %2142 }
 0xd33   : > { %1378 = vrot.lane.b32.xlu1 %v2143_v34, %s2185_s19 }
 0xd3b   : > { %1295 = vrot.lane.b32.xlu1 %v1282_v28, %s2187_s21 }
 0xd9d   : > { %v1286_v36 = vpop.permute.xlu0 %1285 }
 0xd9e   : > { %v2429_v37 = vmul.f32 %v1286_v36, %v1265_v4 }
 0xda0   : > { %1290 = vrot.lane.b32.xlu2 %v2429_v37, %s2188_s22 }
 0xda5   : > { %v1379_v38 = vpop.permute.xlu1 %1378 }
 0xda6   : > { %v2433_v39 = vmul.f32 %v1379_v38, %v1358_v20 }
 0xda8   : > { %1383 = vrot.lane.b32.xlu0 %v2433_v39, %s2188_s22  ;;  %1388 = vrot.lane.b32.xlu2 %v1375_v33, %s2187_s21 }
 0xdad   : > { %v1296_v40 = vpop.permute.xlu1 %1295 }
 0xdae   : > { %1298 = vst.msk [vmem:[#allocation3] sm:$0xf] %vm361_vm10, %v1296_v40 }
 0xdb5   : > { %v1407_v41 = vld [vmem:[#allocation3] sm:$0xf] }
 0xdb6   : > { %1455 = vrot.lane.b32.xlu2 %v1407_v41, %s2185_s19 }
 0xdfa   : > { %v1291_v43 = vpop.permute.xlu2 %1290 }
 0xdfb   : > { %1293 = vst.msk [vmem:[#allocation2] sm:$0xf] %vm361_vm10, %v1291_v43 }
 0xe02   : > { %v1389_v44 = vpop.permute.xlu2 %1388  ;;  %v1406_v45 = vld [vmem:[#allocation2] sm:$0xf] }
 0xe03   : > { %1391 = vst.msk [vmem:[#allocation5] sm:$0xf] %vm361_vm10, %v1389_v44  ;;  %v1408_v46 = vpack.c.bf16 %v1406_v45, %v1406_v45 }
 0xe05   : > { %1992 = vmatmul.msk.bf16.vlgmr.msrb.gmra.mxu0 %vm298_vm1, %v1408_v46 }
 0xe0a   : > { %v1500_v55 = vld [vmem:[#allocation5] sm:$0xf] }
 0xe10   : > { %v1456_v38 = vpop.permute.xlu2 %1455 }
 0xe1a   : > { %v1384_v47 = vpop.permute.xlu0 %1383 }
 0xe1b   : > { %1386 = vst.msk [vmem:[#allocation4] sm:$0xf] %vm361_vm10, %v1384_v47 }
 0xe22   : > { %v1499_v48 = vld [vmem:[#allocation4] sm:$0xf] }
 0xe23   : > { %v1501_v49 = vpack.c.bf16 %v1499_v48, %v1499_v48 }
 0xe25   : > { %2000 = vmatmul.msk.bf16.vlgmr.msrb.gmra.mxu1 %vm298_vm1, %v1501_v49  ;;  %v2033_v49 = vld [vmem:[%s2604_s2] sm:$0xff] }
 0xe26   : > { %1613 = vmatpush.bf16.msrb.mxu2 %v2033_v49 }
 0xe82   : > { %v1429_v51 = vpop.f32.mrf.mxu0 }
 0xe83   : > { %v1433_v52 = vadd.f32 %v1987_v50, %v1429_v51 }
 0xe85   : > { %2144 = vtanh.f32 %v1433_v52  ;;  %v1993_v63 = vmul.f32 -1.442695, %v1433_v52 }
 0xe8a   : > { %v1431_v53 = vpop.f32.mrf.mxu0 }
 0xe8b   : > { %v2145_v54 = vpop.eup %2144 }
 0xe8c   : > { %1460 = vrot.lane.b32.xlu0 %v2145_v54, %s2186_s20 }
 0xe94   : > { %1548 = vrot.lane.b32.xlu0 %v1500_v55, %s2185_s19 }
 0xea2   : > { %v1522_v57 = vpop.f32.mrf.mxu1 }
 0xea3   : > { %v1526_v58 = vadd.f32 %v1995_v56, %v1522_v57  ;;  %v2034_v56 = vld [vmem:[%s2605_s3] sm:$0xff] }
 0xea4   : > { %1705 = vmatpush.bf16.msrb.mxu3 %v2034_v56 }
 0xea5   : > { %2146 = vtanh.f32 %v1526_v58  ;;  %v2001_v8 = vmul.f32 -1.442695, %v1526_v58 }
 0xea6   : > { %2148 = vpow2.f32 %v1993_v63 }
 0xeaa   : > { %v1524_v59 = vpop.f32.mrf.mxu1 }
 0xeab   : > { %v2147_v61 = vpop.eup %2146 }
 0xeac   : > { %1553 = vrot.lane.b32.xlu1 %v2147_v61, %s2186_s20  ;;  %v2149_v0 = vpop.eup %2148 }
 0xead   : > { %v1437_v2 = vadd.f32 1.0, %v2149_v0 }
 0xeaf   : > { %2150 = vrcp.f32 %v1437_v2  ;;  %v1449_v12 = vand.u32 2147483648, %v1437_v2  ;;  %vm1443_vm9 = vweird.f32 %v1437_v2  ;;  %v1447_v13 = vand.u32 2147483647, %v1437_v2 }
 0xeb0   : > { %2152 = vpow2.f32 %v2001_v8 }
 0xeb1   : > { %v1450_v18 = vor.u32 1.1754944e-38, %v1449_v12  ;;  %vm1448_vm12 = vcmp.eq.f32.partialorder %v1447_v13, 8.507059e+37 }
 0xeb5   : > { %v2151_v4 = vpop.eup %2150 }
 0xeb6   : > { %v1439_v5 = vmul.f32 %v2151_v4, %v1437_v2  ;;  %vm1444_vm8 = vweird.f32 %v2151_v4  ;;  %v2153_v14 = vpop.eup %2152 }
 0xeb7   : > { %vm1445_vm11 = vmor %vm1443_vm9, %vm1444_vm8  ;;  %v1530_v19 = vadd.f32 1.0, %v2153_v14 }
 0xeb8   : > { %v1440_v6 = vsub.f32 1.0, %v1439_v5 }
 0xeb9   : > { %2154 = vrcp.f32 %v1530_v19  ;;  %v1542_v30 = vand.u32 2147483648, %v1530_v19  ;;  %vm1536_vm14 = vweird.f32 %v1530_v19  ;;  %v1540_v31 = vand.u32 2147483647, %v1530_v19 }
 0xeba   : > { %v1441_v10 = vmul.f32 %v2151_v4, %v1440_v6 }
 0xebb   : > { %v1543_v33 = vor.u32 1.1754944e-38, %v1542_v30  ;;  %vm1541_vm0 = vcmp.eq.f32.partialorder %v1540_v31, 8.507059e+37 }
 0xebc   : > { %v1442_v11 = vadd.f32 %v2151_v4, %v1441_v10 }
 0xebe   : > { %v1446_v16 = vsel %vm1445_vm11, %v2151_v4, %v1442_v11  ;;  %v2003_v4 = vld [vmem:[%s2230_s27 + $0x1c] sm:$0xf]  ;;  %v462_v11 = vpack.c.bf16 %v2270_v62, %v2270_v62 }
 0xebf   : > { %v1451_v20 = vsel %vm1448_vm12, %v1450_v18, %v1446_v16  ;;  %v2155_v23 = vpop.eup %2154  ;;  %v1683_v16 = vld [vmem:[%s2235_s6] sm:$0xf] }
 0xec0   : > { %v1532_v24 = vmul.f32 %v2155_v23, %v1530_v19  ;;  %vm1537_vm13 = vweird.f32 %v2155_v23  ;;  %v1458_v40 = vmul.f32 %v1456_v38, %v1451_v20  ;;  %v464_v13 = vrot.slane %v462_v11, 2 }
 0xec1   : > { %vm1538_vm15 = vmor %vm1536_vm14, %vm1537_vm13 }
 0xec2   : > { %v1533_v26 = vsub.f32 1.0, %v1532_v24  ;;  %v467_v14 = vsel %vm371_vm2, %v462_v11, %v464_v13 }
 0xec4   : > { %v1534_v28 = vmul.f32 %v2155_v23, %v1533_v26 }
 0xec6   : > { %v1535_v29 = vadd.f32 %v2155_v23, %v1534_v28 }
 0xec8   : > { %v1539_v32 = vsel %vm1538_vm15, %v2155_v23, %v1535_v29 }
 0xec9   : > { %v1544_v34 = vsel %vm1541_vm0, %v1543_v33, %v1539_v32 }
 0xefe   : > { %v1461_v21 = vpop.permute.xlu0 %1460 }
 0xeff   : > { %v1463_v22 = vmul.f32 %v1461_v21, %v1451_v20 }
 0xf01   : > { %1465 = vrot.lane.b32.xlu1 %v1463_v22, %s2185_s19 }
 0xf06   : > { %v1549_v43 = vpop.permute.xlu0 %1548 }
 0xf07   : > { %v1551_v44 = vmul.f32 %v1549_v43, %v1544_v34 }
 0xf1e   : > { %v1554_v35 = vpop.permute.xlu1 %1553 }
 0xf1f   : > { %v1556_v36 = vmul.f32 %v1554_v35, %v1544_v34 }
 0xf21   : > { %1558 = vrot.lane.b32.xlu2 %v1556_v36, %s2185_s19 }
 0xf73   : > { %v1466_v41 = vpop.permute.xlu1 %1465 }
 0xf74   : > { %v1468_v42 = vadd.f32 %v1466_v41, %v1458_v40 }
 0xf76   : > { %2156 = vtanh.f32 %v1468_v42 }
 0xf7b   : > { %v1559_v45 = vpop.permute.xlu2 %1558 }
 0xf7c   : > { %v2157_v46 = vpop.eup %2156  ;;  %v1561_v47 = vadd.f32 %v1559_v45, %v1551_v44 }
 0xf7d   : > { %1471 = vrot.lane.b32.xlu0 %v2157_v46, %s2185_s19 }
 0xf7e   : > { %2158 = vtanh.f32 %v1561_v47 }
 0xf84   : > { %v2159_v48 = vpop.eup %2158 }
 0xf85   : > { %1564 = vrot.lane.b32.xlu1 %v2159_v48, %s2185_s19 }
 0xf8d   : > { %1481 = vrot.lane.b32.xlu1 %v1468_v42, %s2187_s21 }
 0xfef   : > { %v1472_v50 = vpop.permute.xlu0 %1471 }
 0xff0   : > { %v2461_v51 = vmul.f32 %v1472_v50, %v1451_v20 }
 0xff2   : > { %1476 = vrot.lane.b32.xlu2 %v2461_v51, %s2188_s22 }
 0xff7   : > { %v1565_v52 = vpop.permute.xlu1 %1564 }
 0xff8   : > { %v2465_v53 = vmul.f32 %v1565_v52, %v1544_v34 }
 0xffa   : > { %1569 = vrot.lane.b32.xlu0 %v2465_v53, %s2188_s22  ;;  %1574 = vrot.lane.b32.xlu2 %v1561_v47, %s2187_s21 }
 0xfff   : > { %v1482_v54 = vpop.permute.xlu1 %1481 }
0x1000   : > { %1484 = vst.msk [vmem:[#allocation3] sm:$0xf] %vm361_vm10, %v1482_v54 }
0x1007   : > { %v1593_v55 = vld [vmem:[#allocation3] sm:$0xf] }
0x1008   : > { %1641 = vrot.lane.b32.xlu2 %v1593_v55, %s2185_s19 }
0x104c   : > { %v1477_v57 = vpop.permute.xlu2 %1476 }
0x104d   : > { %1479 = vst.msk [vmem:[#allocation2] sm:$0xf] %vm361_vm10, %v1477_v57 }
0x1054   : > { %v1575_v58 = vpop.permute.xlu2 %1574  ;;  %v1592_v59 = vld [vmem:[#allocation2] sm:$0xf] }
0x1055   : > { %1577 = vst.msk [vmem:[#allocation5] sm:$0xf] %vm361_vm10, %v1575_v58  ;;  %v1594_v61 = vpack.c.bf16 %v1592_v59, %v1592_v59  ;;  %v368_v59 = vpack.c.bf16 %v2266_v60, %v2266_v60  ;;  %v1206_v60 = vpack.c.bf16 %v2401_v27, %v2401_v27 }
0x1057   : > { %2008 = vmatmul.msk.bf16.vlgmr.msrb.gmra.mxu2 %vm298_vm1, %v1594_v61  ;;  %v370_v61 = vrot.slane %v368_v59, 2 }
0x105c   : > { %v1685_v12 = vld [vmem:[#allocation5] sm:$0xf] }
0x1062   : > { %v1642_v13 = vpop.permute.xlu2 %1641 }
0x106c   : > { %v1570_v63 = vpop.permute.xlu0 %1569 }
0x106d   : > { %1572 = vst.msk [vmem:[#allocation4] sm:$0xf] %vm361_vm10, %v1570_v63  ;;  %v648_v63 = vpack.c.bf16 %v2305_v3, %v2305_v3  ;;  %v1208_v3 = vrot.slane %v1206_v60, 2 }
0x106f   : > { %v1211_v11 = vsel %vm371_vm2, %v1206_v60, %v1208_v3 }
0x1074   : > { %v1684_v0 = vld [vmem:[#allocation4] sm:$0xf] }
0x1075   : > { %v1686_v2 = vpack.c.bf16 %v1684_v0, %v1684_v0  ;;  %v374_v0 = vsel %vm371_vm2, %v368_v59, %v370_v61 }
0x1077   : > { %2015 = vmatmul.msk.bf16.vlgmr.msrb.gmra.mxu3 %vm298_vm1, %v1686_v2  ;;  %v650_v2 = vrot.slane %v648_v63, 2 }
0x10da   : > { %v1615_v5 = vpop.f32.mrf.mxu2 }
0x10db   : > { %v1619_v6 = vadd.f32 %v2003_v4, %v1615_v5  ;;  %v927_v4 = vpack.c.bf16 %v2365_v15, %v2365_v15  ;;  %v653_v5 = vsel %vm371_vm2, %v648_v63, %v650_v2 }
0x10dd   : > { %2160 = vtanh.f32 %v1619_v6  ;;  %v2009_v22 = vmul.f32 -1.442695, %v1619_v6  ;;  %v929_v6 = vrot.slane %v927_v4, 2 }
0x10e2   : > { %v1617_v8 = vpop.f32.mrf.mxu2 }
0x10e3   : > { %v2161_v10 = vpop.eup %2160  ;;  %v932_v8 = vsel %vm371_vm2, %v927_v4, %v929_v6 }
0x10e4   : > { %1646 = vrot.lane.b32.xlu0 %v2161_v10, %s2186_s20  ;;  %v1485_v10 = vpack.c.bf16 %v2461_v51, %v2461_v51 }
0x10e6   : > { %v1487_v15 = vrot.slane %v1485_v10, 2 }
0x10ec   : > { %1733 = vrot.lane.b32.xlu0 %v1685_v12, %s2185_s19  ;;  %v1490_v12 = vsel %vm371_vm2, %v1485_v10, %v1487_v15 }
0x10f4   : > { %469 = vrot.lane.b32.xlu0 %v467_v14, %s2188_s22 }
0x10fa   : > { %v1707_v18 = vpop.f32.mrf.mxu3 }
0x10fb   : > { %v1711_v19 = vadd.f32 %v1707_v18, %v1683_v16 }
0x10fd   : > { %2162 = vtanh.f32 %v1711_v19  ;;  %v2016_v29 = vmul.f32 -1.442695, %v1711_v19 }
0x10fe   : > { %2164 = vpow2.f32 %v2009_v22 }
0x1102   : > { %v1709_v20 = vpop.f32.mrf.mxu3 }
0x1103   : > { %v2163_v21 = vpop.eup %2162  ;;  %v741_v20 = vpack.c.bf16 %v2333_v7, %v2333_v7 }
0x1104   : > { %1738 = vrot.lane.b32.xlu1 %v2163_v21, %s2186_s20  ;;  %v2165_v62 = vpop.eup %2164 }
0x1105   : > { %v1623_v23 = vadd.f32 1.0, %v2165_v62  ;;  %v743_v22 = vrot.slane %v741_v20, 2 }
0x1107   : > { %2166 = vrcp.f32 %v1623_v23  ;;  %v1635_v32 = vand.u32 2147483648, %v1623_v23  ;;  %vm1629_vm3 = vweird.f32 %v1623_v23  ;;  %v1633_v33 = vand.u32 2147483647, %v1623_v23 }
0x1108   : > { %2168 = vpow2.f32 %v2016_v29  ;;  %v746_v7 = vsel %vm371_vm2, %v741_v20, %v743_v22 }
0x1109   : > { %v1636_v36 = vor.u32 1.1754944e-38, %v1635_v32  ;;  %vm1634_vm5 = vcmp.eq.f32.partialorder %v1633_v33, 8.507059e+37 }
0x110d   : > { %v2167_v24 = vpop.eup %2166 }
0x110e   : > { %v1625_v26 = vmul.f32 %v2167_v24, %v1623_v23  ;;  %vm1630_vm1 = vweird.f32 %v2167_v24  ;;  %v2169_v34 = vpop.eup %2168 }
0x110f   : > { %vm1631_vm4 = vmor %vm1629_vm3, %vm1630_vm1  ;;  %v1715_v38 = vadd.f32 1.0, %v2169_v34 }
0x1110   : > { %v1626_v28 = vsub.f32 1.0, %v1625_v26  ;;  %v1020_v26 = vpack.c.bf16 %v2369_v17, %v2369_v17 }
0x1111   : > { %2170 = vrcp.f32 %v1715_v38  ;;  %v1727_v50 = vand.u32 2147483648, %v1715_v38  ;;  %vm1721_vm8 = vweird.f32 %v1715_v38  ;;  %v1725_v52 = vand.u32 2147483647, %v1715_v38 }
0x1112   : > { %v1627_v30 = vmul.f32 %v2167_v24, %v1626_v28  ;;  %v1022_v29 = vrot.slane %v1020_v26, 2 }
0x1113   : > { %v1728_v55 = vor.u32 1.1754944e-38, %v1727_v50  ;;  %vm1726_vm11 = vcmp.eq.f32.partialorder %v1725_v52, 8.507059e+37 }
0x1114   : > { %v1628_v31 = vadd.f32 %v2167_v24, %v1627_v30  ;;  %v1025_v17 = vsel %vm371_vm2, %v1020_v26, %v1022_v29 }
0x1116   : > { %v1632_v35 = vsel %vm1631_vm4, %v2167_v24, %v1628_v31  ;;  %v555_v24 = vpack.c.bf16 %v2301_v1, %v2301_v1  ;;  %v834_v31 = vpack.c.bf16 %v2337_v9, %v2337_v9  ;;  %v1299_v1 = vpack.c.bf16 %v2429_v37, %v2429_v37 }
0x1117   : > { %v2489_v40 = vsel %vm1634_vm5, %v1636_v36, %v1632_v35  ;;  %v2171_v44 = vpop.eup %2170  ;;  %v1113_v9 = vpack.c.bf16 %v2397_v25, %v2397_v25  ;;  %v1578_v37 = vpack.c.bf16 %v2465_v53, %v2465_v53  ;;  %v1392_v25 = vpack.c.bf16 %v2433_v39, %v2433_v39 }
0x1118   : > { %v1717_v45 = vmul.f32 %v2171_v44, %v1715_v38  ;;  %vm1722_vm7 = vweird.f32 %v2171_v44  ;;  %v1644_v27 = vmul.f32 %v1642_v13, %v2489_v40  ;;  %v557_v28 = vrot.slane %v555_v24, 2 }
0x1119   : > { %vm1723_vm9 = vmor %vm1721_vm8, %vm1722_vm7  ;;  %v836_v33 = vrot.slane %v834_v31, 2  ;;  %v1301_v34 = vrot.slane %v1299_v1, 2 }
0x111a   : > { %v1718_v47 = vsub.f32 1.0, %v1717_v45  ;;  %v560_v32 = vsel %vm371_vm2, %v555_v24, %v557_v28  ;;  %v1394_v45 = vrot.slane %v1392_v25, 2 }
0x111b   : > { %v1304_v36 = vsel %vm371_vm2, %v1299_v1, %v1301_v34  ;;  %v839_v38 = vsel %vm371_vm2, %v834_v31, %v836_v33 }
0x111c   : > { %v1719_v48 = vmul.f32 %v2171_v44, %v1718_v47  ;;  %v1397_v47 = vsel %vm371_vm2, %v1392_v25, %v1394_v45 }
0x111e   : > { %v1720_v49 = vadd.f32 %v2171_v44, %v1719_v48 }
0x1120   : > { %v1724_v54 = vsel %vm1723_vm9, %v2171_v44, %v1720_v49 }
0x1121   : > { %v2495_v56 = vsel %vm1726_vm11, %v1728_v55, %v1724_v54 }
0x1156   : > { %v1647_v41 = vpop.permute.xlu0 %1646 }
0x1157   : > { %v1649_v42 = vmul.f32 %v1647_v41, %v2489_v40  ;;  %v1115_v41 = vrot.slane %v1113_v9, 2 }
0x1159   : > { %1651 = vrot.lane.b32.xlu1 %v1649_v42, %s2185_s19  ;;  %v1580_v42 = vrot.slane %v1578_v37, 2  ;;  %v1118_v44 = vsel %vm371_vm2, %v1113_v9, %v1115_v41 }
0x115b   : > { %v1583_v53 = vsel %vm371_vm2, %v1578_v37, %v1580_v42 }
0x115e   : > { %v1734_v43 = vpop.permute.xlu0 %1733 }
0x115f   : > { %v1736_v51 = vmul.f32 %v1734_v43, %v2495_v56 }
0x1166   : > { %v470_v46 = vpop.permute.xlu0 %469 }
0x1167   : > { %1906 = vst.msk [vmem:[%s2245_s13 + $0xe] sm:$0x3] %vm379_vm6, %v470_v46 }
0x1176   : > { %v1739_v57 = vpop.permute.xlu1 %1738 }
0x1177   : > { %v1741_v58 = vmul.f32 %v1739_v57, %v2495_v56 }
0x1179   : > { %1743 = vrot.lane.b32.xlu2 %v1741_v58, %s2185_s19 }
0x1181   : > { %376 = vrot.lane.b32.xlu2 %v374_v0, %s2188_s22 }
0x1189   : > { %655 = vrot.lane.b32.xlu2 %v653_v5, %s2188_s22 }
0x1191   : > { %934 = vrot.lane.b32.xlu2 %v932_v8, %s2188_s22 }
0x1199   : > { %1213 = vrot.lane.b32.xlu2 %v1211_v11, %s2188_s22 }
0x11a1   : > { %1492 = vrot.lane.b32.xlu2 %v1490_v12, %s2188_s22 }
0x11cb   : > { %v1652_v14 = vpop.permute.xlu1 %1651 }
0x11cc   : > { %v1654_v16 = vadd.f32 %v1652_v14, %v1644_v27 }
0x11ce   : > { %2172 = vtanh.f32 %v1654_v16  ;;  %1667 = vrot.lane.b32.xlu2 %v1654_v16, %s2187_s21 }
0x11d3   : > { %v1744_v18 = vpop.permute.xlu2 %1743 }
0x11d4   : > { %v2173_v19 = vpop.eup %2172  ;;  %v1746_v21 = vadd.f32 %v1744_v18, %v1736_v51 }
0x11d5   : > { %1657 = vrot.lane.b32.xlu0 %v2173_v19, %s2185_s19 }
0x11d6   : > { %2174 = vtanh.f32 %v1746_v21  ;;  %1759 = vrot.lane.b32.xlu2 %v1746_v21, %s2187_s21 }
0x11db   : > { %v377_v62 = vpop.permute.xlu2 %376 }
0x11dc   : > { %v2175_v23 = vpop.eup %2174  ;;  %380 = vst.msk [vmem:[%s2240_s9] sm:$0x3] %vm379_vm6, %v377_v62 }
0x11dd   : > { %748 = vrot.lane.b32.xlu0 %v746_v7, %s2188_s22  ;;  %1749 = vrot.lane.b32.xlu1 %v2175_v23, %s2185_s19 }
0x11e3   : > { %v656_v30 = vpop.permute.xlu2 %655 }
0x11e4   : > { %1922 = vst.msk [vmem:[%s2245_s13 + $0xc] sm:$0x3] %vm379_vm6, %v656_v30 }
0x11e5   : > { %1027 = vrot.lane.b32.xlu0 %v1025_v17, %s2188_s22  ;;  %562 = vrot.lane.b32.xlu1 %v560_v32, %s2188_s22 }
0x11eb   : > { %v935_v35 = vpop.permute.xlu2 %934 }
0x11ec   : > { %1946 = vst.msk [vmem:[%s2240_s9 + $0x6] sm:$0x3] %vm379_vm6, %v935_v35 }
0x11ed   : > { %1306 = vrot.lane.b32.xlu0 %v1304_v36, %s2188_s22  ;;  %841 = vrot.lane.b32.xlu1 %v839_v38, %s2188_s22 }
0x11f3   : > { %v1214_v43 = vpop.permute.xlu2 %1213 }
0x11f4   : > { %1970 = vst.msk [vmem:[%s2245_s13 + $0x6] sm:$0x3] %vm379_vm6, %v1214_v43 }
0x11f5   : > { %1585 = vrot.lane.b32.xlu0 %v1583_v53, %s2188_s22  ;;  %1120 = vrot.lane.b32.xlu1 %v1118_v44, %s2188_s22 }
0x11fb   : > { %v1493_v46 = vpop.permute.xlu2 %1492 }
0x11fc   : > { %1994 = vst.msk [vmem:[%s2240_s9 + $0xc] sm:$0x3] %vm379_vm6, %v1493_v46 }
0x11fd   : > { %1399 = vrot.lane.b32.xlu1 %v1397_v47, %s2188_s22 }
0x1228   : > { %v1668_v39 = vpop.permute.xlu2 %1667 }
0x1229   : > { %1670 = vst.msk [vmem:[#allocation3] sm:$0xf] %vm361_vm10, %v1668_v39 }
0x1230   : > { %v1760_v48 = vpop.permute.xlu2 %1759 }
0x1231   : > { %1762 = vst.msk [vmem:[#allocation5] sm:$0xf] %vm361_vm10, %v1760_v48 }
0x1247   : > { %v1658_v49 = vpop.permute.xlu0 %1657 }
0x1248   : > { %v1660_v50 = vmul.f32 %v1658_v49, %v2489_v40 }
0x124a   : > { %v1671_v52 = vpack.c.bf16 %v1660_v50, %v1660_v50  ;;  %1662 = vrot.lane.b32.xlu1 %v1660_v50, %s2188_s22 }
0x124c   : > { %v1673_v54 = vrot.slane %v1671_v52, 2 }
0x124e   : > { %v1676_v55 = vsel %vm371_vm2, %v1671_v52, %v1673_v54 }
0x124f   : > { %v1750_v57 = vpop.permute.xlu1 %1749  ;;  %1678 = vrot.lane.b32.xlu0 %v1676_v55, %s2188_s22  ;;  %v749_v58 = vpop.permute.xlu0 %748 }
0x1250   : > { %v1752_v59 = vmul.f32 %v1750_v57, %v2495_v56  ;;  %1930 = vst.msk [vmem:[%s2240_s9 + $0x4] sm:$0x3] %vm379_vm6, %v749_v58 }
0x1252   : > { %v1763_v40 = vpack.c.bf16 %v1752_v59, %v1752_v59  ;;  %1754 = vrot.lane.b32.xlu1 %v1752_v59, %s2188_s22 }
0x1254   : > { %v1765_v61 = vrot.slane %v1763_v40, 2 }
0x1256   : > { %v1768_v63 = vsel %vm371_vm2, %v1763_v40, %v1765_v61 }
0x1257   : > { %v563_v0 = vpop.permute.xlu1 %562  ;;  %1770 = vrot.lane.b32.xlu0 %v1768_v63, %s2188_s22  ;;  %v1028_v2 = vpop.permute.xlu0 %1027 }
0x1258   : > { %1914 = vst.msk [vmem:[%s2240_s9 + $0x2] sm:$0x3] %vm379_vm6, %v563_v0 }
0x1259   : > { %1954 = vst.msk [vmem:[%s2245_s13 + $0x8] sm:$0x3] %vm379_vm6, %v1028_v2 }
0x125f   : > { %v842_v56 = vpop.permute.xlu1 %841  ;;  %v1307_v4 = vpop.permute.xlu0 %1306 }
0x1260   : > { %1938 = vst.msk [vmem:[%s2245_s13 + $0xa] sm:$0x3] %vm379_vm6, %v842_v56 }
0x1261   : > { %1978 = vst.msk [vmem:[%s2240_s9 + $0xa] sm:$0x3] %vm379_vm6, %v1307_v4 }
0x1267   : > { %v1121_v5 = vpop.permute.xlu1 %1120  ;;  %v1586_v6 = vpop.permute.xlu0 %1585 }
0x1268   : > { %1962 = vst.msk [vmem:[%s2240_s9 + $0x8] sm:$0x3] %vm379_vm6, %v1121_v5 }
0x1269   : > { %2002 = vst.msk [vmem:[%s2245_s13 + $0x2] sm:$0x3] %vm379_vm6, %v1586_v6 }
0x126f   : > { %v1400_v60 = vpop.permute.xlu1 %1399 }
0x1270   : > { %1986 = vst.msk [vmem:[%s2245_s13 + $0x4] sm:$0x3] %vm379_vm6, %v1400_v60 }
0x12bc   : > { %v1663_v8 = vpop.permute.xlu1 %1662 }
0x12bd   : > { %1665 = vst.msk [vmem:[#allocation2] sm:$0xf] %vm361_vm10, %v1663_v8 }
0x12c1   : > { %v1679_v3 = vpop.permute.xlu0 %1678 }
0x12c2   : > { %2010 = vst.msk [vmem:[%s2240_s9 + $0xe] sm:$0x3] %vm379_vm6, %v1679_v3 }
0x12c4   : > { %v1755_v10 = vpop.permute.xlu1 %1754 }
0x12c5   : > { %1757 = vst.msk [vmem:[#allocation4] sm:$0xf] %vm361_vm10, %v1755_v10 }
0x12c9   : > { %v1771_v11 = vpop.permute.xlu0 %1770 }
0x12ca   : > { %1773 = vst.msk [vmem:[%s2245_s13] sm:$0x3] %vm379_vm6, %v1771_v11 }
0x12cb PF: > { %s16_s18 = sadd.s32 1, %s2182_s18  }
0x12cc   : > { %p13_p6 = scmp.ge.s32.totalorder %s16_s18, 4  }
0x12ce   :  { %15 = sbr.rel (!%p13_p6) target bundleno = 1 (0x1), region = 113 }

// kernel: dprnn_block_forward.10
= control target key start
LH: loop header
LB: loop body
LE: loop exit
PB: predicated region body
PF: predicated region fallthrough
CT: control target
= control target key end

     0   :  { %vm65_vm0 = vcmask 130048   ;;  %v1531_v2 = vmov 0.0   ;;  %s1532_s22 = smov 16   ;;  %s1533_s6 = smov 80   ;;  %s1974_s2 = inlined_call_operand.vmem [shape: bf16[16,64], index: 2, kind: input, shape index: {}]   ;;  %s1975_s3 = inlined_call_operand.vmem [shape: bf16[16,64], index: 3, kind: input, shape index: {}]   ;;  %s1976_s0 = inlined_call_operand.vmem [shape: f32[4,16,64], index: 0, kind: input, shape index: {}]   ;;  %s1977_s1 = inlined_call_operand.vmem [shape: f32[4,16,64], index: 1, kind: input, shape index: {}]   ;;  %s1978_s5 = inlined_call_operand.vmem [shape: bf16[4,16,16], index: 5, kind: output, shape index: {1}]   ;;  %s1979_s4 = inlined_call_operand.vmem [shape: bf16[4,16,16], index: 4, kind: output, shape index: {0}]  }
   0x1   :  { %v1390_v0 = vld [vmem:[%s1974_s2] sm:$0xff]  ;;  %66 = vst.msk [vmem:[#allocation2] sm:$0xff] %vm65_vm0, %v1531_v2  ;;  %v1317_v14 = vld [vmem:[%s1977_s1 + $0x30] sm:$0xff]  ;;  %v75_v17 = vld [vmem:[%s1976_s0 + $0x8] sm:$0xff]  ;;  %s1534_s7 = smov 96   ;;  %s1535_s8 = smov 112  }
   0x2   :  { %v1391_v1 = vld [vmem:[%s1975_s3] sm:$0xff]  ;;  %67 = vst.msk [vmem:[#allocation2 + $0x8] sm:$0xff] %vm65_vm0, %v1531_v2  ;;  %100 = vmatpush.bf16.msra.mxu0 %v1390_v0  ;;  %v1318_v21 = vld [vmem:[%s1977_s1 + $0x38] sm:$0xff] }
   0x3   :  { %250 = vmatpush.bf16.msra.mxu1 %v1391_v1  ;;  %68 = vst.msk [vmem:[#allocation3] sm:$0xff] %vm65_vm0, %v1531_v2  ;;  %v74_v11 = vld [vmem:[%s1976_s0] sm:$0xff] }
   0x4   :  { %69 = vst.msk [vmem:[#allocation3 + $0x8] sm:$0xff] %vm65_vm0, %v1531_v2 }
   0x5   :  { %70 = vst.msk [vmem:[#allocation4] sm:$0xff] %vm65_vm0, %v1531_v2 }
   0x6   :  { %71 = vst.msk [vmem:[#allocation4 + $0x8] sm:$0xff] %vm65_vm0, %v1531_v2 }
   0x7   :  { %72 = vst.msk [vmem:[#allocation5] sm:$0xff] %vm65_vm0, %v1531_v2 }
   0x8   :  { %v76_v3 = vld [vmem:[#allocation2] sm:$0xff]  ;;  %73 = vst.msk [vmem:[#allocation5 + $0x8] sm:$0xff] %vm65_vm0, %v1531_v2 }
   0x9   :  { %v77_v4 = vld [vmem:[#allocation2 + $0x8] sm:$0xff] }
   0xa   :  { %v80_v5 = vpack.c.bf16 %v77_v4, %v76_v3  ;;  %v78_v6 = vld [vmem:[#allocation3] sm:$0xff] }
   0xb   :  { %151 = vrot.lane.b32.xlu2 %v78_v6, %s1532_s22  ;;  %v79_v10 = vld [vmem:[#allocation3 + $0x8] sm:$0xff] }
   0xc   :  { %1314 = vmatmul.msk.bf16.vlgmr.msra.gmra.mxu0 %vm65_vm0, %v80_v5  ;;  %v227_v7 = vld [vmem:[#allocation4] sm:$0xff] }
   0xd   :  { %v228_v8 = vld [vmem:[#allocation4 + $0x8] sm:$0xff] }
   0xe   :  { %v231_v9 = vpack.c.bf16 %v228_v8, %v227_v7  ;;  %v229_v27 = vld [vmem:[#allocation5] sm:$0xff] }
   0xf   :  { %v230_v28 = vld [vmem:[#allocation5 + $0x8] sm:$0xff] }
  0x10   :  { %1323 = vmatmul.msk.bf16.vlgmr.msra.gmra.mxu1 %vm65_vm0, %v231_v9 }
  0x13   :  { %153 = vrot.lane.b32.xlu2 %v79_v10, %s1532_s22 }
  0x89   :  { %v102_v12 = vpop.f32.mrf.mxu0 }
  0x8a   :  { %v107_v13 = vadd.f32 %v102_v12, %v74_v11 }
  0x8c   :  { %1403 = vtanh.f32 %v107_v13  ;;  %v1315_v29 = vmul.f32 -1.442695, %v107_v13 }
  0x8d   :  { %v252_v15 = vpop.f32.mrf.mxu1 }
  0x8e   :  { %v257_v16 = vadd.f32 %v1317_v14, %v252_v15 }
  0x90   :  { %1405 = vtanh.f32 %v257_v16  ;;  %v1324_v30 = vmul.f32 -1.442695, %v257_v16 }
  0x91   :  { %v104_v18 = vpop.f32.mrf.mxu0 }
  0x92   :  { %v1404_v19 = vpop.eup %1403  ;;  %v108_v20 = vadd.f32 %v104_v18, %v75_v17 }
  0x93   :  { %161 = vrot.lane.b32.xlu0 %v1404_v19, %s1533_s6 }
  0x94   :  { %1407 = vtanh.f32 %v108_v20  ;;  %v1316_v31 = vmul.f32 -1.442695, %v108_v20 }
  0x95   :  { %v254_v22 = vpop.f32.mrf.mxu1 }
  0x96   :  { %v1406_v23 = vpop.eup %1405  ;;  %v258_v24 = vadd.f32 %v1318_v21, %v254_v22 }
  0x97   :  { %311 = vrot.lane.b32.xlu1 %v1406_v23, %s1533_s6 }
  0x98   :  { %1409 = vtanh.f32 %v258_v24  ;;  %v1325_v33 = vmul.f32 -1.442695, %v258_v24 }
  0x99   :  { %1411 = vpow2.f32 %v1315_v29 }
  0x9a   :  { %v1408_v25 = vpop.eup %1407  ;;  %1413 = vpow2.f32 %v1324_v30 }
  0x9b   :  { %163 = vrot.lane.b32.xlu0 %v1408_v25, %s1533_s6  ;;  %1415 = vpow2.f32 %v1316_v31  ;;  %v152_v25 = vpop.permute.xlu2 %151 }
  0x9c   :  { %1417 = vpow2.f32 %v1325_v33 }
  0x9e   :  { %v1410_v26 = vpop.eup %1409 }
  0x9f   :  { %313 = vrot.lane.b32.xlu1 %v1410_v26, %s1533_s6  ;;  %v1412_v32 = vpop.eup %1411 }
  0xa0   :  { %v115_v34 = vadd.f32 1.0, %v1412_v32  ;;  %v1414_v35 = vpop.eup %1413 }
  0xa1   :  { %v265_v36 = vadd.f32 1.0, %v1414_v35  ;;  %v1416_v37 = vpop.eup %1415 }
  0xa2   :  { %1419 = vrcp.f32 %v115_v34  ;;  %v116_v38 = vadd.f32 1.0, %v1416_v37  ;;  %v1418_v39 = vpop.eup %1417  ;;  %v128_v55 = vand.u32 2147483648, %v115_v34  ;;  %vm122_vm2 = vweird.f32 %v115_v34 }
  0xa3   :  { %301 = vrot.lane.b32.xlu0 %v229_v27, %s1532_s22  ;;  %1421 = vrcp.f32 %v265_v36  ;;  %v1602_v41 = vadd.f32 1.0, %v1418_v39  ;;  %v126_v56 = vand.u32 2147483647, %v115_v34  ;;  %vm272_vm4 = vweird.f32 %v265_v36  ;;  %v154_v26 = vpop.permute.xlu2 %153 }
  0xa4   :  { %1423 = vrcp.f32 %v116_v38  ;;  %v129_v61 = vor.u32 1.1754944e-38, %v128_v55  ;;  %v278_v62 = vand.u32 2147483648, %v265_v36  ;;  %v276_v63 = vand.u32 2147483647, %v265_v36 }
  0xa5   :  { %1425 = vrcp.f32 %v1602_v41  ;;  %vm127_vm6 = vcmp.eq.f32.partialorder %v126_v56, 8.507059e+37  ;;  %v143_v6 = vand.u32 2147483648, %v116_v38  ;;  %vm137_vm9 = vweird.f32 %v116_v38 }
  0xa6   :  { %v279_v7 = vor.u32 1.1754944e-38, %v278_v62  ;;  %v141_v8 = vand.u32 2147483647, %v116_v38  ;;  %vm277_vm10 = vcmp.eq.f32.partialorder %v276_v63, 8.507059e+37  ;;  %v293_v15 = vand.u32 2147483648, %v1602_v41 }
  0xa7   :  { %303 = vrot.lane.b32.xlu1 %v230_v28, %s1532_s22  ;;  %v144_v14 = vor.u32 1.1754944e-38, %v143_v6  ;;  %vm287_vm14 = vweird.f32 %v1602_v41  ;;  %v291_v16 = vand.u32 2147483647, %v1602_v41 }
  0xa8   :  { %v1420_v40 = vpop.eup %1419  ;;  %vm142_vm13 = vcmp.eq.f32.partialorder %v141_v8, 8.507059e+37  ;;  %v294_v21 = vor.u32 1.1754944e-38, %v293_v15  ;;  %v1339_v8 = vld [vmem:[%s1977_s1 + $0x20] sm:$0xff]  ;;  %v1340_v15 = vld [vmem:[%s1977_s1 + $0x28] sm:$0xff] }
  0xa9   :  { %v118_v42 = vmul.f32 %v1420_v40, %v115_v34  ;;  %v1422_v43 = vpop.eup %1421  ;;  %vm123_vm1 = vweird.f32 %v1420_v40 }
  0xaa   :  { %v268_v45 = vmul.f32 %v1422_v43, %v265_v36  ;;  %v1424_v46 = vpop.eup %1423  ;;  %vm124_vm3 = vmor %vm122_vm2, %vm123_vm1  ;;  %vm273_vm5 = vweird.f32 %v1422_v43  ;;  %vm292_vm1 = vcmp.eq.f32.partialorder %v291_v16, 8.507059e+37 }
  0xab   :  { %v119_v44 = vsub.f32 1.0, %v118_v42  ;;  %v133_v48 = vmul.f32 %v1424_v46, %v116_v38  ;;  %v1426_v50 = vpop.eup %1425  ;;  %vm138_vm7 = vweird.f32 %v1424_v46  ;;  %vm274_vm8 = vmor %vm272_vm4, %vm273_vm5 }
  0xac   :  { %v269_v49 = vsub.f32 1.0, %v268_v45  ;;  %v283_v54 = vmul.f32 %v1426_v50, %v1602_v41  ;;  %vm139_vm11 = vmor %vm137_vm9, %vm138_vm7  ;;  %vm288_vm12 = vweird.f32 %v1426_v50 }
  0xad   :  { %v120_v47 = vmul.f32 %v1420_v40, %v119_v44  ;;  %v134_v52 = vsub.f32 1.0, %v133_v48  ;;  %vm289_vm15 = vmor %vm287_vm14, %vm288_vm12 }
  0xae   :  { %v270_v53 = vmul.f32 %v1422_v43, %v269_v49  ;;  %v284_v60 = vsub.f32 1.0, %v283_v54  ;;  %v1393_v54 = vld [vmem:[%s1975_s3] sm:$0xff] }
  0xaf   :  { %v121_v51 = vadd.f32 %v1420_v40, %v120_v47  ;;  %v135_v58 = vmul.f32 %v1424_v46, %v134_v52  ;;  %550 = vmatpush.bf16.msra.mxu3 %v1393_v54 }
  0xb0   :  { %v271_v59 = vadd.f32 %v1422_v43, %v270_v53  ;;  %v285_v5 = vmul.f32 %v1426_v50, %v284_v60  ;;  %v1392_v53 = vld [vmem:[%s1974_s2] sm:$0xff] }
  0xb1   :  { %v125_v57 = vsel %vm124_vm3, %v1420_v40, %v121_v51  ;;  %v136_v2 = vadd.f32 %v1424_v46, %v135_v58  ;;  %400 = vmatpush.bf16.msra.mxu2 %v1392_v53 }
  0xb2   :  { %v1606_v0 = vsel %vm127_vm6, %v129_v61, %v125_v57  ;;  %v275_v3 = vsel %vm274_vm8, %v1422_v43, %v271_v59  ;;  %v286_v13 = vadd.f32 %v1426_v50, %v285_v5  ;;  %v1328_v5 = vld [vmem:[%s1976_s0 + $0x10] sm:$0xff] }
  0xb3   :  { %v280_v10 = vsel %vm277_vm10, %v279_v7, %v275_v3  ;;  %v140_v11 = vsel %vm139_vm11, %v1424_v46, %v136_v2  ;;  %v157_v27 = vmul.f32 %v152_v25, %v1606_v0 }
  0xb4   :  { %v145_v17 = vsel %vm142_vm13, %v144_v14, %v140_v11  ;;  %v290_v19 = vsel %vm289_vm15, %v1426_v50, %v286_v13  ;;  %v1329_v11 = vld [vmem:[%s1976_s0 + $0x18] sm:$0xff] }
  0xb5   :  { %v295_v22 = vsel %vm292_vm1, %v294_v21, %v290_v19  ;;  %v158_v40 = vmul.f32 %v154_v26, %v145_v17 }
 0x105   :  { %v162_v1 = vpop.permute.xlu0 %161 }
 0x106   :  { %v167_v4 = vmul.f32 %v162_v1, %v1606_v0 }
 0x108   :  { %171 = vrot.lane.b32.xlu2 %v167_v4, %s1532_s22 }
 0x109   :  { %v312_v9 = vpop.permute.xlu1 %311 }
 0x10a   :  { %v317_v12 = vmul.f32 %v312_v9, %v280_v10 }
 0x10c   :  { %321 = vrot.lane.b32.xlu1 %v317_v12, %s1532_s22 }
 0x10d   :  { %v164_v18 = vpop.permute.xlu0 %163 }
 0x10e   :  { %v168_v20 = vmul.f32 %v164_v18, %v145_v17 }
 0x110   :  { %173 = vrot.lane.b32.xlu0 %v168_v20, %s1532_s22 }
 0x111   :  { %v314_v23 = vpop.permute.xlu1 %313 }
 0x112   :  { %v318_v24 = vmul.f32 %v314_v23, %v295_v22 }
 0x114   :  { %323 = vrot.lane.b32.xlu2 %v318_v24, %s1532_s22 }
 0x115   :  { %v302_v36 = vpop.permute.xlu0 %301 }
 0x116   :  { %v307_v37 = vmul.f32 %v302_v36, %v280_v10 }
 0x119   :  { %v304_v30 = vpop.permute.xlu1 %303 }
 0x11a   :  { %v308_v32 = vmul.f32 %v304_v30, %v295_v22 }
 0x162   :  { %v172_v28 = vpop.permute.xlu2 %171 }
 0x163   :  { %v177_v29 = vadd.f32 %v172_v28, %v157_v27 }
 0x165   :  { %1427 = vtanh.f32 %v177_v29 }
 0x16b   :  { %v1428_v31 = vpop.eup %1427 }
 0x16c   :  { %183 = vrot.lane.b32.xlu0 %v1428_v31, %s1532_s22 }
 0x16e   :  { %v324_v33 = vpop.permute.xlu2 %323 }
 0x16f   :  { %v328_v34 = vadd.f32 %v324_v33, %v308_v32 }
 0x171   :  { %1429 = vtanh.f32 %v328_v34 }
 0x177   :  { %v1430_v35 = vpop.eup %1429 }
 0x178   :  { %335 = vrot.lane.b32.xlu0 %v1430_v35, %s1532_s22 }
 0x17e   :  { %v322_v38 = vpop.permute.xlu1 %321 }
 0x17f   :  { %v327_v39 = vadd.f32 %v322_v38, %v307_v37 }
 0x181   :  { %1431 = vtanh.f32 %v327_v39 }
 0x182   :  { %v174_v41 = vpop.permute.xlu0 %173 }
 0x183   :  { %v178_v42 = vadd.f32 %v174_v41, %v158_v40 }
 0x185   :  { %1433 = vtanh.f32 %v178_v42 }
 0x187   :  { %v1432_v43 = vpop.eup %1431 }
 0x188   :  { %333 = vrot.lane.b32.xlu2 %v1432_v43, %s1532_s22 }
 0x18b   :  { %v1434_v44 = vpop.eup %1433 }
 0x18c   :  { %185 = vrot.lane.b32.xlu1 %v1434_v44, %s1532_s22 }
 0x1de   :  { %v184_v45 = vpop.permute.xlu0 %183 }
 0x1df   :  { %v1622_v46 = vmul.f32 %v184_v45, %v1606_v0 }
 0x1e1   :  { %193 = vrot.lane.b32.xlu1 %v1622_v46, %s1534_s7 }
 0x1e2   :  { %v334_v47 = vpop.permute.xlu2 %333 }
 0x1e3   :  { %v1626_v48 = vmul.f32 %v334_v47, %v280_v10 }
 0x1e5   :  { %343 = vrot.lane.b32.xlu0 %v1626_v48, %s1534_s7 }
 0x1ea   :  { %v336_v49 = vpop.permute.xlu0 %335 }
 0x1eb   :  { %v1630_v50 = vmul.f32 %v336_v49, %v295_v22 }
 0x1ed   :  { %205 = vrot.lane.b32.xlu0 %v178_v42, %s1535_s8  ;;  %345 = vrot.lane.b32.xlu1 %v1630_v50, %s1534_s7 }
 0x1f5   :  { %353 = vrot.lane.b32.xlu1 %v327_v39, %s1535_s8 }
 0x1fe   :  { %v186_v51 = vpop.permute.xlu1 %185 }
 0x1ff   :  { %v1636_v52 = vmul.f32 %v186_v51, %v145_v17 }
 0x201   :  { %195 = vrot.lane.b32.xlu2 %v1636_v52, %s1534_s7 }
 0x209   :  { %203 = vrot.lane.b32.xlu2 %v177_v29, %s1535_s8 }
 0x211   :  { %355 = vrot.lane.b32.xlu2 %v328_v34, %s1535_s8 }
 0x253   :  { %v194_v55 = vpop.permute.xlu1 %193 }
 0x254   :  { %199 = vst.msk [vmem:[#allocation2] sm:$0xff] %vm65_vm0, %v194_v55 }
 0x257   :  { %v344_v56 = vpop.permute.xlu0 %343 }
 0x258   :  { %349 = vst.msk [vmem:[#allocation4] sm:$0xff] %vm65_vm0, %v344_v56 }
 0x25b   :  { %v196_v57 = vpop.permute.xlu2 %195  ;;  %v377_v61 = vld [vmem:[#allocation2] sm:$0xff] }
 0x25c   :  { %200 = vst.msk [vmem:[#allocation2 + $0x8] sm:$0xff] %vm65_vm0, %v196_v57 }
 0x25f   :  { %v346_v58 = vpop.permute.xlu1 %345  ;;  %v206_v59 = vpop.permute.xlu0 %205  ;;  %v527_v1 = vld [vmem:[#allocation4] sm:$0xff] }
 0x260   :  { %350 = vst.msk [vmem:[#allocation4 + $0x8] sm:$0xff] %vm65_vm0, %v346_v58 }
 0x261   :  { %210 = vst.msk [vmem:[#allocation3 + $0x8] sm:$0xff] %vm65_vm0, %v206_v59 }
 0x263   :  { %v204_v60 = vpop.permute.xlu2 %203  ;;  %v378_v62 = vld [vmem:[#allocation2 + $0x8] sm:$0xff] }
 0x264   :  { %209 = vst.msk [vmem:[#allocation3] sm:$0xff] %vm65_vm0, %v204_v60  ;;  %v381_v63 = vpack.c.bf16 %v378_v62, %v377_v61 }
 0x266   :  { %1334 = vmatmul.msk.bf16.vlgmr.msra.gmra.mxu2 %vm65_vm0, %v381_v63 }
 0x267   :  { %v354_v0 = vpop.permute.xlu1 %353  ;;  %v528_v2 = vld [vmem:[#allocation4 + $0x8] sm:$0xff] }
 0x268   :  { %359 = vst.msk [vmem:[#allocation5] sm:$0xff] %vm65_vm0, %v354_v0  ;;  %v531_v3 = vpack.c.bf16 %v528_v2, %v527_v1  ;;  %v380_v21 = vld [vmem:[#allocation3 + $0x8] sm:$0xff] }
 0x26a   :  { %1345 = vmatmul.msk.bf16.vlgmr.msra.gmra.mxu3 %vm65_vm0, %v531_v3 }
 0x26b   :  { %v356_v4 = vpop.permute.xlu2 %355  ;;  %v379_v22 = vld [vmem:[#allocation3] sm:$0xff] }
 0x26c   :  { %360 = vst.msk [vmem:[#allocation5 + $0x8] sm:$0xff] %vm65_vm0, %v356_v4 }
 0x26f   :  { %v529_v23 = vld [vmem:[#allocation5] sm:$0xff] }
 0x273   :  { %v530_v24 = vld [vmem:[#allocation5 + $0x8] sm:$0xff] }
 0x2e9   :  { %v402_v6 = vpop.f32.mrf.mxu2 }
 0x2ea   :  { %v407_v7 = vadd.f32 %v1328_v5, %v402_v6 }
 0x2ec   :  { %1435 = vtanh.f32 %v407_v7  ;;  %v1335_v28 = vmul.f32 -1.442695, %v407_v7 }
 0x2ed   :  { %v552_v9 = vpop.f32.mrf.mxu3 }
 0x2ee   :  { %v557_v10 = vadd.f32 %v1339_v8, %v552_v9 }
 0x2f0   :  { %1437 = vtanh.f32 %v557_v10  ;;  %v1346_v25 = vmul.f32 -1.442695, %v557_v10 }
 0x2f1   :  { %v404_v12 = vpop.f32.mrf.mxu2 }
 0x2f2   :  { %v1436_v13 = vpop.eup %1435  ;;  %v408_v14 = vadd.f32 %v1329_v11, %v404_v12 }
 0x2f3   :  { %461 = vrot.lane.b32.xlu0 %v1436_v13, %s1533_s6 }
 0x2f4   :  { %1439 = vtanh.f32 %v408_v14  ;;  %v1336_v31 = vmul.f32 -1.442695, %v408_v14 }
 0x2f5   :  { %v554_v16 = vpop.f32.mrf.mxu3 }
 0x2f6   :  { %v1438_v17 = vpop.eup %1437  ;;  %v558_v18 = vadd.f32 %v1340_v15, %v554_v16 }
 0x2f7   :  { %611 = vrot.lane.b32.xlu2 %v1438_v17, %s1533_s6 }
 0x2f8   :  { %1441 = vtanh.f32 %v558_v18  ;;  %v1347_v34 = vmul.f32 -1.442695, %v558_v18 }
 0x2f9   :  { %1443 = vpow2.f32 %v1346_v25 }
 0x2fa   :  { %v1440_v19 = vpop.eup %1439 }
 0x2fb   :  { %463 = vrot.lane.b32.xlu1 %v1440_v19, %s1533_s6 }
 0x2fe   :  { %v1442_v20 = vpop.eup %1441 }
 0x2ff   :  { %613 = vrot.lane.b32.xlu0 %v1442_v20, %s1533_s6  ;;  %453 = vrot.lane.b32.xlu2 %v380_v21, %s1532_s22  ;;  %v1444_v26 = vpop.eup %1443 }
 0x300   :  { %v565_v27 = vadd.f32 1.0, %v1444_v26 }
 0x302   :  { %1445 = vrcp.f32 %v565_v27  ;;  %v578_v39 = vand.u32 2147483648, %v565_v27  ;;  %vm572_vm3 = vweird.f32 %v565_v27  ;;  %v576_v40 = vand.u32 2147483647, %v565_v27 }
 0x303   :  { %451 = vrot.lane.b32.xlu1 %v379_v22, %s1532_s22  ;;  %1447 = vpow2.f32 %v1335_v28 }
 0x304   :  { %1449 = vpow2.f32 %v1336_v31  ;;  %v579_v45 = vor.u32 1.1754944e-38, %v578_v39  ;;  %vm577_vm5 = vcmp.eq.f32.partialorder %v576_v40, 8.507059e+37 }
 0x305   :  { %1451 = vpow2.f32 %v1347_v34 }
 0x307   :  { %601 = vrot.lane.b32.xlu0 %v529_v23, %s1532_s22 }
 0x308   :  { %v1446_v29 = vpop.eup %1445 }
 0x309   :  { %v568_v30 = vmul.f32 %v1446_v29, %v565_v27  ;;  %v1448_v32 = vpop.eup %1447  ;;  %vm573_vm2 = vweird.f32 %v1446_v29 }
 0x30a   :  { %v415_v35 = vadd.f32 1.0, %v1448_v32  ;;  %v1450_v37 = vpop.eup %1449  ;;  %vm574_vm4 = vmor %vm572_vm3, %vm573_vm2 }
 0x30b   :  { %603 = vrot.lane.b32.xlu1 %v530_v24, %s1532_s22  ;;  %v569_v33 = vsub.f32 1.0, %v568_v30  ;;  %v416_v41 = vadd.f32 1.0, %v1450_v37  ;;  %v1452_v42 = vpop.eup %1451 }
 0x30c   :  { %1453 = vrcp.f32 %v415_v35  ;;  %v566_v47 = vadd.f32 1.0, %v1452_v42  ;;  %v428_v63 = vand.u32 2147483648, %v415_v35  ;;  %vm422_vm7 = vweird.f32 %v415_v35 }
 0x30d   :  { %v570_v36 = vmul.f32 %v1446_v29, %v569_v33  ;;  %1455 = vrcp.f32 %v416_v41  ;;  %v426_v0 = vand.u32 2147483647, %v415_v35  ;;  %v443_v10 = vand.u32 2147483648, %v416_v41 }
 0x30e   :  { %1457 = vrcp.f32 %v566_v47  ;;  %v429_v4 = vor.u32 1.1754944e-38, %v428_v63  ;;  %vm437_vm11 = vweird.f32 %v416_v41  ;;  %v441_v11 = vand.u32 2147483647, %v416_v41 }
 0x30f   :  { %v571_v38 = vadd.f32 %v1446_v29, %v570_v36  ;;  %vm427_vm9 = vcmp.eq.f32.partialorder %v426_v0, 8.507059e+37  ;;  %v444_v14 = vor.u32 1.1754944e-38, %v443_v10  ;;  %v593_v15 = vand.u32 2147483648, %v566_v47 }
 0x310   :  { %vm442_vm14 = vcmp.eq.f32.partialorder %v441_v11, 8.507059e+37  ;;  %vm587_vm15 = vweird.f32 %v566_v47  ;;  %v591_v16 = vand.u32 2147483647, %v566_v47 }
 0x311   :  { %v575_v43 = vsel %vm574_vm4, %v1446_v29, %v571_v38  ;;  %v594_v21 = vor.u32 1.1754944e-38, %v593_v15  ;;  %v1351_v15 = vld [vmem:[%s1976_s0 + $0x28] sm:$0xff] }
 0x312   :  { %v1454_v44 = vpop.eup %1453  ;;  %v1678_v51 = vsel %vm577_vm5, %v579_v45, %v575_v43  ;;  %vm592_vm2 = vcmp.eq.f32.partialorder %v591_v16, 8.507059e+37 }
 0x313   :  { %v418_v54 = vmul.f32 %v1454_v44, %v415_v35  ;;  %v1456_v56 = vpop.eup %1455  ;;  %vm423_vm6 = vweird.f32 %v1454_v44 }
 0x314   :  { %v433_v57 = vmul.f32 %v1456_v56, %v416_v41  ;;  %v1458_v59 = vpop.eup %1457  ;;  %vm424_vm8 = vmor %vm422_vm7, %vm423_vm6  ;;  %vm438_vm10 = vweird.f32 %v1456_v56 }
 0x315   :  { %v419_v55 = vsub.f32 1.0, %v418_v54  ;;  %v583_v62 = vmul.f32 %v1458_v59, %v566_v47  ;;  %vm439_vm12 = vmor %vm437_vm11, %vm438_vm10  ;;  %vm588_vm13 = vweird.f32 %v1458_v59 }
 0x316   :  { %v434_v60 = vsub.f32 1.0, %v433_v57  ;;  %vm589_vm1 = vmor %vm587_vm15, %vm588_vm13  ;;  %v1394_v57 = vld [vmem:[%s1974_s2] sm:$0xff] }
 0x317   :  { %v420_v58 = vmul.f32 %v1454_v44, %v419_v55  ;;  %v584_v3 = vsub.f32 1.0, %v583_v62  ;;  %700 = vmatpush.bf16.msrb.mxu0 %v1394_v57 }
 0x318   :  { %v435_v1 = vmul.f32 %v1456_v56, %v434_v60 }
 0x319   :  { %v421_v61 = vadd.f32 %v1454_v44, %v420_v58  ;;  %v585_v9 = vmul.f32 %v1458_v59, %v584_v3 }
 0x31a   :  { %v436_v7 = vadd.f32 %v1456_v56, %v435_v1 }
 0x31b   :  { %v425_v2 = vsel %vm424_vm8, %v1454_v44, %v421_v61  ;;  %v586_v13 = vadd.f32 %v1458_v59, %v585_v9  ;;  %v1350_v9 = vld [vmem:[%s1976_s0 + $0x20] sm:$0xff] }
 0x31c   :  { %v1682_v5 = vsel %vm427_vm9, %v429_v4, %v425_v2  ;;  %v440_v12 = vsel %vm439_vm12, %v1456_v56, %v436_v7 }
 0x31d   :  { %v445_v17 = vsel %vm442_vm14, %v444_v14, %v440_v12  ;;  %v590_v20 = vsel %vm589_vm1, %v1458_v59, %v586_v13  ;;  %v1395_v59 = vld [vmem:[%s1975_s3] sm:$0xff]  ;;  %v1361_v12 = vld [vmem:[%s1977_s1 + $0x10] sm:$0xff] }
 0x31e   :  { %v595_v22 = vsel %vm592_vm2, %v594_v21, %v590_v20  ;;  %850 = vmatpush.bf16.msrb.mxu1 %v1395_v59 }
 0x351   :  { %v612_v49 = vpop.permute.xlu2 %611 }
 0x352   :  { %v617_v53 = vmul.f32 %v612_v49, %v1678_v51 }
 0x354   :  { %621 = vrot.lane.b32.xlu1 %v617_v53, %s1532_s22 }
 0x359   :  { %v454_v26 = vpop.permute.xlu2 %453 }
 0x35a   :  { %v458_v41 = vmul.f32 %v454_v26, %v445_v17 }
 0x365   :  { %v462_v6 = vpop.permute.xlu0 %461 }
 0x366   :  { %v467_v8 = vmul.f32 %v462_v6, %v1682_v5 }
 0x368   :  { %471 = vrot.lane.b32.xlu2 %v467_v8, %s1532_s22 }
 0x36d   :  { %v464_v18 = vpop.permute.xlu1 %463 }
 0x36e   :  { %v468_v19 = vmul.f32 %v464_v18, %v445_v17 }
 0x370   :  { %473 = vrot.lane.b32.xlu0 %v468_v19, %s1532_s22  ;;  %v1362_v19 = vld [vmem:[%s1977_s1 + $0x18] sm:$0xff] }
 0x371   :  { %v614_v23 = vpop.permute.xlu0 %613 }
 0x372   :  { %v618_v24 = vmul.f32 %v614_v23, %v595_v22 }
 0x374   :  { %623 = vrot.lane.b32.xlu2 %v618_v24, %s1532_s22 }
 0x375   :  { %v452_v25 = vpop.permute.xlu1 %451 }
 0x376   :  { %v457_v28 = vmul.f32 %v452_v25, %v1682_v5 }
 0x379   :  { %v602_v29 = vpop.permute.xlu0 %601 }
 0x37a   :  { %v607_v32 = vmul.f32 %v602_v29, %v1678_v51 }
 0x37d   :  { %v604_v27 = vpop.permute.xlu1 %603 }
 0x37e   :  { %v608_v36 = vmul.f32 %v604_v27, %v595_v22 }
 0x3c2   :  { %v472_v30 = vpop.permute.xlu2 %471 }
 0x3c3   :  { %v477_v31 = vadd.f32 %v472_v30, %v457_v28 }
 0x3c5   :  { %1459 = vtanh.f32 %v477_v31 }
 0x3c6   :  { %v622_v33 = vpop.permute.xlu1 %621 }
 0x3c7   :  { %v627_v34 = vadd.f32 %v622_v33, %v607_v32 }
 0x3c9   :  { %1461 = vtanh.f32 %v627_v34 }
 0x3cb   :  { %v1460_v35 = vpop.eup %1459 }
 0x3cc   :  { %483 = vrot.lane.b32.xlu0 %v1460_v35, %s1532_s22 }
 0x3ce   :  { %v624_v37 = vpop.permute.xlu2 %623 }
 0x3cf   :  { %v1462_v38 = vpop.eup %1461  ;;  %v628_v39 = vadd.f32 %v624_v37, %v608_v36 }
 0x3d0   :  { %633 = vrot.lane.b32.xlu2 %v1462_v38, %s1532_s22 }
 0x3d1   :  { %1463 = vtanh.f32 %v628_v39 }
 0x3d7   :  { %v1464_v40 = vpop.eup %1463 }
 0x3d8   :  { %635 = vrot.lane.b32.xlu0 %v1464_v40, %s1532_s22 }
 0x3e2   :  { %v474_v42 = vpop.permute.xlu0 %473 }
 0x3e3   :  { %v478_v43 = vadd.f32 %v474_v42, %v458_v41 }
 0x3e5   :  { %1465 = vtanh.f32 %v478_v43 }
 0x3eb   :  { %v1466_v44 = vpop.eup %1465 }
 0x3ec   :  { %485 = vrot.lane.b32.xlu1 %v1466_v44, %s1532_s22 }
 0x42a   :  { %v634_v45 = vpop.permute.xlu2 %633 }
 0x42b   :  { %v1695_v47 = vmul.f32 %v634_v45, %v1678_v51 }
 0x42d   :  { %643 = vrot.lane.b32.xlu0 %v1695_v47, %s1534_s7 }
 0x435   :  { %505 = vrot.lane.b32.xlu0 %v478_v43, %s1535_s8 }
 0x43e   :  { %v484_v49 = vpop.permute.xlu0 %483 }
 0x43f   :  { %v1701_v53 = vmul.f32 %v484_v49, %v1682_v5 }
 0x441   :  { %493 = vrot.lane.b32.xlu1 %v1701_v53, %s1534_s7 }
 0x44a   :  { %v636_v54 = vpop.permute.xlu0 %635 }
 0x44b   :  { %v1705_v55 = vmul.f32 %v636_v54, %v595_v22 }
 0x44d   :  { %645 = vrot.lane.b32.xlu1 %v1705_v55, %s1534_s7 }
 0x455   :  { %653 = vrot.lane.b32.xlu1 %v627_v34, %s1535_s8 }
 0x45e   :  { %v486_v51 = vpop.permute.xlu1 %485 }
 0x45f   :  { %v1710_v56 = vmul.f32 %v486_v51, %v445_v17 }
 0x461   :  { %495 = vrot.lane.b32.xlu2 %v1710_v56, %s1534_s7 }
 0x469   :  { %503 = vrot.lane.b32.xlu2 %v477_v31, %s1535_s8 }
 0x471   :  { %655 = vrot.lane.b32.xlu2 %v628_v39, %s1535_s8 }
 0x49f   :  { %v644_v58 = vpop.permute.xlu0 %643 }
 0x4a0   :  { %649 = vst.msk [vmem:[#allocation4] sm:$0xff] %vm65_vm0, %v644_v58 }
 0x4a7   :  { %v506_v60 = vpop.permute.xlu0 %505  ;;  %v827_v5 = vld [vmem:[#allocation4] sm:$0xff] }
 0x4a8   :  { %510 = vst.msk [vmem:[#allocation3 + $0x8] sm:$0xff] %vm65_vm0, %v506_v60 }
 0x4af   :  { %v680_v25 = vld [vmem:[#allocation3 + $0x8] sm:$0xff] }
 0x4b3   :  { %v494_v61 = vpop.permute.xlu1 %493 }
 0x4b4   :  { %499 = vst.msk [vmem:[#allocation2] sm:$0xff] %vm65_vm0, %v494_v61 }
 0x4bb   :  { %v496_v62 = vpop.permute.xlu2 %495  ;;  %v677_v1 = vld [vmem:[#allocation2] sm:$0xff] }
 0x4bc   :  { %500 = vst.msk [vmem:[#allocation2 + $0x8] sm:$0xff] %vm65_vm0, %v496_v62 }
 0x4bf   :  { %v646_v63 = vpop.permute.xlu1 %645 }
 0x4c0   :  { %650 = vst.msk [vmem:[#allocation4 + $0x8] sm:$0xff] %vm65_vm0, %v646_v63 }
 0x4c3   :  { %v504_v0 = vpop.permute.xlu2 %503  ;;  %v678_v2 = vld [vmem:[#allocation2 + $0x8] sm:$0xff] }
 0x4c4   :  { %509 = vst.msk [vmem:[#allocation3] sm:$0xff] %vm65_vm0, %v504_v0  ;;  %v681_v3 = vpack.c.bf16 %v678_v2, %v677_v1 }
 0x4c6   :  { %1356 = vmatmul.msk.bf16.vlgmr.msrb.gmra.mxu0 %vm65_vm0, %v681_v3 }
 0x4c7   :  { %v654_v4 = vpop.permute.xlu1 %653  ;;  %v828_v6 = vld [vmem:[#allocation4 + $0x8] sm:$0xff] }
 0x4c8   :  { %659 = vst.msk [vmem:[#allocation5] sm:$0xff] %vm65_vm0, %v654_v4  ;;  %v831_v7 = vpack.c.bf16 %v828_v6, %v827_v5 }
 0x4ca   :  { %1367 = vmatmul.msk.bf16.vlgmr.msrb.gmra.mxu1 %vm65_vm0, %v831_v7 }
 0x4cb   :  { %v656_v8 = vpop.permute.xlu2 %655  ;;  %v679_v26 = vld [vmem:[#allocation3] sm:$0xff] }
 0x4cc   :  { %660 = vst.msk [vmem:[#allocation5 + $0x8] sm:$0xff] %vm65_vm0, %v656_v8 }
 0x4cf   :  { %v829_v27 = vld [vmem:[#allocation5] sm:$0xff] }
 0x4d3   :  { %v830_v28 = vld [vmem:[#allocation5 + $0x8] sm:$0xff] }
 0x543   :  { %v702_v10 = vpop.f32.mrf.mxu0 }
 0x544   :  { %v707_v11 = vadd.f32 %v1350_v9, %v702_v10 }
 0x546   :  { %1467 = vtanh.f32 %v707_v11  ;;  %v1357_v32 = vmul.f32 -1.442695, %v707_v11 }
 0x547   :  { %v852_v13 = vpop.f32.mrf.mxu1 }
 0x548   :  { %v857_v14 = vadd.f32 %v1361_v12, %v852_v13 }
 0x54a   :  { %1469 = vtanh.f32 %v857_v14  ;;  %v1368_v29 = vmul.f32 -1.442695, %v857_v14 }
 0x54b   :  { %v704_v16 = vpop.f32.mrf.mxu0 }
 0x54c   :  { %v1468_v17 = vpop.eup %1467  ;;  %v708_v18 = vadd.f32 %v1351_v15, %v704_v16 }
 0x54d   :  { %761 = vrot.lane.b32.xlu0 %v1468_v17, %s1533_s6 }
 0x54e   :  { %1471 = vtanh.f32 %v708_v18  ;;  %v1358_v35 = vmul.f32 -1.442695, %v708_v18 }
 0x54f   :  { %v854_v20 = vpop.f32.mrf.mxu1 }
 0x550   :  { %v1470_v21 = vpop.eup %1469  ;;  %v858_v22 = vadd.f32 %v1362_v19, %v854_v20 }
 0x551   :  { %911 = vrot.lane.b32.xlu2 %v1470_v21, %s1533_s6 }
 0x552   :  { %1473 = vtanh.f32 %v858_v22  ;;  %v1369_v38 = vmul.f32 -1.442695, %v858_v22 }
 0x553   :  { %1475 = vpow2.f32 %v1368_v29 }
 0x554   :  { %v1472_v23 = vpop.eup %1471 }
 0x555   :  { %763 = vrot.lane.b32.xlu1 %v1472_v23, %s1533_s6 }
 0x558   :  { %v1474_v24 = vpop.eup %1473 }
 0x559   :  { %913 = vrot.lane.b32.xlu0 %v1474_v24, %s1533_s6  ;;  %753 = vrot.lane.b32.xlu2 %v680_v25, %s1532_s22  ;;  %v1476_v30 = vpop.eup %1475 }
 0x55a   :  { %v865_v31 = vadd.f32 1.0, %v1476_v30 }
 0x55c   :  { %1477 = vrcp.f32 %v865_v31  ;;  %v878_v43 = vand.u32 2147483648, %v865_v31  ;;  %vm872_vm4 = vweird.f32 %v865_v31  ;;  %v876_v44 = vand.u32 2147483647, %v865_v31 }
 0x55d   :  { %751 = vrot.lane.b32.xlu1 %v679_v26, %s1532_s22  ;;  %1479 = vpow2.f32 %v1357_v32 }
 0x55e   :  { %1481 = vpow2.f32 %v1358_v35  ;;  %v879_v57 = vor.u32 1.1754944e-38, %v878_v43  ;;  %vm877_vm6 = vcmp.eq.f32.partialorder %v876_v44, 8.507059e+37 }
 0x55f   :  { %1483 = vpow2.f32 %v1369_v38 }
 0x561   :  { %901 = vrot.lane.b32.xlu0 %v829_v27, %s1532_s22 }
 0x562   :  { %v1478_v33 = vpop.eup %1477 }
 0x563   :  { %v868_v34 = vmul.f32 %v1478_v33, %v865_v31  ;;  %v1480_v36 = vpop.eup %1479  ;;  %vm873_vm3 = vweird.f32 %v1478_v33 }
 0x564   :  { %v715_v39 = vadd.f32 1.0, %v1480_v36  ;;  %v1482_v41 = vpop.eup %1481  ;;  %vm874_vm5 = vmor %vm872_vm4, %vm873_vm3 }
 0x565   :  { %903 = vrot.lane.b32.xlu1 %v830_v28, %s1532_s22  ;;  %v869_v37 = vsub.f32 1.0, %v868_v34  ;;  %v716_v45 = vadd.f32 1.0, %v1482_v41  ;;  %v1484_v49 = vpop.eup %1483 }
 0x566   :  { %1485 = vrcp.f32 %v715_v39  ;;  %v866_v58 = vadd.f32 1.0, %v1484_v49  ;;  %v728_v7 = vand.u32 2147483648, %v715_v39  ;;  %vm722_vm8 = vweird.f32 %v715_v39 }
 0x567   :  { %v870_v40 = vmul.f32 %v1478_v33, %v869_v37  ;;  %1487 = vrcp.f32 %v716_v45  ;;  %v726_v8 = vand.u32 2147483647, %v715_v39  ;;  %v743_v18 = vand.u32 2147483648, %v716_v45 }
 0x568   :  { %1489 = vrcp.f32 %v866_v58  ;;  %v729_v12 = vor.u32 1.1754944e-38, %v728_v7  ;;  %vm737_vm12 = vweird.f32 %v716_v45  ;;  %v741_v19 = vand.u32 2147483647, %v716_v45  ;;  %v1397_v7 = vld [vmem:[%s1975_s3] sm:$0xff] }
 0x569   :  { %v871_v42 = vadd.f32 %v1478_v33, %v870_v40  ;;  %vm727_vm10 = vcmp.eq.f32.partialorder %v726_v8, 8.507059e+37  ;;  %v744_v22 = vor.u32 1.1754944e-38, %v743_v18  ;;  %v893_v23 = vand.u32 2147483648, %v866_v58  ;;  %1149 = vmatpush.bf16.msrb.mxu3 %v1397_v7 }
 0x56a   :  { %vm742_vm15 = vcmp.eq.f32.partialorder %v741_v19, 8.507059e+37  ;;  %vm887_vm1 = vweird.f32 %v866_v58  ;;  %v891_v24 = vand.u32 2147483647, %v866_v58 }
 0x56b   :  { %v875_v54 = vsel %vm874_vm5, %v1478_v33, %v871_v42  ;;  %v894_v29 = vor.u32 1.1754944e-38, %v893_v23 }
 0x56c   :  { %v1486_v51 = vpop.eup %1485  ;;  %v1752_v60 = vsel %vm877_vm6, %v879_v57, %v875_v54  ;;  %vm892_vm3 = vcmp.eq.f32.partialorder %v891_v24, 8.507059e+37  ;;  %v1124_v24 = vld [vmem:[%s1977_s1] sm:$0xff] }
 0x56d   :  { %v718_v62 = vmul.f32 %v1486_v51, %v715_v39  ;;  %v1488_v0 = vpop.eup %1487  ;;  %vm723_vm7 = vweird.f32 %v1486_v51 }
 0x56e   :  { %v733_v1 = vmul.f32 %v1488_v0, %v716_v45  ;;  %v1490_v3 = vpop.eup %1489  ;;  %vm724_vm9 = vmor %vm722_vm8, %vm723_vm7  ;;  %vm738_vm11 = vweird.f32 %v1488_v0 }
 0x56f   :  { %v719_v63 = vsub.f32 1.0, %v718_v62  ;;  %v883_v6 = vmul.f32 %v1490_v3, %v866_v58  ;;  %vm739_vm13 = vmor %vm737_vm12, %vm738_vm11  ;;  %vm888_vm14 = vweird.f32 %v1490_v3 }
 0x570   :  { %v734_v4 = vsub.f32 1.0, %v733_v1  ;;  %vm889_vm2 = vmor %vm887_vm1, %vm888_vm14 }
 0x571   :  { %v720_v2 = vmul.f32 %v1486_v51, %v719_v63  ;;  %v884_v11 = vsub.f32 1.0, %v883_v6 }
 0x572   :  { %v735_v9 = vmul.f32 %v1488_v0, %v734_v4 }
 0x573   :  { %v721_v5 = vadd.f32 %v1486_v51, %v720_v2  ;;  %v885_v17 = vmul.f32 %v1490_v3, %v884_v11 }
 0x574   :  { %v736_v15 = vadd.f32 %v1488_v0, %v735_v9 }
 0x575   :  { %v725_v10 = vsel %vm724_vm9, %v1486_v51, %v721_v5  ;;  %v886_v21 = vadd.f32 %v1490_v3, %v885_v17  ;;  %v1396_v5 = vld [vmem:[%s1974_s2] sm:$0xff] }
 0x576   :  { %v1756_v13 = vsel %vm727_vm10, %v729_v12, %v725_v10  ;;  %v740_v20 = vsel %vm739_vm13, %v1488_v0, %v736_v15  ;;  %1000 = vmatpush.bf16.msrb.mxu2 %v1396_v5 }
 0x577   :  { %v745_v25 = vsel %vm742_vm15, %v744_v22, %v740_v20  ;;  %v890_v28 = vsel %vm889_vm2, %v1490_v3, %v886_v21  ;;  %v1372_v21 = vld [vmem:[%s1976_s0 + $0x30] sm:$0xff] }
 0x578   :  { %v895_v30 = vsel %vm892_vm3, %v894_v29, %v890_v28 }
 0x5ab   :  { %v912_v59 = vpop.permute.xlu2 %911 }
 0x5ac   :  { %v917_v61 = vmul.f32 %v912_v59, %v1752_v60 }
 0x5ae   :  { %921 = vrot.lane.b32.xlu1 %v917_v61, %s1532_s22 }
 0x5b3   :  { %v754_v34 = vpop.permute.xlu2 %753 }
 0x5b4   :  { %v758_v57 = vmul.f32 %v754_v34, %v745_v25 }
 0x5bf   :  { %v762_v14 = vpop.permute.xlu0 %761 }
 0x5c0   :  { %v767_v16 = vmul.f32 %v762_v14, %v1756_v13 }
 0x5c2   :  { %771 = vrot.lane.b32.xlu2 %v767_v16, %s1532_s22 }
 0x5c7   :  { %v764_v26 = vpop.permute.xlu1 %763 }
 0x5c8   :  { %v768_v27 = vmul.f32 %v764_v26, %v745_v25 }
 0x5ca   :  { %773 = vrot.lane.b32.xlu0 %v768_v27, %s1532_s22  ;;  %v1373_v27 = vld [vmem:[%s1976_s0 + $0x38] sm:$0xff] }
 0x5cb   :  { %v914_v31 = vpop.permute.xlu0 %913 }
 0x5cc   :  { %v918_v32 = vmul.f32 %v914_v31, %v895_v30  ;;  %v1125_v31 = vld [vmem:[%s1977_s1 + $0x8] sm:$0xff] }
 0x5ce   :  { %923 = vrot.lane.b32.xlu2 %v918_v32, %s1532_s22 }
 0x5cf   :  { %v752_v33 = vpop.permute.xlu1 %751 }
 0x5d0   :  { %v757_v36 = vmul.f32 %v752_v33, %v1756_v13 }
 0x5d3   :  { %v902_v37 = vpop.permute.xlu0 %901 }
 0x5d4   :  { %v907_v40 = vmul.f32 %v902_v37, %v1752_v60 }
 0x5d7   :  { %v904_v35 = vpop.permute.xlu1 %903 }
 0x5d8   :  { %v908_v44 = vmul.f32 %v904_v35, %v895_v30 }
 0x61c   :  { %v772_v38 = vpop.permute.xlu2 %771 }
 0x61d   :  { %v777_v39 = vadd.f32 %v772_v38, %v757_v36 }
 0x61f   :  { %1491 = vtanh.f32 %v777_v39 }
 0x620   :  { %v922_v41 = vpop.permute.xlu1 %921 }
 0x621   :  { %v927_v42 = vadd.f32 %v922_v41, %v907_v40 }
 0x623   :  { %1493 = vtanh.f32 %v927_v42 }
 0x625   :  { %v1492_v43 = vpop.eup %1491 }
 0x626   :  { %783 = vrot.lane.b32.xlu0 %v1492_v43, %s1532_s22 }
 0x628   :  { %v924_v45 = vpop.permute.xlu2 %923 }
 0x629   :  { %v1494_v49 = vpop.eup %1493  ;;  %v928_v54 = vadd.f32 %v924_v45, %v908_v44 }
 0x62a   :  { %933 = vrot.lane.b32.xlu2 %v1494_v49, %s1532_s22 }
 0x62b   :  { %1495 = vtanh.f32 %v928_v54 }
 0x631   :  { %v1496_v51 = vpop.eup %1495 }
 0x632   :  { %935 = vrot.lane.b32.xlu0 %v1496_v51, %s1532_s22 }
 0x63c   :  { %v774_v58 = vpop.permute.xlu0 %773 }
 0x63d   :  { %v778_v59 = vadd.f32 %v774_v58, %v758_v57 }
 0x63f   :  { %1497 = vtanh.f32 %v778_v59 }
 0x645   :  { %v1498_v61 = vpop.eup %1497 }
 0x646   :  { %785 = vrot.lane.b32.xlu1 %v1498_v61, %s1532_s22 }
 0x684   :  { %v934_v62 = vpop.permute.xlu2 %933 }
 0x685   :  { %v1769_v63 = vmul.f32 %v934_v62, %v1752_v60 }
 0x687   :  { %943 = vrot.lane.b32.xlu0 %v1769_v63, %s1534_s7 }
 0x68f   :  { %805 = vrot.lane.b32.xlu0 %v778_v59, %s1535_s8 }
 0x698   :  { %v784_v0 = vpop.permute.xlu0 %783 }
 0x699   :  { %v1775_v1 = vmul.f32 %v784_v0, %v1756_v13 }
 0x69b   :  { %793 = vrot.lane.b32.xlu1 %v1775_v1, %s1534_s7 }
 0x6a4   :  { %v936_v2 = vpop.permute.xlu0 %935 }
 0x6a5   :  { %v1779_v3 = vmul.f32 %v936_v2, %v895_v30 }
 0x6a7   :  { %945 = vrot.lane.b32.xlu1 %v1779_v3, %s1534_s7 }
 0x6af   :  { %953 = vrot.lane.b32.xlu1 %v927_v42, %s1535_s8 }
 0x6b8   :  { %v786_v60 = vpop.permute.xlu1 %785 }
 0x6b9   :  { %v1784_v4 = vmul.f32 %v786_v60, %v745_v25 }
 0x6bb   :  { %795 = vrot.lane.b32.xlu2 %v1784_v4, %s1534_s7 }
 0x6c3   :  { %803 = vrot.lane.b32.xlu2 %v777_v39, %s1535_s8 }
 0x6cb   :  { %955 = vrot.lane.b32.xlu2 %v928_v54, %s1535_s8 }
 0x6f9   :  { %v944_v6 = vpop.permute.xlu0 %943 }
 0x6fa   :  { %949 = vst.msk [vmem:[#allocation4] sm:$0xff] %vm65_vm0, %v944_v6 }
 0x701   :  { %v806_v8 = vpop.permute.xlu0 %805  ;;  %v1126_v17 = vld [vmem:[#allocation4] sm:$0xff] }
 0x702   :  { %810 = vst.msk [vmem:[#allocation3 + $0x8] sm:$0xff] %vm65_vm0, %v806_v8 }
 0x709   :  { %v980_v37 = vld [vmem:[#allocation3 + $0x8] sm:$0xff] }
 0x70d   :  { %v794_v9 = vpop.permute.xlu1 %793 }
 0x70e   :  { %799 = vst.msk [vmem:[#allocation2] sm:$0xff] %vm65_vm0, %v794_v9 }
 0x715   :  { %v796_v10 = vpop.permute.xlu2 %795  ;;  %v977_v13 = vld [vmem:[#allocation2] sm:$0xff] }
 0x716   :  { %800 = vst.msk [vmem:[#allocation2 + $0x8] sm:$0xff] %vm65_vm0, %v796_v10 }
 0x719   :  { %v946_v11 = vpop.permute.xlu1 %945 }
 0x71a   :  { %950 = vst.msk [vmem:[#allocation4 + $0x8] sm:$0xff] %vm65_vm0, %v946_v11 }
 0x71d   :  { %v804_v12 = vpop.permute.xlu2 %803  ;;  %v978_v14 = vld [vmem:[#allocation2 + $0x8] sm:$0xff] }
 0x71e   :  { %809 = vst.msk [vmem:[#allocation3] sm:$0xff] %vm65_vm0, %v804_v12  ;;  %v981_v15 = vpack.c.bf16 %v978_v14, %v977_v13 }
 0x720   :  { %1378 = vmatmul.msk.bf16.vlgmr.msrb.gmra.mxu2 %vm65_vm0, %v981_v15 }
 0x721   :  { %v954_v16 = vpop.permute.xlu1 %953  ;;  %v1127_v18 = vld [vmem:[#allocation4 + $0x8] sm:$0xff] }
 0x722   :  { %959 = vst.msk [vmem:[#allocation5] sm:$0xff] %vm65_vm0, %v954_v16  ;;  %v1130_v19 = vpack.c.bf16 %v1127_v18, %v1126_v17  ;;  %v362_v17 = vpack.c.bf16 %v1630_v50, %v1630_v50 }
 0x724   :  { %1387 = vmatmul.msk.bf16.vlgmr.msrb.gmra.mxu3 %vm65_vm0, %v1130_v19 }
 0x725   :  { %v956_v20 = vpop.permute.xlu2 %955  ;;  %v979_v38 = vld [vmem:[#allocation3] sm:$0xff] }
 0x726   :  { %960 = vst.msk [vmem:[#allocation5 + $0x8] sm:$0xff] %vm65_vm0, %v956_v20 }
 0x729   :  { %v1128_v39 = vld [vmem:[#allocation5] sm:$0xff] }
 0x72d   :  { %v1129_v40 = vld [vmem:[#allocation5 + $0x8] sm:$0xff] }
 0x7a3   :  { %v1002_v22 = vpop.f32.mrf.mxu2 }
 0x7a4   :  { %v1007_v23 = vadd.f32 %v1372_v21, %v1002_v22 }
 0x7a6   :  { %1499 = vtanh.f32 %v1007_v23  ;;  %v1379_v44 = vmul.f32 -1.442695, %v1007_v23 }
 0x7a7   :  { %v1151_v25 = vpop.f32.mrf.mxu3 }
 0x7a8   :  { %v1156_v26 = vadd.f32 %v1151_v25, %v1124_v24 }
 0x7aa   :  { %1501 = vtanh.f32 %v1156_v26  ;;  %v1388_v41 = vmul.f32 -1.442695, %v1156_v26 }
 0x7ab   :  { %v1004_v28 = vpop.f32.mrf.mxu2 }
 0x7ac   :  { %v1500_v29 = vpop.eup %1499  ;;  %v1008_v30 = vadd.f32 %v1373_v27, %v1004_v28 }
 0x7ad   :  { %1061 = vrot.lane.b32.xlu0 %v1500_v29, %s1533_s6 }
 0x7ae   :  { %1503 = vtanh.f32 %v1008_v30  ;;  %v1380_v54 = vmul.f32 -1.442695, %v1008_v30 }
 0x7af   :  { %v1153_v32 = vpop.f32.mrf.mxu3 }
 0x7b0   :  { %v1502_v33 = vpop.eup %1501  ;;  %v1157_v34 = vadd.f32 %v1153_v32, %v1125_v31 }
 0x7b1   :  { %1210 = vrot.lane.b32.xlu2 %v1502_v33, %s1533_s6 }
 0x7b2   :  { %1505 = vtanh.f32 %v1157_v34  ;;  %v1389_v58 = vmul.f32 -1.442695, %v1157_v34 }
 0x7b3   :  { %1507 = vpow2.f32 %v1388_v41 }
 0x7b4   :  { %v1504_v35 = vpop.eup %1503 }
 0x7b5   :  { %1063 = vrot.lane.b32.xlu1 %v1504_v35, %s1533_s6 }
 0x7b8   :  { %v1506_v36 = vpop.eup %1505 }
 0x7b9   :  { %1212 = vrot.lane.b32.xlu0 %v1506_v36, %s1533_s6  ;;  %1053 = vrot.lane.b32.xlu2 %v980_v37, %s1532_s22  ;;  %v1508_v42 = vpop.eup %1507 }
 0x7ba   :  { %v1164_v43 = vadd.f32 1.0, %v1508_v42 }
 0x7bc   :  { %1509 = vrcp.f32 %v1164_v43  ;;  %v1177_v2 = vand.u32 2147483648, %v1164_v43  ;;  %vm1171_vm5 = vweird.f32 %v1164_v43  ;;  %v1175_v60 = vand.u32 2147483647, %v1164_v43 }
 0x7bd   :  { %1051 = vrot.lane.b32.xlu1 %v979_v38, %s1532_s22  ;;  %1511 = vpow2.f32 %v1379_v44 }
 0x7be   :  { %1513 = vpow2.f32 %v1380_v54  ;;  %v1178_v9 = vor.u32 1.1754944e-38, %v1177_v2  ;;  %vm1176_vm7 = vcmp.eq.f32.partialorder %v1175_v60, 8.507059e+37 }
 0x7bf   :  { %1515 = vpow2.f32 %v1389_v58  ;;  %v212_v58 = vpack.c.bf16 %v1636_v52, %v1636_v52 }
 0x7c1   :  { %1200 = vrot.lane.b32.xlu0 %v1128_v39, %s1532_s22 }
 0x7c2   :  { %v1510_v45 = vpop.eup %1509 }
 0x7c3   :  { %v1167_v49 = vmul.f32 %v1510_v45, %v1164_v43  ;;  %v1512_v51 = vpop.eup %1511  ;;  %vm1172_vm4 = vweird.f32 %v1510_v45 }
 0x7c4   :  { %v1015_v59 = vadd.f32 1.0, %v1512_v51  ;;  %v1514_v62 = vpop.eup %1513  ;;  %vm1173_vm6 = vmor %vm1171_vm5, %vm1172_vm4  ;;  %vm221_vm5 = vcmask 125952  }
 0x7c5   :  { %1202 = vrot.lane.b32.xlu1 %v1129_v40, %s1532_s22  ;;  %v1168_v57 = vsub.f32 1.0, %v1167_v49  ;;  %v1016_v5 = vadd.f32 1.0, %v1514_v62  ;;  %v1516_v6 = vpop.eup %1515 }
 0x7c6   :  { %1517 = vrcp.f32 %v1015_v59  ;;  %v1165_v10 = vadd.f32 1.0, %v1516_v6  ;;  %v1028_v24 = vand.u32 2147483648, %v1015_v59  ;;  %vm1022_vm9 = vweird.f32 %v1015_v59 }
 0x7c7   :  { %v1169_v61 = vmul.f32 %v1510_v45, %v1168_v57  ;;  %1519 = vrcp.f32 %v1016_v5  ;;  %v1026_v25 = vand.u32 2147483647, %v1015_v59  ;;  %v1043_v34 = vand.u32 2147483648, %v1016_v5 }
 0x7c8   :  { %1521 = vrcp.f32 %v1165_v10  ;;  %v1029_v29 = vor.u32 1.1754944e-38, %v1028_v24  ;;  %vm1037_vm13 = vweird.f32 %v1016_v5  ;;  %v1041_v35 = vand.u32 2147483647, %v1016_v5 }
 0x7c9   :  { %v1170_v0 = vadd.f32 %v1510_v45, %v1169_v61  ;;  %vm1027_vm11 = vcmp.eq.f32.partialorder %v1026_v25, 8.507059e+37  ;;  %v1044_v38 = vor.u32 1.1754944e-38, %v1043_v34  ;;  %v1192_v39 = vand.u32 2147483648, %v1165_v10 }
 0x7ca   :  { %vm1042_vm1 = vcmp.eq.f32.partialorder %v1041_v35, 8.507059e+37  ;;  %vm1186_vm2 = vweird.f32 %v1165_v10  ;;  %v1190_v40 = vand.u32 2147483647, %v1165_v10  ;;  %v211_v57 = vpack.c.bf16 %v1622_v46, %v1622_v46 }
 0x7cb   :  { %v1174_v7 = vsel %vm1173_vm6, %v1510_v45, %v1170_v0  ;;  %v1193_v45 = vor.u32 1.1754944e-38, %v1192_v39  ;;  %v511_v61 = vpack.c.bf16 %v1701_v53, %v1701_v53  ;;  %v512_v46 = vpack.c.bf16 %v1710_v56, %v1710_v56 }
 0x7cc   :  { %v1518_v8 = vpop.eup %1517  ;;  %v1826_v12 = vsel %vm1176_vm7, %v1178_v9, %v1174_v7  ;;  %vm1191_vm4 = vcmp.eq.f32.partialorder %v1190_v40, 8.507059e+37  ;;  %v961_v24 = vpack.c.bf16 %v1769_v63, %v1769_v63 }
 0x7cd   :  { %v1018_v14 = vmul.f32 %v1518_v8, %v1015_v59  ;;  %v1520_v16 = vpop.eup %1519  ;;  %vm1023_vm8 = vweird.f32 %v1518_v8  ;;  %v361_v59 = vpack.c.bf16 %v1626_v48, %v1626_v48 }
 0x7ce   :  { %v1033_v18 = vmul.f32 %v1520_v16, %v1016_v5  ;;  %v1522_v20 = vpop.eup %1521  ;;  %vm1024_vm10 = vmor %vm1022_vm9, %vm1023_vm8  ;;  %vm1038_vm12 = vweird.f32 %v1520_v16 }
 0x7cf   :  { %v1019_v15 = vsub.f32 1.0, %v1018_v14  ;;  %v1182_v23 = vmul.f32 %v1522_v20, %v1165_v10  ;;  %vm1039_vm14 = vmor %vm1037_vm13, %vm1038_vm12  ;;  %vm1187_vm15 = vweird.f32 %v1522_v20  ;;  %v811_v14 = vpack.c.bf16 %v1775_v1, %v1775_v1 }
 0x7d0   :  { %v1034_v21 = vsub.f32 1.0, %v1033_v18  ;;  %vm1188_vm3 = vmor %vm1186_vm2, %vm1187_vm15  ;;  %v962_v18 = vpack.c.bf16 %v1779_v3, %v1779_v3 }
 0x7d1   :  { %v1020_v19 = vmul.f32 %v1518_v8, %v1019_v15  ;;  %v1183_v28 = vsub.f32 1.0, %v1182_v23 }
 0x7d2   :  { %v1035_v26 = vmul.f32 %v1520_v16, %v1034_v21 }
 0x7d3   :  { %v1021_v22 = vadd.f32 %v1518_v8, %v1020_v19  ;;  %v1184_v33 = vmul.f32 %v1522_v20, %v1183_v28 }
 0x7d4   :  { %v1036_v31 = vadd.f32 %v1520_v16, %v1035_v26 }
 0x7d5   :  { %v1025_v27 = vsel %vm1024_vm10, %v1518_v8, %v1021_v22  ;;  %v1185_v37 = vadd.f32 %v1522_v20, %v1184_v33 }
 0x7d6   :  { %v1833_v30 = vsel %vm1027_vm11, %v1029_v29, %v1025_v27  ;;  %v1040_v36 = vsel %vm1039_vm14, %v1520_v16, %v1036_v31 }
 0x7d7   :  { %v1837_v41 = vsel %vm1042_vm1, %v1044_v38, %v1040_v36  ;;  %v1189_v44 = vsel %vm1188_vm3, %v1522_v20, %v1185_v37 }
 0x7d8   :  { %v1841_v49 = vsel %vm1191_vm4, %v1193_v45, %v1189_v44 }
 0x80b   :  { %v1211_v11 = vpop.permute.xlu2 %1210 }
 0x80c   :  { %v1216_v13 = vmul.f32 %v1211_v11, %v1826_v12 }
 0x80e   :  { %1220 = vrot.lane.b32.xlu1 %v1216_v13, %s1532_s22 }
 0x813   :  { %v1054_v0 = vpop.permute.xlu2 %1053 }
 0x814   :  { %v1058_v1 = vmul.f32 %v1054_v0, %v1837_v41 }
 0x816   :  { %367 = vrot.lane.b32.xlu1 %v362_v17, %s1534_s7  ;;  %v661_v17 = vpack.c.bf16 %v1695_v47, %v1695_v47  ;;  %v812_v47 = vpack.c.bf16 %v1784_v4, %v1784_v4  ;;  %v662_v4 = vpack.c.bf16 %v1705_v55, %v1705_v55 }
 0x81f   :  { %v1062_v50 = vpop.permute.xlu0 %1061 }
 0x820   :  { %v1067_v32 = vmul.f32 %v1062_v50, %v1833_v30 }
 0x822   :  { %1071 = vrot.lane.b32.xlu2 %v1067_v32, %s1532_s22 }
 0x827   :  { %v1064_v42 = vpop.permute.xlu1 %1063 }
 0x828   :  { %v1068_v43 = vmul.f32 %v1064_v42, %v1837_v41 }
 0x82a   :  { %1073 = vrot.lane.b32.xlu0 %v1068_v43, %s1532_s22 }
 0x82b   :  { %v1213_v54 = vpop.permute.xlu0 %1212 }
 0x82c   :  { %v1217_v51 = vmul.f32 %v1213_v54, %v1841_v49 }
 0x82e   :  { %1222 = vrot.lane.b32.xlu2 %v1217_v51, %s1532_s22 }
 0x82f   :  { %v1052_v62 = vpop.permute.xlu1 %1051 }
 0x830   :  { %v1057_v2 = vmul.f32 %v1052_v62, %v1833_v30 }
 0x832   :  { %215 = vrot.lane.b32.xlu0 %v211_v57, %s1534_s7 }
 0x833   :  { %v1201_v60 = vpop.permute.xlu0 %1200 }
 0x834   :  { %v1206_v6 = vmul.f32 %v1201_v60, %v1826_v12 }
 0x836   :  { %217 = vrot.lane.b32.xlu2 %v212_v58, %s1534_s7 }
 0x837   :  { %v1203_v52 = vpop.permute.xlu1 %1202 }
 0x838   :  { %v1207_v56 = vmul.f32 %v1203_v52, %v1841_v49 }
 0x83a   :  { %365 = vrot.lane.b32.xlu0 %v361_v59, %s1534_s7 }
 0x83e   :  { %515 = vrot.lane.b32.xlu2 %v511_v61, %s1534_s7 }
 0x842   :  { %517 = vrot.lane.b32.xlu0 %v512_v46, %s1534_s7 }
 0x87c   :  { %v1072_v5 = vpop.permute.xlu2 %1071 }
 0x87d   :  { %v1077_v48 = vadd.f32 %v1072_v5, %v1057_v2 }
 0x87f   :  { %1523 = vtanh.f32 %v1077_v48 }
 0x880   :  { %v1221_v7 = vpop.permute.xlu1 %1220 }
 0x881   :  { %v1226_v53 = vadd.f32 %v1221_v7, %v1206_v6 }
 0x883   :  { %1525 = vtanh.f32 %v1226_v53 }
 0x885   :  { %v1524_v8 = vpop.eup %1523 }
 0x886   :  { %1083 = vrot.lane.b32.xlu1 %v1524_v8, %s1532_s22 }
 0x888   :  { %v368_v9 = vpop.permute.xlu1 %367  ;;  %v1223_v10 = vpop.permute.xlu2 %1222 }
 0x889   :  { %v1526_v11 = vpop.eup %1525  ;;  %1327 = vst.msk [vmem:[%s1978_s5 + $0x1c] sm:$0xf] %vm221_vm5, %v368_v9  ;;  %v1227_v13 = vadd.f32 %v1223_v10, %v1207_v56 }
 0x88a   :  { %1232 = vrot.lane.b32.xlu0 %v1526_v11, %s1532_s22 }
 0x88b   :  { %1527 = vtanh.f32 %v1227_v13 }
 0x890   :  { %v218_v15 = vpop.permute.xlu2 %217 }
 0x891   :  { %v1528_v16 = vpop.eup %1527  ;;  %223 = vst.msk [vmem:[%s1979_s4 + $0x4] sm:$0xf] %vm221_vm5, %v218_v15 }
 0x892   :  { %1234 = vrot.lane.b32.xlu1 %v1528_v16, %s1532_s22  ;;  %815 = vrot.lane.b32.xlu0 %v811_v14, %s1534_s7 }
 0x898   :  { %v516_v19 = vpop.permute.xlu2 %515 }
 0x899   :  { %1337 = vst.msk [vmem:[%s1979_s4 + $0x8] sm:$0xf] %vm221_vm5, %v516_v19 }
 0x89a   :  { %665 = vrot.lane.b32.xlu1 %v661_v17, %s1534_s7  ;;  %967 = vrot.lane.b32.xlu0 %v962_v18, %s1534_s7 }
 0x89c   :  { %v1074_v20 = vpop.permute.xlu0 %1073 }
 0x89d   :  { %v1078_v21 = vadd.f32 %v1074_v20, %v1058_v1 }
 0x89f   :  { %1529 = vtanh.f32 %v1078_v21 }
 0x8a2   :  { %817 = vrot.lane.b32.xlu1 %v812_v47, %s1534_s7  ;;  %1103 = vrot.lane.b32.xlu0 %v1077_v48, %s1535_s8 }
 0x8a4   :  { %v216_v3 = vpop.permute.xlu0 %215 }
 0x8a5   :  { %v1530_v22 = vpop.eup %1529  ;;  %222 = vst.msk [vmem:[%s1979_s4] sm:$0xf] %vm221_vm5, %v216_v3 }
 0x8a6   :  { %1085 = vrot.lane.b32.xlu2 %v1530_v22, %s1532_s22 }
 0x8aa   :  { %1252 = vrot.lane.b32.xlu0 %v1226_v53, %s1535_s8  ;;  %1105 = vrot.lane.b32.xlu1 %v1078_v21, %s1535_s8 }
 0x8ac   :  { %v366_v23 = vpop.permute.xlu0 %365 }
 0x8ad   :  { %1326 = vst.msk [vmem:[%s1978_s5 + $0x18] sm:$0xf] %vm221_vm5, %v366_v23 }
 0x8ae   :  { %667 = vrot.lane.b32.xlu2 %v662_v4, %s1534_s7 }
 0x8b4   :  { %v518_v25 = vpop.permute.xlu0 %517 }
 0x8b5   :  { %1338 = vst.msk [vmem:[%s1979_s4 + $0xc] sm:$0xf] %vm221_vm5, %v518_v25 }
 0x8b6   :  { %965 = vrot.lane.b32.xlu2 %v961_v24, %s1534_s7 }
 0x8f8   :  { %v1084_v55 = vpop.permute.xlu1 %1083 }
 0x8f9   :  { %v1089_v26 = vmul.f32 %v1084_v55, %v1833_v30 }
 0x8fb   :  { %v1111_v27 = vpack.c.bf16 %v1089_v26, %v1089_v26  ;;  %1093 = vrot.lane.b32.xlu1 %v1089_v26, %s1534_s7 }
 0x8fc   :  { %v1233_v28 = vpop.permute.xlu0 %1232 }
 0x8fd   :  { %1115 = vrot.lane.b32.xlu2 %v1111_v27, %s1534_s7  ;;  %v1238_v63 = vmul.f32 %v1233_v28, %v1826_v12 }
 0x8ff   :  { %v1260_v38 = vpack.c.bf16 %v1238_v63, %v1238_v63 }
 0x900   :  { %v1086_v29 = vpop.permute.xlu2 %1085 }
 0x901   :  { %v1090_v50 = vmul.f32 %v1086_v29, %v1837_v41 }
 0x903   :  { %v1112_v31 = vpack.c.bf16 %v1090_v50, %v1090_v50  ;;  %1242 = vrot.lane.b32.xlu1 %v1238_v63, %s1534_s7 }
 0x904   :  { %v1235_v32 = vpop.permute.xlu1 %1234  ;;  %v816_v33 = vpop.permute.xlu0 %815 }
 0x905   :  { %1359 = vst.msk [vmem:[%s1979_s4 + $0x10] sm:$0xf] %vm221_vm5, %v816_v33  ;;  %1095 = vrot.lane.b32.xlu2 %v1090_v50, %s1534_s7  ;;  %1117 = vrot.lane.b32.xlu0 %v1112_v31, %s1534_s7  ;;  %v1239_v30 = vmul.f32 %v1235_v32, %v1841_v49 }
 0x907   :  { %v1261_v12 = vpack.c.bf16 %v1239_v30, %v1239_v30 }
 0x908   :  { %v668_v34 = vpop.permute.xlu2 %667 }
 0x909   :  { %1349 = vst.msk [vmem:[%s1978_s5 + $0x14] sm:$0xf] %vm221_vm5, %v668_v34 }
 0x90b   :  { %1254 = vrot.lane.b32.xlu1 %v1227_v13, %s1535_s8 }
 0x90c   :  { %v666_v35 = vpop.permute.xlu1 %665  ;;  %v968_v36 = vpop.permute.xlu0 %967 }
 0x90d   :  { %1348 = vst.msk [vmem:[%s1978_s5 + $0x10] sm:$0xf] %vm221_vm5, %v666_v35  ;;  %1244 = vrot.lane.b32.xlu2 %v1239_v30, %s1534_s7  ;;  %1266 = vrot.lane.b32.xlu0 %v1261_v12, %s1534_s7 }
 0x90e   :  { %1371 = vst.msk [vmem:[%s1978_s5 + $0xc] sm:$0xf] %vm221_vm5, %v968_v36 }
 0x910   :  { %v966_v37 = vpop.permute.xlu2 %965 }
 0x911   :  { %1370 = vst.msk [vmem:[%s1978_s5 + $0x8] sm:$0xf] %vm221_vm5, %v966_v37 }
 0x914   :  { %v818_v39 = vpop.permute.xlu1 %817  ;;  %v1104_v40 = vpop.permute.xlu0 %1103 }
 0x915   :  { %1360 = vst.msk [vmem:[%s1979_s4 + $0x14] sm:$0xf] %vm221_vm5, %v818_v39  ;;  %1264 = vrot.lane.b32.xlu2 %v1260_v38, %s1534_s7 }
 0x916   :  { %1109 = vst.msk [vmem:[#allocation3] sm:$0xff] %vm65_vm0, %v1104_v40 }
 0x91c   :  { %v1106_v41 = vpop.permute.xlu1 %1105  ;;  %v1253_v42 = vpop.permute.xlu0 %1252 }
 0x91d   :  { %1110 = vst.msk [vmem:[#allocation3 + $0x8] sm:$0xff] %vm65_vm0, %v1106_v41 }
 0x91e   :  { %1258 = vst.msk [vmem:[#allocation5] sm:$0xff] %vm65_vm0, %v1253_v42 }
 0x957   :  { %v1116_v43 = vpop.permute.xlu2 %1115 }
 0x958   :  { %1381 = vst.msk [vmem:[%s1979_s4 + $0x18] sm:$0xf] %vm221_vm5, %v1116_v43 }
 0x95f   :  { %v1096_v44 = vpop.permute.xlu2 %1095 }
 0x960   :  { %1100 = vst.msk [vmem:[#allocation2 + $0x8] sm:$0xff] %vm65_vm0, %v1096_v44 }
 0x967   :  { %v1245_v45 = vpop.permute.xlu2 %1244 }
 0x968   :  { %1249 = vst.msk [vmem:[#allocation4 + $0x8] sm:$0xff] %vm65_vm0, %v1245_v45 }
 0x96d   :  { %v1094_v49 = vpop.permute.xlu1 %1093 }
 0x96e   :  { %1099 = vst.msk [vmem:[#allocation2] sm:$0xff] %vm65_vm0, %v1094_v49 }
 0x96f   :  { %v1265_v54 = vpop.permute.xlu2 %1264 }
 0x970   :  { %1270 = vst.msk [vmem:[%s1978_s5] sm:$0xf] %vm221_vm5, %v1265_v54 }
 0x975   :  { %v1243_v51 = vpop.permute.xlu1 %1242 }
 0x976   :  { %1248 = vst.msk [vmem:[#allocation4] sm:$0xff] %vm65_vm0, %v1243_v51 }
 0x977   :  { %v1118_v57 = vpop.permute.xlu0 %1117 }
 0x978   :  { %1382 = vst.msk [vmem:[%s1979_s4 + $0x1c] sm:$0xf] %vm221_vm5, %v1118_v57 }
 0x97d   :  { %v1255_v58 = vpop.permute.xlu1 %1254 }
 0x97e   :  { %1259 = vst.msk [vmem:[#allocation5 + $0x8] sm:$0xff] %vm65_vm0, %v1255_v58 }
 0x97f   :  { %v1267_v59 = vpop.permute.xlu0 %1266 }
 0x980   :  { %1271 = vst.msk [vmem:[%s1978_s5 + $0x4] sm:$0xf] %vm221_vm5, %v1267_v59 }

</bundles_post_ra>
